<compile_context>
chip_gen: v7x
topology: tpu7x:2x2x1
jax: 0.10.0
libtpu: 0.0.40
codegen_flags: <defaults>
</compile_context>

<pallas_src>
import jax
import jax.numpy as jnp
from jax import lax
from jax.experimental import pallas as pl
from jax.experimental.pallas import tpu as pltpu

NUM_KEYPOINTS = 136
K_PAD = 256                  # keypoint lanes padded to a 128-multiple
FRAMES_PER_SAMPLE = 64       # T
AUDIO_T = 418
AUDIO_T_PAD = 424            # 8-aligned spectrogram-time padding
AUDIO_MEL = 64
ENC_DIM = 32
HID = 64
N_SCORE = 16                 # discriminator outputs 16 temporal realism scores
SCORE_PAD = 128              # lane-dense score writeback


# ----------------------------------------------------------------------------
# Fused kernel: encoder + generator + discriminator(real) + discriminator(fake)
# ----------------------------------------------------------------------------
def fused_train_d_kernel(
        pose_ref, audio_ref,
        ew1_ref, eb1_ref, ew2_ref, eb2_ref,
        gwt_ref, gwa_ref, gwe_ref, gbh_ref, gwo_ref, gbo_ref,
        dw1_ref, db1_ref, dpool_ref, dw2_ref,
        out_ref,
        x_scr, hg_scr):
    B, T, Kp = pose_ref.shape                 # (B, 64, 256)
    H = gwa_ref.shape[1]
    f32 = jnp.float32

    real3 = pose_ref[...]                     # (B, T, Kp)
    image = real3[:, 0, :]                    # (B, Kp) seed frame (t = 0)

    # ---------------- ImageEncoderPIV (torch.no_grad in reference) ----------
    he = jnp.maximum(
        jnp.dot(image, ew1_ref[...], preferred_element_type=f32) + eb1_ref[...],
        0.0)                                                        # (B, 64)
    enc = jnp.dot(he, ew2_ref[...], preferred_element_type=f32) + eb2_ref[...]  # (B, 32)

    # ---------------- Generator (torch.no_grad in reference) ----------------
    # Reassociated: gwt @ (audio @ gwa); audio@gwa batched over all samples.
    ag = jnp.dot(audio_ref[...], gwa_ref[...],
                 preferred_element_type=f32)                        # (B*424, H)
    bias = jnp.dot(enc, gwe_ref[...],
                   preferred_element_type=f32) + gbh_ref[...]       # (B, H), hoisted
    gwt = gwt_ref[...]                                              # (T, 424)

    for n in range(B):       # per-sample: only the 424-long time contraction
        ff = jnp.dot(gwt, ag[n * AUDIO_T_PAD:(n + 1) * AUDIO_T_PAD, :],
                     preferred_element_type=f32)                    # (T, H)
        hg_scr[n * T:(n + 1) * T, :] = jnp.maximum(ff + bias[n:n + 1, :], 0.0)

    delta = jnp.dot(hg_scr[...], gwo_ref[...],
                    preferred_element_type=f32) + gbo_ref[...]      # (B*T, Kp)

    # -------- pack real + fake rows into the shared discriminator scratch ---
    x_scr[0:B * T, :] = real3.reshape(B * T, Kp)
    for n in range(B):
        x_scr[(B + n) * T:(B + n + 1) * T, :] = (
            image[n:n + 1, :] + delta[n * T:(n + 1) * T, :])        # seed + offsets

    # -------- Discriminator on real and fake poses together (M = 2*B*T) -----
    # keypoint gating is pre-folded into dw1 (one-time weight transform).
    x = x_scr[...]                                                  # (2*B*T, Kp)
    shifted = pltpu.roll(x, shift=1, axis=0)
    row = lax.broadcasted_iota(jnp.int32, x.shape, 0)
    motion = jnp.where((row % T) == 0, 0.0, x - shifted)            # temporal diff
    h = jnp.dot(motion, dw1_ref[...], preferred_element_type=f32) + db1_ref[...]
    h = jnp.where(h > 0.0, h, 0.2 * h)                              # leaky relu

    # pool stage: per-row (h . w2) lane-reduce, then 4-frame block pooling as a
    # lane-dense (2*B, T) @ (T, 128) matmul (scores live in lanes 0..15).
    hv = jnp.sum((h * dw2_ref[...]).reshape(2 * B, T, H), axis=-1)  # (2*B, T)
    out_ref[...] = jnp.dot(hv, dpool_ref[...],
                           preferred_element_type=f32)              # (2*B, 128)


# ----------------------------------------------------------------------------
# Audio2Keypoint._train_D (the default `mode` of forward())
# ----------------------------------------------------------------------------
@jax.jit
def audio2keypoint_train_D(audio_spect, real_pose, params):
    """
    audio_spect : (B, 1, 418, 64)   real_pose : (B, 136, 64)
    returns (real_score, fake_score), each (B, 16)
    """
    B = audio_spect.shape[0]
    T = FRAMES_PER_SAMPLE

    # TODO(synk): these are thin XLA layout ops in front of the fused kernel;
    # fold into the data producer if it can emit (B, 64, K) / time-padded
    # spectrogram layouts directly.
    audio = jnp.pad(audio_spect[:, 0],
                    ((0, 0), (0, AUDIO_T_PAD - AUDIO_T), (0, 0)))
    audio = audio.reshape(B * AUDIO_T_PAD, AUDIO_MEL)               # (B*424, 64)
    pose = jnp.pad(jnp.transpose(real_pose, (0, 2, 1)),
                   ((0, 0), (0, 0), (0, K_PAD - NUM_KEYPOINTS)))    # (B, 64, 256)

    names = ['enc_w1', 'enc_b1', 'enc_w2', 'enc_b2',
             'gen_wt', 'gen_wa', 'gen_we', 'gen_bh', 'gen_wo', 'gen_bo',
             'dis_w1', 'dis_b1', 'dis_poolT', 'dis_w2']

    const2 = lambda i: (0, 0)
    const3 = lambda i: (0, 0, 0)
    weight_specs = [pl.BlockSpec(params[n].shape, const2) for n in names]

    flops = 2 * (B * K_PAD * 64 + B * 64 * ENC_DIM + B * ENC_DIM * HID
                 + B * AUDIO_T_PAD * AUDIO_MEL * HID          # audio @ gwa
                 + B * T * AUDIO_T_PAD * HID                  # gwt contraction
                 + B * T * HID * K_PAD                        # gwo
                 + 2 * B * T * K_PAD * HID                    # discriminator dw1
                 + 2 * B * T * SCORE_PAD)                     # pooling
    bytes_accessed = 4 * (pose.size + audio.size
                          + sum(int(params[n].size) for n in names)
                          + 2 * B * SCORE_PAD)

    out = pl.pallas_call(
        fused_train_d_kernel,
        out_shape=jax.ShapeDtypeStruct((2 * B, SCORE_PAD), jnp.float32),
        grid_spec=pltpu.PrefetchScalarGridSpec(
            num_scalar_prefetch=0,
            grid=(1,),
            in_specs=[
                pl.BlockSpec((B, T, K_PAD), const3),
                pl.BlockSpec((B * AUDIO_T_PAD, AUDIO_MEL), const2),
            ] + weight_specs,
            out_specs=pl.BlockSpec((2 * B, SCORE_PAD), const2),
            scratch_shapes=[
                pltpu.VMEM((2 * B * T, K_PAD), jnp.float32),   # real+fake rows
                pltpu.VMEM((B * T, HID), jnp.float32),         # generator hidden
            ]),
        compiler_params=pltpu.CompilerParams(dimension_semantics=("arbitrary",)),
        cost_estimate=pl.CostEstimate(flops=flops, transcendentals=0,
                                      bytes_accessed=bytes_accessed),
    )(pose, audio, *[params[n] for n in names])

    real_score = out[:B, :N_SCORE]                              # (B, 16)
    fake_score = out[B:, :N_SCORE]                              # (B, 16)
    return real_score, fake_score


# ----------------------------------------------------------------------------
# Deterministic parameter initialization (Glorot, as in __init_weights) plus a
# ONE-TIME TPU-layout prep (padding, keypoint-gating fold, fixed pooling).
# ----------------------------------------------------------------------------
def xavier_uniform(key, shape):
    fan_in, fan_out = shape[0], shape[-1]
    bound = (6.0 / (fan_in + fan_out)) ** 0.5
    return jax.random.uniform(key, shape, jnp.float32, -bound, bound)


def init_params(key):
    keys = jax.random.split(key, 8)
    return {
        # ImageEncoderPIV
        'enc_w1': xavier_uniform(keys[0], (NUM_KEYPOINTS, 64)),
        'enc_b1': jnp.zeros((1, 64), jnp.float32),
        'enc_w2': xavier_uniform(keys[1], (64, ENC_DIM)),
        'enc_b2': jnp.zeros((1, ENC_DIM), jnp.float32),
        # Generator
        'gen_wt': xavier_uniform(keys[2], (FRAMES_PER_SAMPLE, AUDIO_T)),
        'gen_wa': xavier_uniform(keys[3], (AUDIO_MEL, HID)),
        'gen_we': xavier_uniform(keys[4], (ENC_DIM, HID)),
        'gen_bh': jnp.zeros((1, HID), jnp.float32),
        'gen_wo': xavier_uniform(keys[5], (HID, NUM_KEYPOINTS)),
        'gen_bo': jnp.zeros((1, NUM_KEYPOINTS), jnp.float32),
        # Discriminator
        'dis_w1': xavier_uniform(keys[6], (NUM_KEYPOINTS, HID)),
        'dis_b1': jnp.zeros((1, HID), jnp.float32),
        'dis_w2': xavier_uniform(keys[7], (1, HID)),
    }


def prepare_params(params, keypoints):
    """One-time weight transforms: zero-pad to lane-friendly shapes, fold the
    fixed keypoint gating into dis_w1, pad gen_wt time 418->424, and build the
    fixed 4-frame block-average pooling matrix (transposed + lane-padded)."""
    pad_k = K_PAD - NUM_KEYPOINTS
    p = dict(params)
    p['enc_w1'] = jnp.pad(params['enc_w1'], ((0, pad_k), (0, 0)))          # (256, 64)
    p['gen_wt'] = jnp.pad(params['gen_wt'],
                          ((0, 0), (0, AUDIO_T_PAD - AUDIO_T)))            # (64, 424)
    p['gen_wo'] = jnp.pad(params['gen_wo'], ((0, 0), (0, pad_k)))          # (64, 256)
    p['gen_bo'] = jnp.pad(params['gen_bo'], ((0, 0), (0, pad_k)))          # (1, 256)
    # (motion * kp) @ w1  ==  motion @ (diag(kp) @ w1)  -- fold once here.
    kp = keypoints.reshape(NUM_KEYPOINTS, 1).astype(jnp.float32)
    p['dis_w1'] = jnp.pad(kp * params['dis_w1'], ((0, pad_k), (0, 0)))     # (256, 64)
    # fixed 4-frame block-average pooling (64 frames -> 16 windows), stored
    # transposed + lane-padded so scores land in lanes 0..15 of a 128 tile.
    win = jnp.arange(N_SCORE)[:, None]
    frm = jnp.arange(FRAMES_PER_SAMPLE)[None, :]
    pool = jnp.where(frm // (FRAMES_PER_SAMPLE // N_SCORE) == win,
                     0.25, 0.0).astype(jnp.float32)
    p['dis_poolT'] = jnp.pad(pool.T, ((0, 0), (0, SCORE_PAD - N_SCORE)))   # (64, 128)
    return p


if __name__ == "__main__":
    key = jax.random.PRNGKey(0)
    k_audio, k_pose, k_params = jax.random.split(key, 3)

    B = 2
    audio_spect = jax.random.normal(k_audio, (B, 1, AUDIO_T, AUDIO_MEL), jnp.float32)
    real_pose = jax.random.normal(k_pose, (B, NUM_KEYPOINTS, FRAMES_PER_SAMPLE),
                                  jnp.float32)

    # registered buffer `keypoints` (get_training_keypoints()): deterministic
    # per-keypoint gating weights (all keypoints used).
    keypoints = jnp.ones((NUM_KEYPOINTS,), jnp.float32)

    params = prepare_params(init_params(k_params), keypoints)

    real_score, fake_score = audio2keypoint_train_D(audio_spect, real_pose, params)
    jax.block_until_ready((real_score, fake_score))

    assert real_score.shape == (B, N_SCORE), real_score.shape
    assert fake_score.shape == (B, N_SCORE), fake_score.shape
    assert bool(jnp.all(jnp.isfinite(real_score)))
    assert bool(jnp.all(jnp.isfinite(fake_score)))
    print("KERNEL_OK")
</pallas_src>

<mosaic_0001>
module attributes {stable_mosaic.version = 11 : i64} {
  func.func @fused_train_d_kernel(%arg0: i32, %arg1: memref<2x64x256xf32, #tpu.memory_space<vmem>>, %arg2: memref<848x64xf32, #tpu.memory_space<vmem>>, %arg3: memref<256x64xf32, #tpu.memory_space<vmem>>, %arg4: memref<1x64xf32, #tpu.memory_space<vmem>>, %arg5: memref<64x32xf32, #tpu.memory_space<vmem>>, %arg6: memref<1x32xf32, #tpu.memory_space<vmem>>, %arg7: memref<64x424xf32, #tpu.memory_space<vmem>>, %arg8: memref<64x64xf32, #tpu.memory_space<vmem>>, %arg9: memref<32x64xf32, #tpu.memory_space<vmem>>, %arg10: memref<1x64xf32, #tpu.memory_space<vmem>>, %arg11: memref<64x256xf32, #tpu.memory_space<vmem>>, %arg12: memref<1x256xf32, #tpu.memory_space<vmem>>, %arg13: memref<256x64xf32, #tpu.memory_space<vmem>>, %arg14: memref<1x64xf32, #tpu.memory_space<vmem>>, %arg15: memref<64x128xf32, #tpu.memory_space<vmem>>, %arg16: memref<1x64xf32, #tpu.memory_space<vmem>>, %arg17: memref<4x128xf32, #tpu.memory_space<vmem>>, %arg18: memref<256x256xf32, #tpu.memory_space<vmem>>, %arg19: memref<128x64xf32, #tpu.memory_space<vmem>>) attributes {dimension_semantics = [#tpu.dimension_semantics<arbitrary>], iteration_bounds = array<i64: 1>, scalar_prefetch = 0 : i64, scratch_operands = 2 : i64, tpu.core_type = #tpu.core_type<tc>, window_params = [{pipeline_mode = #tpu.pipeline_mode<synchronous>, transform_indices = @transform_0, window_bounds = array<i64: 2, 64, 256>}, {pipeline_mode = #tpu.pipeline_mode<synchronous>, transform_indices = @transform_1, window_bounds = array<i64: 848, 64>}, {pipeline_mode = #tpu.pipeline_mode<synchronous>, transform_indices = @transform_2, window_bounds = array<i64: 256, 64>}, {pipeline_mode = #tpu.pipeline_mode<synchronous>, transform_indices = @transform_3, window_bounds = array<i64: 1, 64>}, {pipeline_mode = #tpu.pipeline_mode<synchronous>, transform_indices = @transform_4, window_bounds = array<i64: 64, 32>}, {pipeline_mode = #tpu.pipeline_mode<synchronous>, transform_indices = @transform_5, window_bounds = array<i64: 1, 32>}, {pipeline_mode = #tpu.pipeline_mode<synchronous>, transform_indices = @transform_6, window_bounds = array<i64: 64, 424>}, {pipeline_mode = #tpu.pipeline_mode<synchronous>, transform_indices = @transform_7, window_bounds = array<i64: 64, 64>}, {pipeline_mode = #tpu.pipeline_mode<synchronous>, transform_indices = @transform_8, window_bounds = array<i64: 32, 64>}, {pipeline_mode = #tpu.pipeline_mode<synchronous>, transform_indices = @transform_9, window_bounds = array<i64: 1, 64>}, {pipeline_mode = #tpu.pipeline_mode<synchronous>, transform_indices = @transform_10, window_bounds = array<i64: 64, 256>}, {pipeline_mode = #tpu.pipeline_mode<synchronous>, transform_indices = @transform_11, window_bounds = array<i64: 1, 256>}, {pipeline_mode = #tpu.pipeline_mode<synchronous>, transform_indices = @transform_12, window_bounds = array<i64: 256, 64>}, {pipeline_mode = #tpu.pipeline_mode<synchronous>, transform_indices = @transform_13, window_bounds = array<i64: 1, 64>}, {pipeline_mode = #tpu.pipeline_mode<synchronous>, transform_indices = @transform_14, window_bounds = array<i64: 64, 128>}, {pipeline_mode = #tpu.pipeline_mode<synchronous>, transform_indices = @transform_15, window_bounds = array<i64: 1, 64>}, {pipeline_mode = #tpu.pipeline_mode<synchronous>, transform_indices = @transform_16, window_bounds = array<i64: 4, 128>}]} {
    %c0 = arith.constant 0 : index
    %c0_0 = arith.constant 0 : index
    %c0_1 = arith.constant 0 : index
    %0 = vector.load %arg1[%c0, %c0_0, %c0_1] : memref<2x64x256xf32, #tpu.memory_space<vmem>>, vector<2x64x256xf32>
    %1 = vector.extract_strided_slice %0 {offsets = [0, 0, 0], sizes = [2, 1, 256], strides = [1, 1, 1]} : vector<2x64x256xf32> to vector<2x1x256xf32>
    %2 = vector.shape_cast %1 : vector<2x1x256xf32> to vector<2x256xf32>
    %c0_2 = arith.constant 0 : index
    %c0_3 = arith.constant 0 : index
    %3 = vector.load %arg3[%c0_2, %c0_3] : memref<256x64xf32, #tpu.memory_space<vmem>>, vector<256x64xf32>
    %cst = arith.constant dense<0.000000e+00> : vector<2x64xf32>
    %4 = tpu.matmul %2, %3, %cst {dimension_numbers = #tpu.dot_dimension_numbers<[1], [0], [0], [1], [0, 0, 1, 1], [], []>} : vector<2x256xf32>, vector<256x64xf32>, vector<2x64xf32> -> vector<2x64xf32>
    %c0_4 = arith.constant 0 : index
    %c0_5 = arith.constant 0 : index
    %5 = vector.load %arg4[%c0_4, %c0_5] : memref<1x64xf32, #tpu.memory_space<vmem>>, vector<1x64xf32>
    %6 = vector.broadcast %5 : vector<1x64xf32> to vector<2x64xf32>
    %7 = arith.addf %4, %6 : vector<2x64xf32>
    %cst_6 = arith.constant 0.000000e+00 : f32
    %8 = vector.broadcast %cst_6 : f32 to vector<2x64xf32>
    %9 = arith.maximumf %7, %8 : vector<2x64xf32>
    %c0_7 = arith.constant 0 : index
    %c0_8 = arith.constant 0 : index
    %10 = vector.load %arg5[%c0_7, %c0_8] : memref<64x32xf32, #tpu.memory_space<vmem>>, vector<64x32xf32>
    %cst_9 = arith.constant dense<0.000000e+00> : vector<2x32xf32>
    %11 = tpu.matmul %9, %10, %cst_9 {dimension_numbers = #tpu.dot_dimension_numbers<[1], [0], [0], [1], [0, 0, 1, 1], [], []>} : vector<2x64xf32>, vector<64x32xf32>, vector<2x32xf32> -> vector<2x32xf32>
    %c0_10 = arith.constant 0 : index
    %c0_11 = arith.constant 0 : index
    %12 = vector.load %arg6[%c0_10, %c0_11] : memref<1x32xf32, #tpu.memory_space<vmem>>, vector<1x32xf32>
    %13 = vector.broadcast %12 : vector<1x32xf32> to vector<2x32xf32>
    %14 = arith.addf %11, %13 : vector<2x32xf32>
    %c0_12 = arith.constant 0 : index
    %c0_13 = arith.constant 0 : index
    %15 = vector.load %arg2[%c0_12, %c0_13] : memref<848x64xf32, #tpu.memory_space<vmem>>, vector<848x64xf32>
    %c0_14 = arith.constant 0 : index
    %c0_15 = arith.constant 0 : index
    %16 = vector.load %arg8[%c0_14, %c0_15] : memref<64x64xf32, #tpu.memory_space<vmem>>, vector<64x64xf32>
    %cst_16 = arith.constant dense<0.000000e+00> : vector<848x64xf32>
    %17 = tpu.matmul %15, %16, %cst_16 {dimension_numbers = #tpu.dot_dimension_numbers<[1], [0], [0], [1], [0, 0, 1, 1], [], []>} : vector<848x64xf32>, vector<64x64xf32>, vector<848x64xf32> -> vector<848x64xf32>
    %c0_17 = arith.constant 0 : index
    %c0_18 = arith.constant 0 : index
    %18 = vector.load %arg9[%c0_17, %c0_18] : memref<32x64xf32, #tpu.memory_space<vmem>>, vector<32x64xf32>
    %cst_19 = arith.constant dense<0.000000e+00> : vector<2x64xf32>
    %19 = tpu.matmul %14, %18, %cst_19 {dimension_numbers = #tpu.dot_dimension_numbers<[1], [0], [0], [1], [0, 0, 1, 1], [], []>} : vector<2x32xf32>, vector<32x64xf32>, vector<2x64xf32> -> vector<2x64xf32>
    %c0_20 = arith.constant 0 : index
    %c0_21 = arith.constant 0 : index
    %20 = vector.load %arg10[%c0_20, %c0_21] : memref<1x64xf32, #tpu.memory_space<vmem>>, vector<1x64xf32>
    %21 = vector.broadcast %20 : vector<1x64xf32> to vector<2x64xf32>
    %22 = arith.addf %19, %21 : vector<2x64xf32>
    %c0_22 = arith.constant 0 : index
    %c0_23 = arith.constant 0 : index
    %23 = vector.load %arg7[%c0_22, %c0_23] : memref<64x424xf32, #tpu.memory_space<vmem>>, vector<64x424xf32>
    %24 = vector.extract_strided_slice %17 {offsets = [0, 0], sizes = [424, 64], strides = [1, 1]} : vector<848x64xf32> to vector<424x64xf32>
    %cst_24 = arith.constant dense<0.000000e+00> : vector<64x64xf32>
    %25 = tpu.matmul %23, %24, %cst_24 {dimension_numbers = #tpu.dot_dimension_numbers<[1], [0], [0], [1], [0, 0, 1, 1], [], []>} : vector<64x424xf32>, vector<424x64xf32>, vector<64x64xf32> -> vector<64x64xf32>
    %26 = vector.extract_strided_slice %22 {offsets = [0, 0], sizes = [1, 64], strides = [1, 1]} : vector<2x64xf32> to vector<1x64xf32>
    %27 = vector.broadcast %26 : vector<1x64xf32> to vector<64x64xf32>
    %28 = arith.addf %25, %27 : vector<64x64xf32>
    %cst_25 = arith.constant 0.000000e+00 : f32
    %29 = vector.broadcast %cst_25 : f32 to vector<64x64xf32>
    %30 = arith.maximumf %28, %29 : vector<64x64xf32>
    %c0_26 = arith.constant 0 : index
    %c0_27 = arith.constant 0 : index
    %31 = vector.load %arg19[%c0_26, %c0_27] : memref<128x64xf32, #tpu.memory_space<vmem>>, vector<64x64xf32>
    tpu.vector_store %arg19[%c0_26, %c0_27], %30 {strides = array<i32>} : memref<128x64xf32, #tpu.memory_space<vmem>>, vector<64x64xf32>,
    %32 = vector.extract_strided_slice %17 {offsets = [424, 0], sizes = [424, 64], strides = [1, 1]} : vector<848x64xf32> to vector<424x64xf32>
    %cst_28 = arith.constant dense<0.000000e+00> : vector<64x64xf32>
    %33 = tpu.matmul %23, %32, %cst_28 {dimension_numbers = #tpu.dot_dimension_numbers<[1], [0], [0], [1], [0, 0, 1, 1], [], []>} : vector<64x424xf32>, vector<424x64xf32>, vector<64x64xf32> -> vector<64x64xf32>
    %34 = vector.extract_strided_slice %22 {offsets = [1, 0], sizes = [1, 64], strides = [1, 1]} : vector<2x64xf32> to vector<1x64xf32>
    %35 = vector.broadcast %34 : vector<1x64xf32> to vector<64x64xf32>
    %36 = arith.addf %33, %35 : vector<64x64xf32>
    %cst_29 = arith.constant 0.000000e+00 : f32
    %37 = vector.broadcast %cst_29 : f32 to vector<64x64xf32>
    %38 = arith.maximumf %36, %37 : vector<64x64xf32>
    %c64 = arith.constant 64 : index
    %c0_30 = arith.constant 0 : index
    %39 = vector.load %arg19[%c64, %c0_30] : memref<128x64xf32, #tpu.memory_space<vmem>>, vector<64x64xf32>
    tpu.vector_store %arg19[%c64, %c0_30], %38 {strides = array<i32>} : memref<128x64xf32, #tpu.memory_space<vmem>>, vector<64x64xf32>,
    %c0_31 = arith.constant 0 : index
    %c0_32 = arith.constant 0 : index
    %40 = vector.load %arg19[%c0_31, %c0_32] : memref<128x64xf32, #tpu.memory_space<vmem>>, vector<128x64xf32>
    %c0_33 = arith.constant 0 : index
    %c0_34 = arith.constant 0 : index
    %41 = vector.load %arg11[%c0_33, %c0_34] : memref<64x256xf32, #tpu.memory_space<vmem>>, vector<64x256xf32>
    %cst_35 = arith.constant dense<0.000000e+00> : vector<128x256xf32>
    %42 = tpu.matmul %40, %41, %cst_35 {dimension_numbers = #tpu.dot_dimension_numbers<[1], [0], [0], [1], [0, 0, 1, 1], [], []>} : vector<128x64xf32>, vector<64x256xf32>, vector<128x256xf32> -> vector<128x256xf32>
    %c0_36 = arith.constant 0 : index
    %c0_37 = arith.constant 0 : index
    %43 = vector.load %arg12[%c0_36, %c0_37] : memref<1x256xf32, #tpu.memory_space<vmem>>, vector<1x256xf32>
    %44 = vector.broadcast %43 : vector<1x256xf32> to vector<128x256xf32>
    %45 = arith.addf %42, %44 : vector<128x256xf32>
    %46 = vector.shape_cast %0 : vector<2x64x256xf32> to vector<128x256xf32>
    %c0_38 = arith.constant 0 : index
    %c0_39 = arith.constant 0 : index
    %47 = vector.load %arg18[%c0_38, %c0_39] : memref<256x256xf32, #tpu.memory_space<vmem>>, vector<128x256xf32>
    tpu.vector_store %arg18[%c0_38, %c0_39], %46 {strides = array<i32>} : memref<256x256xf32, #tpu.memory_space<vmem>>, vector<128x256xf32>,
    %48 = vector.extract_strided_slice %2 {offsets = [0, 0], sizes = [1, 256], strides = [1, 1]} : vector<2x256xf32> to vector<1x256xf32>
    %49 = vector.extract_strided_slice %45 {offsets = [0, 0], sizes = [64, 256], strides = [1, 1]} : vector<128x256xf32> to vector<64x256xf32>
    %50 = vector.broadcast %48 : vector<1x256xf32> to vector<64x256xf32>
    %51 = arith.addf %50, %49 : vector<64x256xf32>
    %c128 = arith.constant 128 : index
    %c0_40 = arith.constant 0 : index
    %52 = vector.load %arg18[%c128, %c0_40] : memref<256x256xf32, #tpu.memory_space<vmem>>, vector<64x256xf32>
    tpu.vector_store %arg18[%c128, %c0_40], %51 {strides = array<i32>} : memref<256x256xf32, #tpu.memory_space<vmem>>, vector<64x256xf32>,
    %53 = vector.extract_strided_slice %2 {offsets = [1, 0], sizes = [1, 256], strides = [1, 1]} : vector<2x256xf32> to vector<1x256xf32>
    %54 = vector.extract_strided_slice %45 {offsets = [64, 0], sizes = [64, 256], strides = [1, 1]} : vector<128x256xf32> to vector<64x256xf32>
    %55 = vector.broadcast %53 : vector<1x256xf32> to vector<64x256xf32>
    %56 = arith.addf %55, %54 : vector<64x256xf32>
    %c192 = arith.constant 192 : index
    %c0_41 = arith.constant 0 : index
    %57 = vector.load %arg18[%c192, %c0_41] : memref<256x256xf32, #tpu.memory_space<vmem>>, vector<64x256xf32>
    tpu.vector_store %arg18[%c192, %c0_41], %56 {strides = array<i32>} : memref<256x256xf32, #tpu.memory_space<vmem>>, vector<64x256xf32>,
    %c0_42 = arith.constant 0 : index
    %c0_43 = arith.constant 0 : index
    %58 = vector.load %arg18[%c0_42, %c0_43] : memref<256x256xf32, #tpu.memory_space<vmem>>, vector<256x256xf32>
    %c1_i32 = arith.constant 1 : i32
    %59 = tpu.dynamic_rotate %58 by %c1_i32 dim 0 : vector<256x256xf32>, i32 -> vector<256x256xf32>
    %60 = tpu.iota {dimensions = array<i32: 0>} : vector<256x256xi32>
    %c64_i32 = arith.constant 64 : i32
    %c0_i32 = arith.constant 0 : i32
    %61 = arith.cmpi eq, %c64_i32, %c0_i32 : i32
    %c1_i32_44 = arith.constant 1 : i32
    %62 = arith.select %61, %c1_i32_44, %c64_i32 : i32
    %63 = vector.broadcast %62 : i32 to vector<256x256xi32>
    %64 = arith.remsi %60, %63 : vector<256x256xi32>
    %c0_i32_45 = arith.constant 0 : i32
    %65 = vector.broadcast %c0_i32_45 : i32 to vector<256x256xi32>
    %66 = arith.cmpi ne, %64, %65 : vector<256x256xi32>
    %c0_i32_46 = arith.constant 0 : i32
    %67 = vector.broadcast %c0_i32_46 : i32 to vector<256x256xi32>
    %68 = arith.cmpi slt, %64, %67 : vector<256x256xi32>
    %c0_i32_47 = arith.constant 0 : i32
    %69 = arith.cmpi slt, %62, %c0_i32_47 : i32
    %70 = vector.broadcast %69 : i1 to vector<256x256xi1>
    %71 = vector.broadcast %70 : vector<256x256xi1> to vector<256x256xi1>
    %72 = arith.xori %68, %71 : vector<256x256xi1>
    %73 = arith.andi %72, %66 : vector<256x256xi1>
    %74 = vector.broadcast %62 : i32 to vector<256x256xi32>
    %75 = arith.addi %64, %74 : vector<256x256xi32>
    %76 = arith.select %73, %75, %64 : vector<256x256xi1>, vector<256x256xi32>
    %c0_i32_48 = arith.constant 0 : i32
    %77 = vector.broadcast %c0_i32_48 : i32 to vector<256x256xi32>
    %78 = arith.cmpi eq, %76, %77 : vector<256x256xi32>
    %79 = arith.subf %58, %59 : vector<256x256xf32>
    %cst_49 = arith.constant 0.000000e+00 : f32
    %80 = vector.broadcast %cst_49 : f32 to vector<256x256xf32>
    %81 = arith.select %78, %80, %79 : vector<256x256xi1>, vector<256x256xf32>
    %c0_50 = arith.constant 0 : index
    %c0_51 = arith.constant 0 : index
    %82 = vector.load %arg13[%c0_50, %c0_51] : memref<256x64xf32, #tpu.memory_space<vmem>>, vector<256x64xf32>
    %cst_52 = arith.constant dense<0.000000e+00> : vector<256x64xf32>
    %83 = tpu.matmul %81, %82, %cst_52 {dimension_numbers = #tpu.dot_dimension_numbers<[1], [0], [0], [1], [0, 0, 1, 1], [], []>} : vector<256x256xf32>, vector<256x64xf32>, vector<256x64xf32> -> vector<256x64xf32>
    %c0_53 = arith.constant 0 : index
    %c0_54 = arith.constant 0 : index
    %84 = vector.load %arg14[%c0_53, %c0_54] : memref<1x64xf32, #tpu.memory_space<vmem>>, vector<1x64xf32>
    %85 = vector.broadcast %84 : vector<1x64xf32> to vector<256x64xf32>
    %86 = arith.addf %83, %85 : vector<256x64xf32>
    %cst_55 = arith.constant 0.000000e+00 : f32
    %87 = vector.broadcast %cst_55 : f32 to vector<256x64xf32>
    %88 = arith.cmpf ogt, %86, %87 : vector<256x64xf32>
    %cst_56 = arith.constant 2.000000e-01 : f32
    %89 = vector.broadcast %cst_56 : f32 to vector<256x64xf32>
    %90 = arith.mulf %89, %86 : vector<256x64xf32>
    %91 = arith.select %88, %86, %90 : vector<256x64xi1>, vector<256x64xf32>
    %c0_57 = arith.constant 0 : index
    %c0_58 = arith.constant 0 : index
    %92 = vector.load %arg16[%c0_57, %c0_58] : memref<1x64xf32, #tpu.memory_space<vmem>>, vector<1x64xf32>
    %93 = vector.broadcast %92 : vector<1x64xf32> to vector<256x64xf32>
    %94 = arith.mulf %91, %93 : vector<256x64xf32>
    %95 = vector.shape_cast %94 : vector<256x64xf32> to vector<4x64x64xf32>
    %cst_59 = arith.constant dense<0.000000e+00> : vector<4x64xf32>
    %96 = vector.multi_reduction <add>, %95, %cst_59 [2] : vector<4x64x64xf32> to vector<4x64xf32>
    %c0_60 = arith.constant 0 : index
    %c0_61 = arith.constant 0 : index
    %97 = vector.load %arg15[%c0_60, %c0_61] : memref<64x128xf32, #tpu.memory_space<vmem>>, vector<64x128xf32>
    %cst_62 = arith.constant dense<0.000000e+00> : vector<4x128xf32>
    %98 = tpu.matmul %96, %97, %cst_62 {dimension_numbers = #tpu.dot_dimension_numbers<[1], [0], [0], [1], [0, 0, 1, 1], [], []>} : vector<4x64xf32>, vector<64x128xf32>, vector<4x128xf32> -> vector<4x128xf32>
    %c0_63 = arith.constant 0 : index
    %c0_64 = arith.constant 0 : index
    %99 = vector.load %arg17[%c0_63, %c0_64] : memref<4x128xf32, #tpu.memory_space<vmem>>, vector<4x128xf32>
    tpu.vector_store %arg17[%c0_63, %c0_64], %98 {strides = array<i32>} : memref<4x128xf32, #tpu.memory_space<vmem>>, vector<4x128xf32>,
    return
  }
  func.func @transform_0(%arg0: i32) -> (i32, i32, i32) {
    %c0_i32 = arith.constant 0 : i32
    %c0_i32_0 = arith.constant 0 : i32
    %c0_i32_1 = arith.constant 0 : i32
    %c0_i32_2 = arith.constant 0 : i32
    return %c0_i32, %c0_i32_0, %c0_i32_1 : i32, i32, i32
  }
  func.func @transform_1(%arg0: i32) -> (i32, i32) {
    %c0_i32 = arith.constant 0 : i32
    %c0_i32_0 = arith.constant 0 : i32
    %c0_i32_1 = arith.constant 0 : i32
    return %c0_i32, %c0_i32_0 : i32, i32
  }
  func.func @transform_2(%arg0: i32) -> (i32, i32) {
    %c0_i32 = arith.constant 0 : i32
    %c0_i32_0 = arith.constant 0 : i32
    %c0_i32_1 = arith.constant 0 : i32
    return %c0_i32, %c0_i32_0 : i32, i32
  }
  func.func @transform_3(%arg0: i32) -> (i32, i32) {
    %c0_i32 = arith.constant 0 : i32
    %c0_i32_0 = arith.constant 0 : i32
    %c0_i32_1 = arith.constant 0 : i32
    return %c0_i32, %c0_i32_0 : i32, i32
  }
  func.func @transform_4(%arg0: i32) -> (i32, i32) {
    %c0_i32 = arith.constant 0 : i32
    %c0_i32_0 = arith.constant 0 : i32
    %c0_i32_1 = arith.constant 0 : i32
    return %c0_i32, %c0_i32_0 : i32, i32
  }
  func.func @transform_5(%arg0: i32) -> (i32, i32) {
    %c0_i32 = arith.constant 0 : i32
    %c0_i32_0 = arith.constant 0 : i32
    %c0_i32_1 = arith.constant 0 : i32
    return %c0_i32, %c0_i32_0 : i32, i32
  }
  func.func @transform_6(%arg0: i32) -> (i32, i32) {
    %c0_i32 = arith.constant 0 : i32
    %c0_i32_0 = arith.constant 0 : i32
    %c0_i32_1 = arith.constant 0 : i32
    return %c0_i32, %c0_i32_0 : i32, i32
  }
  func.func @transform_7(%arg0: i32) -> (i32, i32) {
    %c0_i32 = arith.constant 0 : i32
    %c0_i32_0 = arith.constant 0 : i32
    %c0_i32_1 = arith.constant 0 : i32
    return %c0_i32, %c0_i32_0 : i32, i32
  }
  func.func @transform_8(%arg0: i32) -> (i32, i32) {
    %c0_i32 = arith.constant 0 : i32
    %c0_i32_0 = arith.constant 0 : i32
    %c0_i32_1 = arith.constant 0 : i32
    return %c0_i32, %c0_i32_0 : i32, i32
  }
  func.func @transform_9(%arg0: i32) -> (i32, i32) {
    %c0_i32 = arith.constant 0 : i32
    %c0_i32_0 = arith.constant 0 : i32
    %c0_i32_1 = arith.constant 0 : i32
    return %c0_i32, %c0_i32_0 : i32, i32
  }
  func.func @transform_10(%arg0: i32) -> (i32, i32) {
    %c0_i32 = arith.constant 0 : i32
    %c0_i32_0 = arith.constant 0 : i32
    %c0_i32_1 = arith.constant 0 : i32
    return %c0_i32, %c0_i32_0 : i32, i32
  }
  func.func @transform_11(%arg0: i32) -> (i32, i32) {
    %c0_i32 = arith.constant 0 : i32
    %c0_i32_0 = arith.constant 0 : i32
    %c0_i32_1 = arith.constant 0 : i32
    return %c0_i32, %c0_i32_0 : i32, i32
  }
  func.func @transform_12(%arg0: i32) -> (i32, i32) {
    %c0_i32 = arith.constant 0 : i32
    %c0_i32_0 = arith.constant 0 : i32
    %c0_i32_1 = arith.constant 0 : i32
    return %c0_i32, %c0_i32_0 : i32, i32
  }
  func.func @transform_13(%arg0: i32) -> (i32, i32) {
    %c0_i32 = arith.constant 0 : i32
    %c0_i32_0 = arith.constant 0 : i32
    %c0_i32_1 = arith.constant 0 : i32
    return %c0_i32, %c0_i32_0 : i32, i32
  }
  func.func @transform_14(%arg0: i32) -> (i32, i32) {
    %c0_i32 = arith.constant 0 : i32
    %c0_i32_0 = arith.constant 0 : i32
    %c0_i32_1 = arith.constant 0 : i32
    return %c0_i32, %c0_i32_0 : i32, i32
  }
  func.func @transform_15(%arg0: i32) -> (i32, i32) {
    %c0_i32 = arith.constant 0 : i32
    %c0_i32_0 = arith.constant 0 : i32
    %c0_i32_1 = arith.constant 0 : i32
    return %c0_i32, %c0_i32_0 : i32, i32
  }
  func.func @transform_16(%arg0: i32) -> (i32, i32) {
    %c0_i32 = arith.constant 0 : i32
    %c0_i32_0 = arith.constant 0 : i32
    %c0_i32_1 = arith.constant 0 : i32
    return %c0_i32, %c0_i32_0 : i32, i32
  }
}

</mosaic_0001>

<bundles_post_ra>
// kernel: audio2keypoint_train_D.1
= control target key start
LH: loop header
LB: loop body
LE: loop exit
PB: predicated region body
PF: predicated region fallthrough
CT: control target
= control target key end

     0   :  { %v4829_v3 = vmov 0.0|0.0   ;;  %vm129_vm0 = vcmask 1041409   ;;  %vm4830_vm1 = vmmov 0   ;;  %vm221_vm2 = vcmask 523264   ;;  %s6757_s2 = inlined_call_operand.vmem [shape: f32[256,64], index: 2, kind: input, shape index: {}]   ;;  %s6758_s0 = inlined_call_operand.vmem [shape: f32[2,64,256], index: 0, kind: input, shape index: {}]   ;;  %s6759_s4 = inlined_call_operand.vmem [shape: f32[64,32], index: 4, kind: input, shape index: {}]   ;;  %s6760_s7 = inlined_call_operand.vmem [shape: f32[64,64], index: 7, kind: input, shape index: {}]   ;;  %s6761_s3 = inlined_call_operand.vmem [shape: f32[1,64], index: 3, kind: input, shape index: {}]   ;;  %s6762_s1 = inlined_call_operand.vmem [shape: f32[848,64], index: 1, kind: input, shape index: {}]   ;;  %s6763_s8 = inlined_call_operand.vmem [shape: f32[32,64], index: 8, kind: input, shape index: {}]   ;;  %s6764_s5 = inlined_call_operand.vmem [shape: f32[1,32], index: 5, kind: input, shape index: {}]   ;;  %s6765_s6 = inlined_call_operand.vmem [shape: f32[64,424], index: 6, kind: input, shape index: {}]   ;;  %s6766_s10 = inlined_call_operand.vmem [shape: f32[64,256], index: 10, kind: input, shape index: {}]   ;;  %s6767_s9 = inlined_call_operand.vmem [shape: f32[1,64], index: 9, kind: input, shape index: {}]   ;;  %s6768_s12 = inlined_call_operand.vmem [shape: f32[256,64], index: 12, kind: input, shape index: {}]   ;;  %s6769_s11 = inlined_call_operand.vmem [shape: f32[1,256], index: 11, kind: input, shape index: {}]   ;;  %s6770_s13 = inlined_call_operand.vmem [shape: f32[1,64], index: 13, kind: input, shape index: {}]   ;;  %s6771_s15 = inlined_call_operand.vmem [shape: f32[1,64], index: 15, kind: input, shape index: {}]   ;;  %s6772_s14 = inlined_call_operand.vmem [shape: f32[64,128], index: 14, kind: input, shape index: {}]   ;;  %s6773_s16 = inlined_call_operand.vmem [shape: f32[4,128], index: 16, kind: output, shape index: {}]  }
   0x1   :  { %6775 = sst [smem:[#allocation4_spill]] %s6757_s2  ;;  %4554 = vmatprep.subr.bf16.mxu1 %v4829_v3  ;;  %v54_v26 = vld [vmem:[%s6758_s0 + $0x8] sm:$0xff]  ;;  %v206_v30 = vld [vmem:[%s6759_s4] sm:$0xff]  ;;  %v208_v32 = vld [vmem:[%s6759_s4 + $0x10] sm:$0xff]  ;;  %vm1333_vm3 = vcmask 261120   ;;  %vm1443_vm4 = vcmask 326656  }
   0x2   :  { %s6776_s23 = sld [smem:[#allocation4_spill]]  ;;  %v70_v27 = vld [vmem:[%s6758_s0 + $0x88] sm:$0xff]  ;;  %v209_v37 = vld [vmem:[%s6759_s4 + $0x18] sm:$0xff]  ;;  %v69_v58 = vld [vmem:[%s6758_s0 + $0x80] sm:$0xff] }
   0x3   :  { %v4978_v29 = vrot.slane %v70_v27, 7  ;;  %v207_v31 = vld [vmem:[%s6759_s4 + $0x8] sm:$0xff]  ;;  %v4558_v41 = vpack.c.bf16 %v209_v37, %v208_v32  ;;  %v5041_v60 = vrot.slane %v69_v58, 7  ;;  %v53_v61 = vld [vmem:[%s6758_s0] sm:$0xff]  ;;  %v297_v27 = vld [vmem:[%s6762_s1 + $0x10] sm:$0xff] }
   0x4   :  { %v4555_v36 = vpack.c.bf16 %v207_v31, %v206_v30  ;;  %v210_v63 = vld [vmem:[%s6759_s4 + $0x20] sm:$0xff]  ;;  %v300_v31 = vld [vmem:[%s6762_s1 + $0x28] sm:$0xff]  ;;  %v301_v32 = vld [vmem:[%s6762_s1 + $0x30] sm:$0xff] }
   0x5   :  { %v132_v40 = vsel %vm129_vm0, %v4978_v29, %v54_v26  ;;  %v130_v62 = vsel %vm129_vm0, %v5041_v60, %v53_v61  ;;  %v296_v26 = vld [vmem:[%s6762_s1 + $0x8] sm:$0xff]  ;;  %v299_v30 = vld [vmem:[%s6762_s1 + $0x20] sm:$0xff]  ;;  %v306_v37 = vld [vmem:[%s6762_s1 + $0x58] sm:$0xff] }
   0x6   :  { %199 = vmatprep.mubr.f32.mxu0 %v132_v40  ;;  %4556 = vmatpush3.bf16.msra.mxu1 %v4555_v36  ;;  %v305_v36 = vld [vmem:[%s6762_s1 + $0x50] sm:$0xff]  ;;  %v327_v58 = vld [vmem:[%s6762_s1 + $0x100] sm:$0xff] }
   0x7   :  { %4557 = vmatprep.subr.bf16.mxu1 %v4829_v3  ;;  %v309_v40 = vld [vmem:[%s6762_s1 + $0x70] sm:$0xff]  ;;  %v1322_v61 = vld [vmem:[%s6763_s8] sm:$0xff] }
   0x8   :  { %v101_v0 = vld [vmem:[%s6776_s23 + $0x80] sm:$0xff]  ;;  %v102_v1 = vld [vmem:[%s6776_s23 + $0x88] sm:$0xff]  ;;  %v103_v6 = vld [vmem:[%s6776_s23 + $0x90] sm:$0xff] }
   0x9   :  { %v85_v2 = vld [vmem:[%s6776_s23] sm:$0xff]  ;;  %v4522_v4 = vpack.c.bf16 %v102_v1, %v101_v0  ;;  %v86_v5 = vld [vmem:[%s6776_s23 + $0x8] sm:$0xff]  ;;  %v104_v7 = vld [vmem:[%s6776_s23 + $0x98] sm:$0xff] }
   0xa   :  { %v4524_v8 = vpack.c.bf16 %v86_v5, %v85_v2  ;;  %v4526_v9 = vpack.c.bf16 %v104_v7, %v103_v6  ;;  %v87_v10 = vld [vmem:[%s6776_s23 + $0x10] sm:$0xff]  ;;  %v88_v11 = vld [vmem:[%s6776_s23 + $0x18] sm:$0xff]  ;;  %v105_v12 = vld [vmem:[%s6776_s23 + $0xa0] sm:$0xff]  ;;  %4559 = vmatpush3.bf16.msra.mxu1 %v4558_v41 }
   0xb   :  { %4523 = vmatprep.subr.bf16.mxu0 %v4522_v4  ;;  %v106_v13 = vld [vmem:[%s6776_s23 + $0xa8] sm:$0xff]  ;;  %v4528_v14 = vpack.c.bf16 %v88_v11, %v87_v10  ;;  %v89_v16 = vld [vmem:[%s6776_s23 + $0x20] sm:$0xff]  ;;  %v107_v18 = vld [vmem:[%s6776_s23 + $0xb0] sm:$0xff]  ;;  %4560 = vmatprep.subr.bf16.mxu1 %v4829_v3 }
   0xc   :  { %4525 = vmatpush3.bf16.msra.mxu0 %v4524_v8  ;;  %v4530_v15 = vpack.c.bf16 %v106_v13, %v105_v12  ;;  %v90_v17 = vld [vmem:[%s6776_s23 + $0x28] sm:$0xff]  ;;  %v108_v19 = vld [vmem:[%s6776_s23 + $0xb8] sm:$0xff]  ;;  %v91_v22 = vld [vmem:[%s6776_s23 + $0x30] sm:$0xff] }
   0xd   :  { %4527 = vmatprep.subr.bf16.mxu0 %v4526_v9  ;;  %v4532_v20 = vpack.c.bf16 %v90_v17, %v89_v16  ;;  %v4534_v21 = vpack.c.bf16 %v108_v19, %v107_v18  ;;  %v92_v23 = vld [vmem:[%s6776_s23 + $0x38] sm:$0xff]  ;;  %v109_v24 = vld [vmem:[%s6776_s23 + $0xc0] sm:$0xff]  ;;  %v110_v25 = vld [vmem:[%s6776_s23 + $0xc8] sm:$0xff]  ;;  %v4831_v9 = vmov 0.0  }
   0xe   :  { %v4536_v28 = vpack.c.bf16 %v92_v23, %v91_v22  ;;  %v4538_v33 = vpack.c.bf16 %v110_v25, %v109_v24  ;;  %v93_v34 = vld [vmem:[%s6776_s23 + $0x40] sm:$0xff]  ;;  %v94_v35 = vld [vmem:[%s6776_s23 + $0x48] sm:$0xff]  ;;  %v111_v38 = vld [vmem:[%s6776_s23 + $0xd0] sm:$0xff]  ;;  %4314 = vmatprep.mubr.msk.f32.mxu1 %vm4830_vm1, %v4831_v9 }
   0xf   :  { %v112_v39 = vld [vmem:[%s6776_s23 + $0xd8] sm:$0xff]  ;;  %v4540_v42 = vpack.c.bf16 %v94_v35, %v93_v34  ;;  %v95_v44 = vld [vmem:[%s6776_s23 + $0x50] sm:$0xff]  ;;  %v113_v46 = vld [vmem:[%s6776_s23 + $0xe0] sm:$0xff] }
  0x10   :  { %4529 = vmatpush3.bf16.msra.mxu0 %v4528_v14  ;;  %v4542_v43 = vpack.c.bf16 %v112_v39, %v111_v38  ;;  %v96_v45 = vld [vmem:[%s6776_s23 + $0x58] sm:$0xff]  ;;  %v114_v47 = vld [vmem:[%s6776_s23 + $0xe8] sm:$0xff]  ;;  %v97_v50 = vld [vmem:[%s6776_s23 + $0x60] sm:$0xff] }
  0x11   :  { %4531 = vmatprep.subr.bf16.mxu0 %v4530_v15  ;;  %v4544_v48 = vpack.c.bf16 %v96_v45, %v95_v44  ;;  %v4546_v49 = vpack.c.bf16 %v114_v47, %v113_v46  ;;  %v98_v51 = vld [vmem:[%s6776_s23 + $0x68] sm:$0xff]  ;;  %v115_v52 = vld [vmem:[%s6776_s23 + $0xf0] sm:$0xff]  ;;  %v116_v53 = vld [vmem:[%s6776_s23 + $0xf8] sm:$0xff] }
  0x12   :  { %v4548_v54 = vpack.c.bf16 %v98_v51, %v97_v50  ;;  %v4550_v55 = vpack.c.bf16 %v116_v53, %v115_v52  ;;  %v99_v56 = vld [vmem:[%s6776_s23 + $0x70] sm:$0xff]  ;;  %v100_v57 = vld [vmem:[%s6776_s23 + $0x78] sm:$0xff]  ;;  %v211_v0 = vld [vmem:[%s6759_s4 + $0x28] sm:$0xff] }
  0x13   :  { %v4552_v59 = vpack.c.bf16 %v100_v57, %v99_v56  ;;  %v4561_v1 = vpack.c.bf16 %v211_v0, %v210_v63  ;;  %v212_v2 = vld [vmem:[%s6759_s4 + $0x30] sm:$0xff]  ;;  %v213_v4 = vld [vmem:[%s6759_s4 + $0x38] sm:$0xff]  ;;  %v401_v6 = vld [vmem:[%s6760_s7] sm:$0xff] }
  0x14   :  { %4533 = vmatpush3.bf16.msra.mxu0 %v4532_v20  ;;  %v4564_v5 = vpack.c.bf16 %v213_v4, %v212_v2  ;;  %v402_v7 = vld [vmem:[%s6760_s7 + $0x8] sm:$0xff]  ;;  %v3848_v11 = vld [vmem:[%s6761_s3] ss:$0 sm:$0xff]  ;;  %v403_v14 = vld [vmem:[%s6760_s7 + $0x10] sm:$0xff] }
  0x15   :  { %4535 = vmatprep.subr.bf16.mxu0 %v4534_v21  ;;  %4562 = vmatpush3.bf16.msra.mxu1 %v4561_v1  ;;  %v4566_v8 = vpack.c.bf16 %v402_v7, %v401_v6  ;;  %v404_v15 = vld [vmem:[%s6760_s7 + $0x18] sm:$0xff]  ;;  %v295_v19 = vld [vmem:[%s6762_s1] sm:$0xff]  ;;  %v406_v21 = vld [vmem:[%s6760_s7 + $0x28] sm:$0xff] }
  0x16   :  { %4563 = vmatprep.subr.bf16.mxu1 %v4829_v3  ;;  %v4570_v18 = vpack.c.bf16 %v404_v15, %v403_v14  ;;  %v405_v20 = vld [vmem:[%s6760_s7 + $0x20] sm:$0xff]  ;;  %v407_v23 = vld [vmem:[%s6760_s7 + $0x30] sm:$0xff]  ;;  %v408_v24 = vld [vmem:[%s6760_s7 + $0x38] sm:$0xff] }
  0x17   :  { %v4574_v22 = vpack.c.bf16 %v406_v21, %v405_v20  ;;  %v4578_v25 = vpack.c.bf16 %v408_v24, %v407_v23  ;;  %v303_v34 = vld [vmem:[%s6762_s1 + $0x40] sm:$0xff]  ;;  %v304_v35 = vld [vmem:[%s6762_s1 + $0x48] sm:$0xff]  ;;  %v310_v41 = vld [vmem:[%s6762_s1 + $0x78] sm:$0xff] }
  0x18   :  { %4537 = vmatpush3.bf16.msra.mxu0 %v4536_v28  ;;  %v298_v28 = vld [vmem:[%s6762_s1 + $0x18] sm:$0xff]  ;;  %v307_v38 = vld [vmem:[%s6762_s1 + $0x60] sm:$0xff]  ;;  %v308_v39 = vld [vmem:[%s6762_s1 + $0x68] sm:$0xff] }
  0x19   :  { %4539 = vmatprep.subr.bf16.mxu0 %v4538_v33  ;;  %4565 = vmatpush3.bf16.msra.mxu1 %v4564_v5  ;;  %v302_v33 = vld [vmem:[%s6762_s1 + $0x38] sm:$0xff]  ;;  %v313_v44 = vld [vmem:[%s6762_s1 + $0x90] sm:$0xff]  ;;  %v315_v46 = vld [vmem:[%s6762_s1 + $0xa0] sm:$0xff] }
  0x1a   :  { %4567 = vmatprep.subr.bf16.mxu1 %v4566_v8  ;;  %v314_v45 = vld [vmem:[%s6762_s1 + $0x98] sm:$0xff]  ;;  %v316_v47 = vld [vmem:[%s6762_s1 + $0xa8] sm:$0xff]  ;;  %v319_v50 = vld [vmem:[%s6762_s1 + $0xc0] sm:$0xff] }
  0x1b   :  { %v320_v51 = vld [vmem:[%s6762_s1 + $0xc8] sm:$0xff]  ;;  %v321_v52 = vld [vmem:[%s6762_s1 + $0xd0] sm:$0xff]  ;;  %v322_v53 = vld [vmem:[%s6762_s1 + $0xd8] sm:$0xff] }
  0x1c   :  { %4541 = vmatpush3.bf16.msra.mxu0 %v4540_v42  ;;  %v311_v42 = vld [vmem:[%s6762_s1 + $0x80] sm:$0xff]  ;;  %v325_v56 = vld [vmem:[%s6762_s1 + $0xf0] sm:$0xff]  ;;  %v326_v57 = vld [vmem:[%s6762_s1 + $0xf8] sm:$0xff] }
  0x1d   :  { %4543 = vmatprep.subr.bf16.mxu0 %v4542_v43  ;;  %v312_v43 = vld [vmem:[%s6762_s1 + $0x88] sm:$0xff]  ;;  %v329_v63 = vld [vmem:[%s6762_s1 + $0x110] sm:$0xff]  ;;  %v330_v1 = vld [vmem:[%s6762_s1 + $0x118] sm:$0xff] }
  0x1e   :  { %v1324_v2 = vld [vmem:[%s6763_s8 + $0x10] sm:$0xff]  ;;  %v1325_v4 = vld [vmem:[%s6763_s8 + $0x18] sm:$0xff]  ;;  %v331_v5 = vld [vmem:[%s6762_s1 + $0x120] sm:$0xff] }
  0x1f   :  { %v4586_v6 = vpack.c.bf16 %v1325_v4, %v1324_v2  ;;  %v332_v7 = vld [vmem:[%s6762_s1 + $0x128] sm:$0xff]  ;;  %v338_v14 = vld [vmem:[%s6762_s1 + $0x158] sm:$0xff]  ;;  %v339_v15 = vld [vmem:[%s6762_s1 + $0x160] sm:$0xff] }
  0x20   :  { %4545 = vmatpush3.bf16.msra.mxu0 %v4544_v48  ;;  %v317_v48 = vld [vmem:[%s6762_s1 + $0xb0] sm:$0xff]  ;;  %v344_v20 = vld [vmem:[%s6762_s1 + $0x188] sm:$0xff]  ;;  %v347_v23 = vld [vmem:[%s6762_s1 + $0x1a0] sm:$0xff] }
  0x21   :  { %4547 = vmatprep.subr.bf16.mxu0 %v4546_v49  ;;  %v318_v49 = vld [vmem:[%s6762_s1 + $0xb8] sm:$0xff]  ;;  %v345_v21 = vld [vmem:[%s6762_s1 + $0x190] sm:$0xff]  ;;  %v348_v24 = vld [vmem:[%s6762_s1 + $0x1a8] sm:$0xff] }
  0x22   :  { %v388_v2 = vld [vmem:[%s6762_s1 + $0x2e8] sm:$0xff]  ;;  %v389_v4 = vld [vmem:[%s6762_s1 + $0x2f0] sm:$0xff] }
  0x24   :  { %4549 = vmatpush3.bf16.msra.mxu0 %v4548_v54  ;;  %v323_v54 = vld [vmem:[%s6762_s1 + $0xe0] sm:$0xff] }
  0x25   :  { %4551 = vmatprep.subr.bf16.mxu0 %v4550_v55  ;;  %v324_v55 = vld [vmem:[%s6762_s1 + $0xe8] sm:$0xff] }
  0x28   :  { %4553 = vmatpush3.bf16.msra.mxu0 %v4552_v59  ;;  %v328_v59 = vld [vmem:[%s6762_s1 + $0x108] sm:$0xff] }
  0x29   :  { %4582 = vmatprep.subr.bf16.mxu0 %v4829_v3 }
  0x2b   :  { %200 = vmatmul.mubr.f32.vlgmr.msra.gmra.mrb[0].mxu0 %v130_v62  ;;  %v1323_v62 = vld [vmem:[%s6763_s8 + $0x8] sm:$0xff] }
  0x2c   :  { %4500 = vmatprep.mubr.msk.f32.mxu0 %vm4830_vm1, %v4831_v9  ;;  %v4583_v0 = vpack.c.bf16 %v1323_v62, %v1322_v61  ;;  %v383_v61 = vld [vmem:[%s6762_s1 + $0x2c0] sm:$0xff]  ;;  %v384_v62 = vld [vmem:[%s6762_s1 + $0x2c8] sm:$0xff] }
  0x2e   :  { %4584 = vmatpush3.bf16.msra.mxu0 %v4583_v0  ;;  %v386_v0 = vld [vmem:[%s6762_s1 + $0x2d8] sm:$0xff] }
  0x2f   :  { %4585 = vmatprep.subr.bf16.mxu0 %v4829_v3 }
  0x32   :  { %4587 = vmatpush3.bf16.msra.mxu0 %v4586_v6  ;;  %v391_v6 = vld [vmem:[%s6762_s1 + $0x300] sm:$0xff] }
  0xfe   :  { %v4046_v10 = vpop.f32.mrb[0].mxu0 }
  0xff   :  { %v4047_v12 = vpop.f32.mrb[1].mxu0 }
 0x100   :  { %v4048_v13 = vadd.f32 %v4047_v12, %v4046_v10  ;;  %v334_v10 = vld [vmem:[%s6762_s1 + $0x138] sm:$0xff]  ;;  %v336_v12 = vld [vmem:[%s6762_s1 + $0x148] sm:$0xff] }
 0x102   :  { %v202_v16 = vadd.f32 %v4048_v13, %v3848_v11  ;;  %v335_v11 = vld [vmem:[%s6762_s1 + $0x140] sm:$0xff]  ;;  %v337_v13 = vld [vmem:[%s6762_s1 + $0x150] sm:$0xff] }
 0x104   :  { %v205_v17 = vmax.f32 %v202_v16, 0.0  ;;  %v340_v16 = vld [vmem:[%s6762_s1 + $0x168] sm:$0xff] }
 0x106   :  { %4315 = vmatmul.mubr.msk.f32.vlgmr.msra.gmra.mrb[0].mxu1 %vm221_vm2, %v205_v17  ;;  %v341_v17 = vld [vmem:[%s6762_s1 + $0x170] sm:$0xff] }
 0x107   :  { %4569 = vmatpush3.bf16.msra.mxu1 %v4566_v8  ;;  %4333 = vmatprep.mubr.msk.f32.mxu1 %vm221_vm2, %v295_v19  ;;  %v333_v8 = vld [vmem:[%s6762_s1 + $0x130] sm:$0xff]  ;;  %v343_v19 = vld [vmem:[%s6762_s1 + $0x180] sm:$0xff] }
 0x108   :  { %4571 = vmatprep.subr.bf16.mxu1 %v4570_v18 }
 0x10b   :  { %4573 = vmatpush3.bf16.msra.mxu1 %v4570_v18  ;;  %v342_v18 = vld [vmem:[%s6762_s1 + $0x178] sm:$0xff] }
 0x10c   :  { %4575 = vmatprep.subr.bf16.mxu1 %v4574_v22 }
 0x10f   :  { %4577 = vmatpush3.bf16.msra.mxu1 %v4574_v22  ;;  %v346_v22 = vld [vmem:[%s6762_s1 + $0x198] sm:$0xff] }
 0x110   :  { %4579 = vmatprep.subr.bf16.mxu1 %v4578_v25 }
 0x113   :  { %4581 = vmatpush3.bf16.msra.mxu1 %v4578_v25  ;;  %v349_v25 = vld [vmem:[%s6762_s1 + $0x1b0] sm:$0xff] }
 0x114   :  { %4788 = vmatprep.subr.bf16.mxu1 %v4829_v3 }
 0x116   :  { %4334 = vmatmul.mubr.msk.f32.vlgmr.msra.gmra.mrb[2].mxu1 %vm221_vm2, %v296_v26  ;;  %v350_v26 = vld [vmem:[%s6762_s1 + $0x1b8] sm:$0xff] }
 0x117   :  { %4336 = vmatprep.mubr.msk.f32.mxu1 %vm221_vm2, %v297_v27  ;;  %v351_v27 = vld [vmem:[%s6762_s1 + $0x1c0] sm:$0xff] }
 0x11a   :  { %4337 = vmatmul.mubr.msk.f32.gmra.mrb[4].mxu1 %vm221_vm2, %v298_v28  ;;  %v352_v28 = vld [vmem:[%s6762_s1 + $0x1c8] sm:$0xff] }
 0x11b   :  { %4339 = vmatprep.mubr.msk.f32.mxu1 %vm221_vm2, %v299_v30  ;;  %v353_v30 = vld [vmem:[%s6762_s1 + $0x1d0] sm:$0xff] }
 0x11e   :  { %4340 = vmatmul.mubr.msk.f32.gmra.mrb[6].mxu1 %vm221_vm2, %v300_v31  ;;  %v354_v31 = vld [vmem:[%s6762_s1 + $0x1d8] sm:$0xff] }
 0x11f   :  { %4342 = vmatprep.mubr.msk.f32.mxu1 %vm221_vm2, %v301_v32  ;;  %v355_v32 = vld [vmem:[%s6762_s1 + $0x1e0] sm:$0xff] }
 0x122   :  { %4343 = vmatmul.mubr.msk.f32.gmra.mrb[8].mxu1 %vm221_vm2, %v302_v33  ;;  %v356_v33 = vld [vmem:[%s6762_s1 + $0x1e8] sm:$0xff] }
 0x123   :  { %4345 = vmatprep.mubr.msk.f32.mxu1 %vm221_vm2, %v303_v34  ;;  %v357_v34 = vld [vmem:[%s6762_s1 + $0x1f0] sm:$0xff] }
 0x126   :  { %4346 = vmatmul.mubr.msk.f32.gmra.mrb[10].mxu1 %vm221_vm2, %v304_v35  ;;  %v358_v35 = vld [vmem:[%s6762_s1 + $0x1f8] sm:$0xff] }
 0x127   :  { %4348 = vmatprep.mubr.msk.f32.mxu1 %vm221_vm2, %v305_v36  ;;  %v359_v36 = vld [vmem:[%s6762_s1 + $0x200] sm:$0xff] }
 0x12a   :  { %4349 = vmatmul.mubr.msk.f32.gmra.mrb[12].mxu1 %vm221_vm2, %v306_v37  ;;  %v360_v37 = vld [vmem:[%s6762_s1 + $0x208] sm:$0xff] }
 0x12b   :  { %4351 = vmatprep.mubr.msk.f32.mxu1 %vm221_vm2, %v307_v38  ;;  %v361_v38 = vld [vmem:[%s6762_s1 + $0x210] sm:$0xff] }
 0x12e   :  { %4352 = vmatmul.mubr.msk.f32.gmra.mrb[14].mxu1 %vm221_vm2, %v308_v39  ;;  %v362_v39 = vld [vmem:[%s6762_s1 + $0x218] sm:$0xff] }
 0x12f   :  { %4354 = vmatprep.mubr.msk.f32.mxu1 %vm221_vm2, %v309_v40  ;;  %v363_v40 = vld [vmem:[%s6762_s1 + $0x220] sm:$0xff] }
 0x132   :  { %4355 = vmatmul.mubr.msk.f32.gmra.mrb[16].mxu1 %vm221_vm2, %v310_v41  ;;  %v364_v41 = vld [vmem:[%s6762_s1 + $0x228] sm:$0xff] }
 0x133   :  { %4357 = vmatprep.mubr.msk.f32.mxu1 %vm221_vm2, %v311_v42  ;;  %v365_v42 = vld [vmem:[%s6762_s1 + $0x230] sm:$0xff] }
 0x136   :  { %4358 = vmatmul.mubr.msk.f32.gmra.mrb[18].mxu1 %vm221_vm2, %v312_v43  ;;  %v366_v43 = vld [vmem:[%s6762_s1 + $0x238] sm:$0xff] }
 0x137   :  { %4360 = vmatprep.mubr.msk.f32.mxu1 %vm221_vm2, %v313_v44  ;;  %v367_v44 = vld [vmem:[%s6762_s1 + $0x240] sm:$0xff] }
 0x13a   :  { %4361 = vmatmul.mubr.msk.f32.gmra.mrb[20].mxu1 %vm221_vm2, %v314_v45  ;;  %v368_v45 = vld [vmem:[%s6762_s1 + $0x248] sm:$0xff] }
 0x13b   :  { %4363 = vmatprep.mubr.msk.f32.mxu1 %vm221_vm2, %v315_v46  ;;  %v369_v46 = vld [vmem:[%s6762_s1 + $0x250] sm:$0xff] }
 0x13e   :  { %4364 = vmatmul.mubr.msk.f32.gmra.mrb[22].mxu1 %vm221_vm2, %v316_v47  ;;  %v370_v47 = vld [vmem:[%s6762_s1 + $0x258] sm:$0xff] }
 0x13f   :  { %4366 = vmatprep.mubr.msk.f32.mxu1 %vm221_vm2, %v317_v48  ;;  %v371_v48 = vld [vmem:[%s6762_s1 + $0x260] sm:$0xff] }
 0x142   :  { %4367 = vmatmul.mubr.msk.f32.gmra.mrb[24].mxu1 %vm221_vm2, %v318_v49  ;;  %v372_v49 = vld [vmem:[%s6762_s1 + $0x268] sm:$0xff] }
 0x143   :  { %4369 = vmatprep.mubr.msk.f32.mxu1 %vm221_vm2, %v319_v50  ;;  %v373_v50 = vld [vmem:[%s6762_s1 + $0x270] sm:$0xff] }
 0x146   :  { %4370 = vmatmul.mubr.msk.f32.gmra.mrb[26].mxu1 %vm221_vm2, %v320_v51  ;;  %v374_v51 = vld [vmem:[%s6762_s1 + $0x278] sm:$0xff] }
 0x147   :  { %4372 = vmatprep.mubr.msk.f32.mxu1 %vm221_vm2, %v321_v52  ;;  %v375_v52 = vld [vmem:[%s6762_s1 + $0x280] sm:$0xff] }
 0x14a   :  { %4373 = vmatmul.mubr.msk.f32.gmra.mrb[28].mxu1 %vm221_vm2, %v322_v53  ;;  %v376_v53 = vld [vmem:[%s6762_s1 + $0x288] sm:$0xff] }
 0x14b   :  { %4375 = vmatprep.mubr.msk.f32.mxu1 %vm221_vm2, %v323_v54  ;;  %v377_v54 = vld [vmem:[%s6762_s1 + $0x290] sm:$0xff] }
 0x14e   :  { %4376 = vmatmul.mubr.msk.f32.gmra.mrb[30].mxu1 %vm221_vm2, %v324_v55  ;;  %v378_v55 = vld [vmem:[%s6762_s1 + $0x298] sm:$0xff] }
 0x14f   :  { %4378 = vmatprep.mubr.msk.f32.mxu1 %vm221_vm2, %v325_v56  ;;  %v379_v56 = vld [vmem:[%s6762_s1 + $0x2a0] sm:$0xff] }
 0x152   :  { %4379 = vmatmul.mubr.msk.f32.gmra.mrb[32].mxu1 %vm221_vm2, %v326_v57  ;;  %v380_v57 = vld [vmem:[%s6762_s1 + $0x2a8] sm:$0xff] }
 0x153   :  { %4381 = vmatprep.mubr.msk.f32.mxu1 %vm221_vm2, %v327_v58  ;;  %v381_v58 = vld [vmem:[%s6762_s1 + $0x2b0] sm:$0xff] }
 0x156   :  { %4382 = vmatmul.mubr.msk.f32.gmra.mrb[34].mxu1 %vm221_vm2, %v328_v59  ;;  %v382_v59 = vld [vmem:[%s6762_s1 + $0x2b8] sm:$0xff] }
 0x157   :  { %4384 = vmatprep.mubr.msk.f32.mxu1 %vm221_vm2, %v329_v63  ;;  %v385_v63 = vld [vmem:[%s6762_s1 + $0x2d0] sm:$0xff] }
 0x15a   :  { %4385 = vmatmul.mubr.msk.f32.gmra.mrb[36].mxu1 %vm221_vm2, %v330_v1  ;;  %v387_v1 = vld [vmem:[%s6762_s1 + $0x2e0] sm:$0xff] }
 0x15b   :  { %4387 = vmatprep.mubr.msk.f32.mxu1 %vm221_vm2, %v331_v5  ;;  %v390_v5 = vld [vmem:[%s6762_s1 + $0x2f8] sm:$0xff] }
 0x15e   :  { %4388 = vmatmul.mubr.msk.f32.gmra.mrb[38].mxu1 %vm221_vm2, %v332_v7  ;;  %v392_v7 = vld [vmem:[%s6762_s1 + $0x308] sm:$0xff] }
 0x15f   :  { %4390 = vmatprep.mubr.msk.f32.mxu1 %vm221_vm2, %v333_v8  ;;  %v393_v8 = vld [vmem:[%s6762_s1 + $0x310] sm:$0xff] }
 0x162   :  { %4391 = vmatmul.mubr.msk.f32.gmra.mrb[40].mxu1 %vm221_vm2, %v334_v10  ;;  %v3849_v10 = vld [vmem:[%s6764_s5] ss:$0 sm:$0xff] }
 0x163   :  { %4393 = vmatprep.mubr.msk.f32.mxu1 %vm221_vm2, %v335_v11  ;;  %v394_v11 = vld [vmem:[%s6762_s1 + $0x318] sm:$0xff] }
 0x166   :  { %4394 = vmatmul.mubr.msk.f32.gmra.mrb[42].mxu1 %vm221_vm2, %v336_v12  ;;  %v395_v12 = vld [vmem:[%s6762_s1 + $0x320] sm:$0xff] }
 0x167   :  { %4396 = vmatprep.mubr.msk.f32.mxu1 %vm221_vm2, %v337_v13 }
 0x16a   :  { %4397 = vmatmul.mubr.msk.f32.gmra.mrb[44].mxu1 %vm221_vm2, %v338_v14 }
 0x16b   :  { %4399 = vmatprep.mubr.msk.f32.mxu1 %vm221_vm2, %v339_v15 }
 0x16e   :  { %4400 = vmatmul.mubr.msk.f32.gmra.mrb[46].mxu1 %vm221_vm2, %v340_v16  ;;  %v5517_v16 = vld [vmem:[%s6765_s6 + $0x8] sm:$0xff] }
 0x16f   :  { %4402 = vmatprep.mubr.msk.f32.mxu1 %vm221_vm2, %v341_v17  ;;  %v396_v17 = vld [vmem:[%s6762_s1 + $0x328] sm:$0xff] }
 0x172   :  { %4403 = vmatmul.mubr.msk.f32.gmra.mrb[48].mxu1 %vm221_vm2, %v342_v18  ;;  %v397_v18 = vld [vmem:[%s6762_s1 + $0x330] sm:$0xff] }
 0x173   :  { %4405 = vmatprep.mubr.msk.f32.mxu1 %vm221_vm2, %v343_v19  ;;  %v398_v19 = vld [vmem:[%s6762_s1 + $0x338] sm:$0xff] }
 0x176   :  { %4406 = vmatmul.mubr.msk.f32.gmra.mrb[50].mxu1 %vm221_vm2, %v344_v20  ;;  %v399_v20 = vld [vmem:[%s6762_s1 + $0x340] sm:$0xff] }
 0x177   :  { %4408 = vmatprep.mubr.msk.f32.mxu1 %vm221_vm2, %v345_v21  ;;  %v400_v21 = vld [vmem:[%s6762_s1 + $0x348] sm:$0xff] }
 0x17a   :  { %4409 = vmatmul.mubr.msk.f32.gmra.mrb[52].mxu1 %vm221_vm2, %v346_v22 }
 0x17b   :  { %4411 = vmatprep.mubr.msk.f32.mxu1 %vm221_vm2, %v347_v23 }
 0x17e   :  { %4412 = vmatmul.mubr.msk.f32.gmra.mrb[54].mxu1 %vm221_vm2, %v348_v24 }
 0x17f   :  { %4414 = vmatprep.mubr.msk.f32.mxu1 %vm221_vm2, %v349_v25 }
 0x182   :  { %4415 = vmatmul.mubr.msk.f32.gmra.mrb[56].mxu1 %vm221_vm2, %v350_v26 }
 0x183   :  { %4417 = vmatprep.mubr.msk.f32.mxu1 %vm221_vm2, %v351_v27 }
 0x186   :  { %4418 = vmatmul.mubr.msk.f32.gmra.mrb[58].mxu1 %vm221_vm2, %v352_v28 }
 0x187   :  { %4420 = vmatprep.mubr.msk.f32.mxu1 %vm221_vm2, %v353_v30 }
 0x18a   :  { %4421 = vmatmul.mubr.msk.f32.gmra.mrb[60].mxu1 %vm221_vm2, %v354_v31 }
 0x18b   :  { %4423 = vmatprep.mubr.msk.f32.mxu1 %vm221_vm2, %v355_v32 }
 0x18e   :  { %4424 = vmatmul.mubr.msk.f32.gmra.mrb[62].mxu1 %vm221_vm2, %v356_v33 }
 0x18f   :  { %4426 = vmatprep.mubr.msk.f32.mxu1 %vm221_vm2, %v357_v34 }
 0x192   :  { %4427 = vmatmul.mubr.msk.f32.gmra.mrb[64].mxu1 %vm221_vm2, %v358_v35 }
 0x193   :  { %4429 = vmatprep.mubr.msk.f32.mxu1 %vm221_vm2, %v359_v36 }
 0x196   :  { %4430 = vmatmul.mubr.msk.f32.gmra.mrb[66].mxu1 %vm221_vm2, %v360_v37 }
 0x197   :  { %4432 = vmatprep.mubr.msk.f32.mxu1 %vm221_vm2, %v361_v38 }
 0x19a   :  { %4433 = vmatmul.mubr.msk.f32.gmra.mrb[68].mxu1 %vm221_vm2, %v362_v39 }
 0x19b   :  { %4435 = vmatprep.mubr.msk.f32.mxu1 %vm221_vm2, %v363_v40 }
 0x19e   :  { %4436 = vmatmul.mubr.msk.f32.gmra.mrb[70].mxu1 %vm221_vm2, %v364_v41 }
 0x19f   :  { %4438 = vmatprep.mubr.msk.f32.mxu1 %vm221_vm2, %v365_v42 }
 0x1a2   :  { %4439 = vmatmul.mubr.msk.f32.gmra.mrb[72].mxu1 %vm221_vm2, %v366_v43 }
 0x1a3   :  { %4441 = vmatprep.mubr.msk.f32.mxu1 %vm221_vm2, %v367_v44 }
 0x1a6   :  { %4442 = vmatmul.mubr.msk.f32.gmra.mrb[74].mxu1 %vm221_vm2, %v368_v45 }
 0x1a7   :  { %4444 = vmatprep.mubr.msk.f32.mxu1 %vm221_vm2, %v369_v46 }
 0x1aa   :  { %4445 = vmatmul.mubr.msk.f32.gmra.mrb[76].mxu1 %vm221_vm2, %v370_v47 }
 0x1ab   :  { %4447 = vmatprep.mubr.msk.f32.mxu1 %vm221_vm2, %v371_v48 }
 0x1ae   :  { %4448 = vmatmul.mubr.msk.f32.gmra.mrb[78].mxu1 %vm221_vm2, %v372_v49 }
 0x1af   :  { %4450 = vmatprep.mubr.msk.f32.mxu1 %vm221_vm2, %v373_v50 }
 0x1b2   :  { %4451 = vmatmul.mubr.msk.f32.gmra.mrb[80].mxu1 %vm221_vm2, %v374_v51 }
 0x1b3   :  { %4453 = vmatprep.mubr.msk.f32.mxu1 %vm221_vm2, %v375_v52 }
 0x1b6   :  { %4454 = vmatmul.mubr.msk.f32.gmra.mrb[82].mxu1 %vm221_vm2, %v376_v53 }
 0x1b7   :  { %4456 = vmatprep.mubr.msk.f32.mxu1 %vm221_vm2, %v377_v54 }
 0x1ba   :  { %4457 = vmatmul.mubr.msk.f32.gmra.mrb[84].mxu1 %vm221_vm2, %v378_v55 }
 0x1bb   :  { %4459 = vmatprep.mubr.msk.f32.mxu1 %vm221_vm2, %v379_v56 }
 0x1be   :  { %4460 = vmatmul.mubr.msk.f32.gmra.mrb[86].mxu1 %vm221_vm2, %v380_v57 }
 0x1bf   :  { %4462 = vmatprep.mubr.msk.f32.mxu1 %vm221_vm2, %v381_v58 }
 0x1c2   :  { %4463 = vmatmul.mubr.msk.f32.gmra.mrb[88].mxu1 %vm221_vm2, %v382_v59 }
 0x1c3   :  { %4465 = vmatprep.mubr.msk.f32.mxu1 %vm221_vm2, %v383_v61 }
 0x1c6   :  { %4466 = vmatmul.mubr.msk.f32.gmra.mrb[90].mxu1 %vm221_vm2, %v384_v62 }
 0x1c7   :  { %4468 = vmatprep.mubr.msk.f32.mxu1 %vm221_vm2, %v385_v63 }
 0x1ca   :  { %4469 = vmatmul.mubr.msk.f32.gmra.mrb[92].mxu1 %vm221_vm2, %v386_v0 }
 0x1cb   :  { %4471 = vmatprep.mubr.msk.f32.mxu1 %vm221_vm2, %v387_v1 }
 0x1ce   :  { %4472 = vmatmul.mubr.msk.f32.gmra.mrb[94].mxu1 %vm221_vm2, %v388_v2 }
 0x1cf   :  { %4474 = vmatprep.mubr.msk.f32.mxu1 %vm221_vm2, %v389_v4 }
 0x1d2   :  { %4475 = vmatmul.mubr.msk.f32.gmra.mrb[96].mxu1 %vm221_vm2, %v390_v5 }
 0x1d3   :  { %4477 = vmatprep.mubr.msk.f32.mxu1 %vm221_vm2, %v391_v6 }
 0x1d6   :  { %4478 = vmatmul.mubr.msk.f32.gmra.mrb[98].mxu1 %vm221_vm2, %v392_v7 }
 0x1d7   :  { %4480 = vmatprep.mubr.msk.f32.mxu1 %vm221_vm2, %v393_v8 }
 0x1d9   :  { %v291_v13 = vpop.f32.mrb[0].mxu1 }
 0x1da   :  { %v292_v14 = vadd.f32 %v3849_v10, %v291_v13  ;;  %4481 = vmatmul.mubr.msk.f32.gmra.mrb[100].mxu1 %vm221_vm2, %v394_v11  ;;  %v4316_v15 = vpop.f32.mrb[1].mxu1 }
 0x1db   :  { %4483 = vmatprep.mubr.msk.f32.mxu1 %vm221_vm2, %v395_v12  ;;  %v5544_v12 = vld [vmem:[%s6765_s6] sm:$0xff] }
 0x1dc   :  { %4501 = vmatmul.mubr.msk.f32.vlgmr.msra.gmra.mrb[2].mxu0 %vm1333_vm3, %v292_v14  ;;  %v5550_v14 = vld [vmem:[%s6765_s6 + $0x28] sm:$0xff] }
 0x1dd   :  { %1532 = vmatprep.mubr.f32.mxu0 %v5517_v16 }
 0x1de   :  { %4484 = vmatmul.mubr.msk.f32.gmra.mrb[102].mxu1 %vm221_vm2, %v396_v17 }
 0x1df   :  { %4486 = vmatprep.mubr.msk.f32.mxu1 %vm221_vm2, %v397_v18  ;;  %v5557_v18 = vld [vmem:[%s6765_s6 + $0x20] sm:$0xff] }
 0x1e2   :  { %4487 = vmatmul.mubr.msk.f32.gmra.mrb[104].mxu1 %vm221_vm2, %v398_v19 }
 0x1e3   :  { %4489 = vmatprep.mubr.msk.f32.mxu1 %vm221_vm2, %v399_v20  ;;  %v5563_v20 = vld [vmem:[%s6765_s6 + $0x48] sm:$0xff] }
 0x1e6   :  { %4490 = vmatmul.mubr.msk.f32.gmra.mrb[106].mxu1 %vm221_vm2, %v400_v21 }
 0x1e9   :  { %v4335_v22 = vpop.f32.mrb[2].mxu1 }
 0x1ea   :  { %v793_v23 = vpop.f32.mrb[3].mxu1 }
 0x1eb   :  { %v4590_v24 = vpack.c.bf16 %v4335_v22, %v793_v23  ;;  %v5570_v23 = vld [vmem:[%s6765_s6 + $0x40] sm:$0xff] }
 0x1ed   :  { %v4338_v25 = vpop.f32.mrb[4].mxu1 }
 0x1ee   :  { %v803_v26 = vpop.f32.mrb[5].mxu1 }
 0x1ef   :  { %v4594_v27 = vpack.c.bf16 %v4338_v25, %v803_v26  ;;  %v5576_v25 = vld [vmem:[%s6765_s6 + $0x68] sm:$0xff] }
 0x1f1   :  { %v4341_v28 = vpop.f32.mrb[6].mxu1 }
 0x1f2   :  { %v813_v30 = vpop.f32.mrb[7].mxu1 }
 0x1f3   :  { %v4598_v31 = vpack.c.bf16 %v4341_v28, %v813_v30  ;;  %v5583_v28 = vld [vmem:[%s6765_s6 + $0x60] sm:$0xff] }
 0x1f5   :  { %v4344_v32 = vpop.f32.mrb[8].mxu1 }
 0x1f6   :  { %v823_v33 = vpop.f32.mrb[9].mxu1 }
 0x1f7   :  { %v4602_v34 = vpack.c.bf16 %v4344_v32, %v823_v33 }
 0x1f9   :  { %v4347_v35 = vpop.f32.mrb[10].mxu1 }
 0x1fa   :  { %v833_v36 = vpop.f32.mrb[11].mxu1 }
 0x1fb   :  { %v4606_v37 = vpack.c.bf16 %v4347_v35, %v833_v36  ;;  %v5602_v36 = vld [vmem:[%s6765_s6 + $0xa8] sm:$0xff] }
 0x1fd   :  { %v4350_v38 = vpop.f32.mrb[12].mxu1 }
 0x1fe   :  { %v843_v39 = vpop.f32.mrb[13].mxu1 }
 0x1ff   :  { %v4610_v40 = vpack.c.bf16 %v4350_v38, %v843_v39  ;;  %v5609_v39 = vld [vmem:[%s6765_s6 + $0xa0] sm:$0xff] }
 0x201   :  { %v4353_v41 = vpop.f32.mrb[14].mxu1 }
 0x202   :  { %v853_v42 = vpop.f32.mrb[15].mxu1 }
 0x203   :  { %v4614_v43 = vpack.c.bf16 %v4353_v41, %v853_v42  ;;  %v5615_v41 = vld [vmem:[%s6765_s6 + $0xc8] sm:$0xff] }
 0x205   :  { %v4356_v44 = vpop.f32.mrb[16].mxu1 }
 0x206   :  { %v863_v45 = vpop.f32.mrb[17].mxu1 }
 0x207   :  { %v4618_v46 = vpack.c.bf16 %v4356_v44, %v863_v45  ;;  %v5622_v44 = vld [vmem:[%s6765_s6 + $0xc0] sm:$0xff] }
 0x209   :  { %v4359_v47 = vpop.f32.mrb[18].mxu1 }
 0x20a   :  { %v873_v48 = vpop.f32.mrb[19].mxu1 }
 0x20b   :  { %v4588_v49 = vpack.c.bf16 %v4359_v47, %v873_v48 }
 0x20d   :  { %v4362_v50 = vpop.f32.mrb[20].mxu1  ;;  %4589 = vmatprep.subr.bf16.mxu0 %v4588_v49  ;;  %v5635_v49 = vld [vmem:[%s6765_s6 + $0xe0] sm:$0xff] }
 0x20e   :  { %v883_v51 = vpop.f32.mrb[21].mxu1  ;;  %4591 = vmatpush3.bf16.msra.mxu0 %v4590_v24 }
 0x20f   :  { %v4592_v52 = vpack.c.bf16 %v4362_v50, %v883_v51  ;;  %v5641_v51 = vld [vmem:[%s6765_s6 + $0x18] sm:$0xff] }
 0x211   :  { %v4365_v53 = vpop.f32.mrb[22].mxu1  ;;  %4593 = vmatprep.subr.bf16.mxu0 %v4592_v52 }
 0x212   :  { %v893_v54 = vpop.f32.mrb[23].mxu1  ;;  %4595 = vmatpush3.bf16.msra.mxu0 %v4594_v27 }
 0x213   :  { %v4596_v55 = vpack.c.bf16 %v4365_v53, %v893_v54 }
 0x215   :  { %v4368_v56 = vpop.f32.mrb[24].mxu1  ;;  %4597 = vmatprep.subr.bf16.mxu0 %v4596_v55 }
 0x216   :  { %v903_v57 = vpop.f32.mrb[25].mxu1  ;;  %4599 = vmatpush3.bf16.msra.mxu0 %v4598_v31  ;;  %v5589_v31 = vld [vmem:[%s6765_s6 + $0x88] sm:$0xff] }
 0x217   :  { %v4600_v58 = vpack.c.bf16 %v4368_v56, %v903_v57 }
 0x219   :  { %v4371_v59 = vpop.f32.mrb[26].mxu1  ;;  %4601 = vmatprep.subr.bf16.mxu0 %v4600_v58 }
 0x21a   :  { %v913_v61 = vpop.f32.mrb[27].mxu1  ;;  %4603 = vmatpush3.bf16.msra.mxu0 %v4602_v34  ;;  %v5596_v34 = vld [vmem:[%s6765_s6 + $0x80] sm:$0xff] }
 0x21b   :  { %v4604_v62 = vpack.c.bf16 %v4371_v59, %v913_v61  ;;  %v5654_v61 = vld [vmem:[%s6765_s6 + $0x10] sm:$0xff] }
 0x21d   :  { %v4374_v63 = vpop.f32.mrb[28].mxu1  ;;  %4605 = vmatprep.subr.bf16.mxu0 %v4604_v62 }
 0x21e   :  { %v923_v0 = vpop.f32.mrb[29].mxu1  ;;  %4607 = vmatpush3.bf16.msra.mxu0 %v4606_v37 }
 0x21f   :  { %v4608_v1 = vpack.c.bf16 %v4374_v63, %v923_v0  ;;  %v5661_v63 = vld [vmem:[%s6765_s6 + $0x38] sm:$0xff] }
 0x221   :  { %v4377_v2 = vpop.f32.mrb[30].mxu1  ;;  %4609 = vmatprep.subr.bf16.mxu0 %v4608_v1 }
 0x222   :  { %v933_v4 = vpop.f32.mrb[31].mxu1  ;;  %4611 = vmatpush3.bf16.msra.mxu0 %v4610_v40 }
 0x223   :  { %v4612_v5 = vpack.c.bf16 %v4377_v2, %v933_v4  ;;  %v5670_v2 = vld [vmem:[%s6765_s6 + $0x30] sm:$0xff] }
 0x225   :  { %v4380_v6 = vpop.f32.mrb[32].mxu1  ;;  %4613 = vmatprep.subr.bf16.mxu0 %v4612_v5  ;;  %v5677_v5 = vld [vmem:[%s6765_s6 + $0x58] sm:$0xff] }
 0x226   :  { %v943_v7 = vpop.f32.mrb[33].mxu1  ;;  %4615 = vmatpush3.bf16.msra.mxu0 %v4614_v43 }
 0x227   :  { %v4616_v8 = vpack.c.bf16 %v4380_v6, %v943_v7 }
 0x229   :  { %v4383_v10 = vpop.f32.mrb[34].mxu1  ;;  %4617 = vmatprep.subr.bf16.mxu0 %v4616_v8  ;;  %v5686_v8 = vld [vmem:[%s6765_s6 + $0x50] sm:$0xff] }
 0x22a   :  { %v953_v11 = vpop.f32.mrb[35].mxu1  ;;  %4619 = vmatpush3.bf16.msra.mxu0 %v4618_v46  ;;  %v5628_v46 = vld [vmem:[%s6765_s6 + $0xe8] sm:$0xff] }
 0x22b   :  { %v4621_v13 = vpack.c.bf16 %v4383_v10, %v953_v11  ;;  %4620 = vmatprep.subr.bf16.mxu0 %v4829_v3  ;;  %v5691_v11 = vld [vmem:[%s6765_s6 + $0x78] sm:$0xff] }
 0x22d   :  { %v4386_v15 = vpop.f32.mrb[36].mxu1  ;;  %1533 = vmatmul.mubr.f32.vlgmr.msra.gmra.mrb[4].mxu0 %v5544_v12 }
 0x22e   :  { %v963_v17 = vpop.f32.mrb[37].mxu1  ;;  %4622 = vmatpush1.bf16.msra.mxu0 %v4621_v13  ;;  %1537 = vmatprep.mubr.f32.mxu0 %v5550_v14 }
 0x22f   :  { %v4624_v19 = vpack.c.bf16 %v4386_v15, %v963_v17  ;;  %4623 = vmatprep.subr.bf16.mxu0 %v4829_v3  ;;  %v5700_v17 = vld [vmem:[%s6765_s6 + $0x70] sm:$0xff] }
 0x231   :  { %v4389_v21 = vpop.f32.mrb[38].mxu1  ;;  %1538 = vmatmul.mubr.f32.gmra.mrb[6].mxu0 %v5557_v18 }
 0x232   :  { %v973_v22 = vpop.f32.mrb[39].mxu1  ;;  %4625 = vmatpush1.bf16.msra.mxu0 %v4624_v19  ;;  %1542 = vmatprep.mubr.f32.mxu0 %v5563_v20 }
 0x233   :  { %v4627_v24 = vpack.c.bf16 %v4389_v21, %v973_v22  ;;  %4626 = vmatprep.subr.bf16.mxu0 %v4829_v3  ;;  %v5705_v21 = vld [vmem:[%s6765_s6 + $0x98] sm:$0xff] }
 0x235   :  { %v4392_v26 = vpop.f32.mrb[40].mxu1  ;;  %1543 = vmatmul.mubr.f32.gmra.mrb[8].mxu0 %v5570_v23 }
 0x236   :  { %v983_v27 = vpop.f32.mrb[41].mxu1  ;;  %4628 = vmatpush1.bf16.msra.mxu0 %v4627_v24  ;;  %1547 = vmatprep.mubr.f32.mxu0 %v5576_v25 }
 0x237   :  { %v4630_v30 = vpack.c.bf16 %v4392_v26, %v983_v27  ;;  %4629 = vmatprep.subr.bf16.mxu0 %v4829_v3  ;;  %v5713_v26 = vld [vmem:[%s6765_s6 + $0x90] sm:$0xff] }
 0x239   :  { %v4395_v32 = vpop.f32.mrb[42].mxu1  ;;  %1548 = vmatmul.mubr.f32.gmra.mrb[10].mxu0 %v5583_v28 }
 0x23a   :  { %v993_v33 = vpop.f32.mrb[43].mxu1  ;;  %4631 = vmatpush1.bf16.msra.mxu0 %v4630_v30  ;;  %1552 = vmatprep.mubr.f32.mxu0 %v5589_v31  ;;  %v5718_v30 = vld [vmem:[%s6765_s6 + $0xb8] sm:$0xff] }
 0x23b   :  { %v4633_v35 = vpack.c.bf16 %v4395_v32, %v993_v33  ;;  %4632 = vmatprep.subr.bf16.mxu0 %v4829_v3 }
 0x23d   :  { %v4398_v37 = vpop.f32.mrb[44].mxu1  ;;  %1553 = vmatmul.mubr.f32.gmra.mrb[12].mxu0 %v5596_v34 }
 0x23e   :  { %v1003_v38 = vpop.f32.mrb[45].mxu1  ;;  %4634 = vmatpush1.bf16.msra.mxu0 %v4633_v35  ;;  %1557 = vmatprep.mubr.f32.mxu0 %v5602_v36  ;;  %v5726_v35 = vld [vmem:[%s6765_s6 + $0xb0] sm:$0xff] }
 0x23f   :  { %v4636_v40 = vpack.c.bf16 %v4398_v37, %v1003_v38  ;;  %4635 = vmatprep.subr.bf16.mxu0 %v4829_v3  ;;  %v5731_v38 = vld [vmem:[%s6765_s6 + $0xd8] sm:$0xff] }
 0x241   :  { %v4401_v42 = vpop.f32.mrb[46].mxu1  ;;  %1558 = vmatmul.mubr.f32.gmra.mrb[14].mxu0 %v5609_v39 }
 0x242   :  { %v1013_v43 = vpop.f32.mrb[47].mxu1  ;;  %4637 = vmatpush1.bf16.msra.mxu0 %v4636_v40  ;;  %1562 = vmatprep.mubr.f32.mxu0 %v5615_v41 }
 0x243   :  { %v4639_v45 = vpack.c.bf16 %v4401_v42, %v1013_v43  ;;  %4638 = vmatprep.subr.bf16.mxu0 %v4829_v3  ;;  %v5739_v43 = vld [vmem:[%s6765_s6 + $0xd0] sm:$0xff] }
 0x245   :  { %v4404_v47 = vpop.f32.mrb[48].mxu1  ;;  %1563 = vmatmul.mubr.f32.gmra.mrb[16].mxu0 %v5622_v44 }
 0x246   :  { %v1023_v48 = vpop.f32.mrb[49].mxu1  ;;  %4640 = vmatpush1.bf16.msra.mxu0 %v4639_v45  ;;  %1567 = vmatprep.mubr.f32.mxu0 %v5628_v46 }
 0x247   :  { %v4642_v50 = vpack.c.bf16 %v4404_v47, %v1023_v48  ;;  %4641 = vmatprep.subr.bf16.mxu0 %v4829_v3  ;;  %v5744_v47 = vld [vmem:[%s6765_s6 + $0xf8] sm:$0xff] }
 0x249   :  { %v4407_v52 = vpop.f32.mrb[50].mxu1  ;;  %1568 = vmatmul.mubr.f32.gmra.mrb[18].mxu0 %v5635_v49 }
 0x24a   :  { %v1033_v53 = vpop.f32.mrb[51].mxu1  ;;  %4643 = vmatpush1.bf16.msra.mxu0 %v4642_v50  ;;  %3959 = vmatprep.mubr.msk.f32.mxu0 %vm1443_vm4, %v5641_v51 }
 0x24b   :  { %v4645_v54 = vpack.c.bf16 %v4407_v52, %v1033_v53  ;;  %4644 = vmatprep.subr.bf16.mxu0 %v4829_v3  ;;  %v5752_v52 = vld [vmem:[%s6765_s6 + $0xf0] sm:$0xff] }
 0x24d   :  { %v4410_v55 = vpop.f32.mrb[52].mxu1 }
 0x24e   :  { %v1043_v56 = vpop.f32.mrb[53].mxu1  ;;  %4646 = vmatpush1.bf16.msra.mxu0 %v4645_v54 }
 0x24f   :  { %v4648_v57 = vpack.c.bf16 %v4410_v55, %v1043_v56  ;;  %4647 = vmatprep.subr.bf16.mxu0 %v4829_v3 }
 0x251   :  { %v5648_v58 = vpop.f32.mrb[54].mxu1 }
 0x252   :  { %v1053_v59 = vpop.f32.mrb[55].mxu1  ;;  %4649 = vmatpush1.bf16.msra.mxu0 %v4648_v57 }
 0x253   :  { %1613 = vmatprep.subr.mxu0 %v4831_v9 }
 0x255   :  { %v5656_v62 = vpop.f32.mrb[56].mxu1 }
 0x256   :  { %v1063_v0 = vpop.f32.mrb[57].mxu1  ;;  %1614 = vmatpush1.msra.mxu0 %v1053_v59 }
 0x257   :  { %v4652_v1 = vpack.c.bf16 %v1063_v0, %v5648_v58  ;;  %1638 = vmatmul.mubr.f32.vlgmr.msra.gmra.mrb[20].mxu0 %v5654_v61 }
 0x258   :  { %3960 = vmatprep.mubr.msk.f32.mxu0 %vm1443_vm4, %v5661_v63 }
 0x259   :  { %v5672_v4 = vpop.f32.mrb[58].mxu1 }
 0x25a   :  { %v1073_v6 = vpop.f32.mrb[59].mxu1 }
 0x25b   :  { %v4656_v7 = vpack.c.bf16 %v1073_v6, %v5656_v62  ;;  %1643 = vmatmul.mubr.f32.gmra.mrb[22].mxu0 %v5670_v2 }
 0x25c   :  { %3961 = vmatprep.mubr.msk.f32.mxu0 %vm1443_vm4, %v5677_v5 }
 0x25d   :  { %v4422_v10 = vpop.f32.mrb[60].mxu1 }
 0x25e   :  { %v1083_v13 = vpop.f32.mrb[61].mxu1 }
 0x25f   :  { %v4660_v15 = vpack.c.bf16 %v1083_v13, %v5672_v4  ;;  %1648 = vmatmul.mubr.f32.gmra.mrb[24].mxu0 %v5686_v8 }
 0x260   :  { %3962 = vmatprep.mubr.msk.f32.mxu0 %vm1443_vm4, %v5691_v11 }
 0x261   :  { %v4425_v19 = vpop.f32.mrb[62].mxu1 }
 0x262   :  { %v1093_v22 = vpop.f32.mrb[63].mxu1 }
 0x263   :  { %v4664_v24 = vpack.c.bf16 %v1093_v22, %v4422_v10  ;;  %1653 = vmatmul.mubr.f32.gmra.mrb[26].mxu0 %v5700_v17 }
 0x264   :  { %3963 = vmatprep.mubr.msk.f32.mxu0 %vm1443_vm4, %v5705_v21 }
 0x265   :  { %v4428_v27 = vpop.f32.mrb[64].mxu1 }
 0x266   :  { %v1103_v32 = vpop.f32.mrb[65].mxu1 }
 0x267   :  { %v4668_v33 = vpack.c.bf16 %v1103_v32, %v4425_v19  ;;  %1658 = vmatmul.mubr.f32.gmra.mrb[28].mxu0 %v5713_v26 }
 0x268   :  { %3964 = vmatprep.mubr.msk.f32.mxu0 %vm1443_vm4, %v5718_v30 }
 0x269   :  { %v4431_v37 = vpop.f32.mrb[66].mxu1 }
 0x26a   :  { %v1113_v40 = vpop.f32.mrb[67].mxu1 }
 0x26b   :  { %v4672_v42 = vpack.c.bf16 %v1113_v40, %v4428_v27  ;;  %1663 = vmatmul.mubr.f32.gmra.mrb[30].mxu0 %v5726_v35 }
 0x26c   :  { %3965 = vmatprep.mubr.msk.f32.mxu0 %vm1443_vm4, %v5731_v38 }
 0x26d   :  { %v4434_v45 = vpop.f32.mrb[68].mxu1 }
 0x26e   :  { %v1123_v48 = vpop.f32.mrb[69].mxu1 }
 0x26f   :  { %v4676_v50 = vpack.c.bf16 %v1123_v48, %v4431_v37  ;;  %1668 = vmatmul.mubr.f32.gmra.mrb[32].mxu0 %v5739_v43 }
 0x270   :  { %3966 = vmatprep.mubr.msk.f32.mxu0 %vm1443_vm4, %v5744_v47 }
 0x271   :  { %v4437_v53 = vpop.f32.mrb[70].mxu1 }
 0x272   :  { %v1133_v54 = vpop.f32.mrb[71].mxu1 }
 0x273   :  { %v4680_v55 = vpack.c.bf16 %v1133_v54, %v4434_v45  ;;  %1673 = vmatmul.mubr.f32.gmra.mrb[34].mxu0 %v5752_v52 }
 0x274   :  { %1762 = vmatprep.mubr.f32.mxu0 %v5517_v16 }
 0x275   :  { %v4440_v56 = vpop.f32.mrb[72].mxu1 }
 0x276   :  { %v1143_v57 = vpop.f32.mrb[73].mxu1 }
 0x277   :  { %v4650_v58 = vpack.c.bf16 %v1143_v57, %v4437_v53 }
 0x279   :  { %v4443_v59 = vpop.f32.mrb[74].mxu1  ;;  %4651 = vmatprep.subr.bf16.mxu0 %v4650_v58 }
 0x27a   :  { %v1153_v62 = vpop.f32.mrb[75].mxu1  ;;  %4653 = vmatpush3.bf16.msra.mxu0 %v4652_v1 }
 0x27b   :  { %v4654_v0 = vpack.c.bf16 %v1153_v62, %v4440_v56 }
 0x27d   :  { %v4446_v4 = vpop.f32.mrb[76].mxu1  ;;  %4655 = vmatprep.subr.bf16.mxu0 %v4654_v0 }
 0x27e   :  { %v1163_v6 = vpop.f32.mrb[77].mxu1  ;;  %4657 = vmatpush3.bf16.msra.mxu0 %v4656_v7 }
 0x27f   :  { %v4658_v10 = vpack.c.bf16 %v1163_v6, %v4443_v59 }
 0x281   :  { %v4449_v13 = vpop.f32.mrb[78].mxu1  ;;  %4659 = vmatprep.subr.bf16.mxu0 %v4658_v10 }
 0x282   :  { %v1173_v19 = vpop.f32.mrb[79].mxu1  ;;  %4661 = vmatpush3.bf16.msra.mxu0 %v4660_v15 }
 0x283   :  { %v4662_v22 = vpack.c.bf16 %v1173_v19, %v4446_v4 }
 0x285   :  { %v4452_v27 = vpop.f32.mrb[80].mxu1  ;;  %4663 = vmatprep.subr.bf16.mxu0 %v4662_v22 }
 0x286   :  { %v1183_v16 = vpop.f32.mrb[81].mxu1  ;;  %4665 = vmatpush3.bf16.msra.mxu0 %v4664_v24 }
 0x287   :  { %v4666_v32 = vpack.c.bf16 %v1183_v16, %v4449_v13 }
 0x289   :  { %v4455_v37 = vpop.f32.mrb[82].mxu1  ;;  %4667 = vmatprep.subr.bf16.mxu0 %v4666_v32  ;;  %v1942_v32 = vld [vmem:[%s6766_s10 + $0x10] sm:$0xff] }
 0x28a   :  { %v1193_v40 = vpop.f32.mrb[83].mxu1  ;;  %4669 = vmatpush3.bf16.msra.mxu0 %v4668_v33 }
 0x28b   :  { %v4670_v1 = vpack.c.bf16 %v1193_v40, %v4452_v27  ;;  %v1947_v40 = vld [vmem:[%s6766_s10 + $0x38] sm:$0xff] }
 0x28d   :  { %v4458_v45 = vpop.f32.mrb[84].mxu1  ;;  %4671 = vmatprep.subr.bf16.mxu0 %v4670_v1 }
 0x28e   :  { %v1203_v48 = vpop.f32.mrb[85].mxu1  ;;  %4673 = vmatpush3.bf16.msra.mxu0 %v4672_v42 }
 0x28f   :  { %v4674_v7 = vpack.c.bf16 %v1203_v48, %v4455_v37  ;;  %v1945_v37 = vld [vmem:[%s6766_s10 + $0x28] sm:$0xff] }
 0x290   :  { %v4716_v48 = vpack.c.bf16 %v1947_v40, %v1945_v37  ;;  %v3061_v40 = vld [vmem:[%s6768_s12 + $0x10] sm:$0xff] }
 0x291   :  { %v4461_v53 = vpop.f32.mrb[86].mxu1  ;;  %4675 = vmatprep.subr.bf16.mxu0 %v4674_v7  ;;  %v1944_v7 = vld [vmem:[%s6766_s10 + $0x20] sm:$0xff] }
 0x292   :  { %v1213_v54 = vpop.f32.mrb[87].mxu1  ;;  %4677 = vmatpush3.bf16.msra.mxu0 %v4676_v50 }
 0x293   :  { %v4678_v15 = vpack.c.bf16 %v1213_v54, %v4458_v45  ;;  %v1949_v54 = vld [vmem:[%s6766_s10 + $0x48] sm:$0xff] }
 0x295   :  { %v4464_v56 = vpop.f32.mrb[88].mxu1  ;;  %4679 = vmatprep.subr.bf16.mxu0 %v4678_v15  ;;  %v1951_v15 = vld [vmem:[%s6766_s10 + $0x58] sm:$0xff] }
 0x296   :  { %v1223_v57 = vpop.f32.mrb[89].mxu1  ;;  %4681 = vmatpush3.bf16.msra.mxu0 %v4680_v55 }
 0x297   :  { %v4683_v24 = vpack.c.bf16 %v1223_v57, %v4461_v53  ;;  %4682 = vmatprep.subr.bf16.mxu0 %v4829_v3  ;;  %v1946_v53 = vld [vmem:[%s6766_s10 + $0x30] sm:$0xff]  ;;  %v4720_v57 = vpack.c.bf16 %v1951_v15, %v1949_v54 }
 0x299   :  { %v4467_v58 = vpop.f32.mrb[90].mxu1  ;;  %1763 = vmatmul.mubr.f32.vlgmr.msra.gmra.mrb[36].mxu0 %v5544_v12 }
 0x29a   :  { %v1233_v33 = vpop.f32.mrb[91].mxu1  ;;  %4684 = vmatpush1.bf16.msra.mxu0 %v4683_v24  ;;  %1767 = vmatprep.mubr.f32.mxu0 %v5550_v14  ;;  %v1948_v24 = vld [vmem:[%s6766_s10 + $0x40] sm:$0xff] }
 0x29b   :  { %v4686_v42 = vpack.c.bf16 %v1233_v33, %v4464_v56  ;;  %4685 = vmatprep.subr.bf16.mxu0 %v4829_v3  ;;  %v4718_v56 = vpack.c.bf16 %v1946_v53, %v1944_v7 }
 0x29d   :  { %v4470_v59 = vpop.f32.mrb[92].mxu1  ;;  %1768 = vmatmul.mubr.f32.gmra.mrb[38].mxu0 %v5557_v18 }
 0x29e   :  { %v1243_v50 = vpop.f32.mrb[93].mxu1  ;;  %4687 = vmatpush1.bf16.msra.mxu0 %v4686_v42  ;;  %1772 = vmatprep.mubr.f32.mxu0 %v5563_v20 }
 0x29f   :  { %v4689_v55 = vpack.c.bf16 %v1243_v50, %v4467_v58  ;;  %4688 = vmatprep.subr.bf16.mxu0 %v4829_v3  ;;  %v1950_v58 = vld [vmem:[%s6766_s10 + $0x50] sm:$0xff] }
 0x2a0   :  { %v4722_v33 = vpack.c.bf16 %v1950_v58, %v1948_v24  ;;  %v1954_v50 = vld [vmem:[%s6766_s10 + $0x70] sm:$0xff] }
 0x2a1   :  { %v4473_v62 = vpop.f32.mrb[94].mxu1  ;;  %1773 = vmatmul.mubr.f32.gmra.mrb[40].mxu0 %v5570_v23 }
 0x2a2   :  { %v1253_v12 = vpop.f32.mrb[95].mxu1  ;;  %4690 = vmatpush1.bf16.msra.mxu0 %v4689_v55  ;;  %1777 = vmatprep.mubr.f32.mxu0 %v5576_v25 }
 0x2a3   :  { %v4692_v14 = vpack.c.bf16 %v1253_v12, %v4470_v59  ;;  %4691 = vmatprep.subr.bf16.mxu0 %v4829_v3  ;;  %v1952_v59 = vld [vmem:[%s6766_s10 + $0x60] sm:$0xff] }
 0x2a5   :  { %v4476_v0 = vpop.f32.mrb[96].mxu1  ;;  %1778 = vmatmul.mubr.f32.gmra.mrb[42].mxu0 %v5583_v28 }
 0x2a6   :  { %v1263_v18 = vpop.f32.mrb[97].mxu1  ;;  %4693 = vmatpush1.bf16.msra.mxu0 %v4692_v14  ;;  %1782 = vmatprep.mubr.f32.mxu0 %v5589_v31 }
 0x2a7   :  { %v4695_v20 = vpack.c.bf16 %v1263_v18, %v4473_v62  ;;  %4694 = vmatprep.subr.bf16.mxu0 %v4829_v3 }
 0x2a9   :  { %v4479_v4 = vpop.f32.mrb[98].mxu1  ;;  %1783 = vmatmul.mubr.f32.gmra.mrb[44].mxu0 %v5596_v34 }
 0x2aa   :  { %v1273_v23 = vpop.f32.mrb[99].mxu1  ;;  %4696 = vmatpush1.bf16.msra.mxu0 %v4695_v20  ;;  %1787 = vmatprep.mubr.f32.mxu0 %v5602_v36 }
 0x2ab   :  { %v4698_v25 = vpack.c.bf16 %v1273_v23, %v4476_v0  ;;  %4697 = vmatprep.subr.bf16.mxu0 %v4829_v3 }
 0x2ad   :  { %v4482_v6 = vpop.f32.mrb[100].mxu1  ;;  %1788 = vmatmul.mubr.f32.gmra.mrb[46].mxu0 %v5609_v39 }
 0x2ae   :  { %v1283_v28 = vpop.f32.mrb[101].mxu1  ;;  %4699 = vmatpush1.bf16.msra.mxu0 %v4698_v25  ;;  %1792 = vmatprep.mubr.f32.mxu0 %v5615_v41 }
 0x2af   :  { %v4701_v31 = vpack.c.bf16 %v1283_v28, %v4479_v4  ;;  %v5774_v10 = vpop.f32.mrb[2].mxu0  ;;  %4700 = vmatprep.subr.bf16.mxu0 %v4829_v3 }
 0x2b0   :  { %v4502_v34 = vpop.f32.mrb[3].mxu0 }
 0x2b1   :  { %v4485_v13 = vpop.f32.mrb[102].mxu1  ;;  %1793 = vmatmul.mubr.f32.gmra.mrb[48].mxu0 %v5622_v44 }
 0x2b2   :  { %v1293_v36 = vpop.f32.mrb[103].mxu1  ;;  %4702 = vmatpush1.bf16.msra.mxu0 %v4701_v31  ;;  %1797 = vmatprep.mubr.f32.mxu0 %v5628_v46  ;;  %v1941_v46 = vld [vmem:[%s6766_s10 + $0x8] sm:$0xff] }
 0x2b3   :  { %v4704_v19 = vpack.c.bf16 %v1293_v36, %v4482_v6  ;;  %4703 = vmatprep.subr.bf16.mxu0 %v4829_v3 }
 0x2b5   :  { %v4488_v39 = vpop.f32.mrb[104].mxu1  ;;  %1798 = vmatmul.mubr.f32.gmra.mrb[50].mxu0 %v5635_v49  ;;  %v1943_v49 = vld [vmem:[%s6766_s10 + $0x18] sm:$0xff] }
 0x2b6   :  { %v1303_v41 = vpop.f32.mrb[105].mxu1  ;;  %4705 = vmatpush1.bf16.msra.mxu0 %v4704_v19  ;;  %3967 = vmatprep.mubr.msk.f32.mxu0 %vm1443_vm4, %v5641_v51  ;;  %v1940_v51 = vld [vmem:[%s6766_s10] sm:$0xff]  ;;  %v4712_v1 = vpack.c.bf16 %v1943_v49, %v1941_v46  ;;  %v3060_v46 = vld [vmem:[%s6768_s12 + $0x8] sm:$0xff] }
 0x2b7   :  { %v4707_v22 = vpack.c.bf16 %v1303_v41, %v4485_v13  ;;  %4706 = vmatprep.subr.bf16.mxu0 %v4829_v3  ;;  %v4714_v45 = vpack.c.bf16 %v1942_v32, %v1940_v51 }
 0x2b9   :  { %v4491_v27 = vpop.f32.mrb[106].mxu1 }
 0x2ba   :  { %v1313_v44 = vpop.f32.mrb[107].mxu1  ;;  %4708 = vmatpush1.bf16.msra.mxu0 %v4707_v22 }
 0x2bb   :  { %v4710_v16 = vpack.c.bf16 %v1313_v44, %v4488_v39  ;;  %4709 = vmatprep.subr.bf16.mxu0 %v4829_v3 }
 0x2be   :  { %4711 = vmatpush1.bf16.msra.mxu0 %v4710_v16  ;;  %v3059_v16 = vld [vmem:[%s6768_s12] sm:$0xff] }
 0x2bf   :  { %1843 = vmatprep.subr.mxu0 %v4831_v9  ;;  %v4729_v51 = vpack.c.bf16 %v3060_v46, %v3059_v16 }
 0x2c1   :  { %4804 = vmatpush1.bf16.msra.mxu1 %v4729_v51 }
 0x2c2   :  { %1844 = vmatpush1.msra.mxu0 %v4491_v27  ;;  %4789 = vmatprep.subr.bf16.mxu1 %v4829_v3 }
 0x2c3   :  { %1868 = vmatmul.mubr.f32.vlgmr.msra.gmra.mrb[52].mxu0 %v5654_v61  ;;  %4713 = vmatprep.subr.bf16.mxu0 %v4712_v1  ;;  %v1953_v61 = vld [vmem:[%s6766_s10 + $0x68] sm:$0xff]  ;;  %v3062_v1 = vld [vmem:[%s6768_s12 + $0x18] sm:$0xff] }
 0x2c4   :  { %3968 = vmatprep.mubr.msk.f32.mxu0 %vm1443_vm4, %v5661_v63  ;;  %4715 = vmatpush1.bf16.msra.mxu0 %v4714_v45  ;;  %v1955_v63 = vld [vmem:[%s6766_s10 + $0x78] sm:$0xff]  ;;  %v4732_v45 = vpack.c.bf16 %v3062_v1, %v3061_v40  ;;  %v3073_v40 = vld [vmem:[%s6768_s12 + $0x70] sm:$0xff]  ;;  %v5964_v1 = vld [vmem:[%s6758_s0 + $0xa8] sm:$0xff] }
 0x2c5   :  { %4717 = vmatprep.subr.bf16.mxu0 %v4716_v48  ;;  %v4724_v42 = vpack.c.bf16 %v1955_v63, %v1953_v61 }
 0x2c6   :  { %4805 = vmatpush1.bf16.msra.mxu1 %v4732_v45 }
 0x2c7   :  { %1873 = vmatmul.mubr.f32.gmra.mrb[54].mxu0 %v5670_v2  ;;  %v4726_v2 = vpack.c.bf16 %v1954_v50, %v1952_v59  ;;  %4790 = vmatprep.subr.bf16.mxu1 %v4829_v3 }
 0x2c8   :  { %3969 = vmatprep.mubr.msk.f32.mxu0 %vm1443_vm4, %v5677_v5  ;;  %4719 = vmatpush1.bf16.msra.mxu0 %v4718_v56  ;;  %v1439_v5 = vlaneseq }
 0x2c9   :  { %4721 = vmatprep.subr.bf16.mxu0 %v4720_v57 }
 0x2cb   :  { %1878 = vmatmul.mubr.f32.gmra.mrb[56].mxu0 %v5686_v8  ;;  %v5859_v8 = vshrl.u32 %v1439_v5, 7 }
 0x2cc   :  { %3970 = vmatprep.mubr.msk.f32.mxu0 %vm1443_vm4, %v5691_v11  ;;  %4723 = vmatpush1.bf16.msra.mxu0 %v4722_v33  ;;  %v3957_v11 = vld [vmem:[%s6767_s9] ss:$0 sm:$0xff] }
 0x2cd   :  { %4725 = vmatprep.subr.bf16.mxu0 %v4724_v42  ;;  %v3063_v33 = vld [vmem:[%s6768_s12 + $0x20] sm:$0xff]  ;;  %v3064_v42 = vld [vmem:[%s6768_s12 + $0x28] sm:$0xff]  ;;  %vm2419_vm5 = vcmp.lt.s32.totalorder %v5859_v8, 1 }
 0x2ce   :  { %v4735_v59 = vpack.c.bf16 %v3064_v42, %v3063_v33  ;;  %v3078_v33 = vld [vmem:[%s6768_s12 + $0x98] sm:$0xff] }
 0x2cf   :  { %1883 = vmatmul.mubr.f32.gmra.mrb[58].mxu0 %v5700_v17  ;;  %v5865_v17 = vsub.s32 0, %v5859_v8 }
 0x2d0   :  { %3971 = vmatprep.mubr.msk.f32.mxu0 %vm1443_vm4, %v5705_v21  ;;  %4727 = vmatpush1.bf16.msra.mxu0 %v4726_v2  ;;  %v5868_v21 = vadd.f32 %v3957_v11, %v5774_v10 }
 0x2d1   :  { %4728 = vmatprep.subr.bf16.mxu0 %v4829_v3  ;;  %4806 = vmatpush1.bf16.msra.mxu1 %v4735_v59 }
 0x2d2   :  { %4791 = vmatprep.subr.bf16.mxu1 %v4829_v3 }
 0x2d3   :  { %1888 = vmatmul.mubr.f32.gmra.mrb[60].mxu0 %v5713_v26 }
 0x2d4   :  { %3972 = vmatprep.mubr.msk.f32.mxu0 %vm1443_vm4, %v5718_v30 }
 0x2d7   :  { %1893 = vmatmul.mubr.f32.gmra.mrb[62].mxu0 %v5726_v35  ;;  %v1442_v35 = vrot.slane %v5868_v21, %v5865_v17 }
 0x2d8   :  { %3973 = vmatprep.mubr.msk.f32.mxu0 %vm1443_vm4, %v5731_v38 }
 0x2db   :  { %1898 = vmatmul.mubr.f32.gmra.mrb[64].mxu0 %v5739_v43 }
 0x2dc   :  { %3974 = vmatprep.mubr.msk.f32.mxu0 %vm1443_vm4, %v5744_v47 }
 0x2df   :  { %1903 = vmatmul.mubr.f32.gmra.mrb[66].mxu0 %v5752_v52 }
 0x2e0   :  { %2080 = vmatprep.mubr.f32.mxu0 %v4831_v9 }
 0x300   :  { %v4209_v26 = vpop.f32.mrb[4].mxu0 }
 0x301   :  { %v4210_v30 = vpop.f32.mrb[5].mxu0 }
 0x302   :  { %v4211_v38 = vadd.f32 %v4210_v30, %v4209_v26 }
 0x304   :  { %v4212_v43 = vpop.f32.mrb[6].mxu0  ;;  %v1535_v47 = vadd.f32 %v4211_v38, %v1442_v35 }
 0x305   :  { %v4213_v52 = vpop.f32.mrb[7].mxu0 }
 0x306   :  { %v4214_v55 = vadd.f32 %v4213_v52, %v4212_v43 }
 0x308   :  { %v4215_v62 = vpop.f32.mrb[8].mxu0  ;;  %v1540_v12 = vadd.f32 %v4214_v55, %v1442_v35  ;;  %v3065_v55 = vld [vmem:[%s6768_s12 + $0x30] sm:$0xff] }
 0x309   :  { %v4216_v14 = vpop.f32.mrb[9].mxu0 }
 0x30a   :  { %v4217_v0 = vadd.f32 %v4216_v14, %v4215_v62  ;;  %v3066_v62 = vld [vmem:[%s6768_s12 + $0x38] sm:$0xff] }
 0x30b   :  { %v4738_v14 = vpack.c.bf16 %v3066_v62, %v3065_v55  ;;  %v3086_v55 = vld [vmem:[%s6768_s12 + $0xd8] sm:$0xff] }
 0x30c   :  { %v4218_v18 = vpop.f32.mrb[10].mxu0  ;;  %v1545_v20 = vadd.f32 %v4217_v0, %v1442_v35 }
 0x30d   :  { %v4219_v4 = vpop.f32.mrb[11].mxu0  ;;  %4807 = vmatpush1.bf16.msra.mxu1 %v4738_v14 }
 0x30e   :  { %v4220_v23 = vadd.f32 %v4219_v4, %v4218_v18  ;;  %4792 = vmatprep.subr.bf16.mxu1 %v4829_v3 }
 0x310   :  { %v4221_v25 = vpop.f32.mrb[12].mxu0  ;;  %v1550_v6 = vadd.f32 %v4220_v23, %v1442_v35  ;;  %v3067_v23 = vld [vmem:[%s6768_s12 + $0x40] sm:$0xff] }
 0x311   :  { %v4222_v28 = vpop.f32.mrb[13].mxu0 }
 0x312   :  { %v4223_v31 = vadd.f32 %v4222_v28, %v4221_v25  ;;  %v3068_v25 = vld [vmem:[%s6768_s12 + $0x48] sm:$0xff]  ;;  %v3069_v28 = vld [vmem:[%s6768_s12 + $0x50] sm:$0xff] }
 0x314   :  { %v4224_v10 = vpop.f32.mrb[14].mxu0  ;;  %v1555_v34 = vadd.f32 %v4223_v31, %v1442_v35  ;;  %v3070_v31 = vld [vmem:[%s6768_s12 + $0x58] sm:$0xff] }
 0x315   :  { %v4225_v13 = vpop.f32.mrb[15].mxu0 }
 0x316   :  { %v4226_v36 = vadd.f32 %v4225_v13, %v4224_v10 }
 0x318   :  { %v4227_v19 = vpop.f32.mrb[16].mxu0  ;;  %v5872_v39 = vadd.f32 %v4226_v36, %v1442_v35 }
 0x319   :  { %v4228_v41 = vpop.f32.mrb[17].mxu0 }
 0x31a   :  { %v4229_v22 = vadd.f32 %v4228_v41, %v4227_v19  ;;  %v3071_v41 = vld [vmem:[%s6768_s12 + $0x60] sm:$0xff] }
 0x31c   :  { %v4230_v27 = vpop.f32.mrb[18].mxu0  ;;  %v5874_v44 = vadd.f32 %v4229_v22, %v1442_v35  ;;  %v3072_v22 = vld [vmem:[%s6768_s12 + $0x68] sm:$0xff] }
 0x31d   :  { %v4231_v49 = vpop.f32.mrb[19].mxu0 }
 0x31e   :  { %v4232_v32 = vadd.f32 %v4231_v49, %v4230_v27 }
 0x320   :  { %v5882_v37 = vadd.f32 %v4232_v32, %v1442_v35  ;;  %v5951_v32 = vld [vmem:[%s6758_s0 + $0x98] sm:$0xff] }
 0x32a   :  { %v1639_v48 = vpop.f32.mrb[20].mxu0 }
 0x32b   :  { %v1640_v7 = vadd.f32 %v1639_v48, %v1535_v47  ;;  %v1641_v53 = vpop.f32.mrb[21].mxu0 }
 0x32d   :  { %v1678_v54 = vmax.f32 %v1640_v7, 0.0  ;;  %v2374_v7 = vrot.slane %v5964_v1, 7 }
 0x32e   :  { %v1644_v15 = vpop.f32.mrb[22].mxu0 }
 0x32f   :  { %1686 = vst.msk [vmem:[#allocation3] sm:$0xff] %vm221_vm2, %v1678_v54  ;;  %v1645_v56 = vadd.f32 %v1644_v15, %v1540_v12  ;;  %v1646_v57 = vpop.f32.mrb[23].mxu0 }
 0x330   :  { %v3076_v57 = vld [vmem:[%s6768_s12 + $0x88] sm:$0xff] }
 0x331   :  { %v1679_v24 = vmax.f32 %v1645_v56, 0.0  ;;  %v3075_v56 = vld [vmem:[%s6768_s12 + $0x80] sm:$0xff] }
 0x332   :  { %v1649_v58 = vpop.f32.mrb[24].mxu0 }
 0x333   :  { %1687 = vst.msk [vmem:[#allocation3 + $0x8] sm:$0xff] %vm221_vm2, %v1679_v24  ;;  %v1650_v61 = vadd.f32 %v1649_v58, %v1545_v20  ;;  %v1651_v63 = vpop.f32.mrb[25].mxu0 }
 0x334   :  { %v3077_v63 = vld [vmem:[%s6768_s12 + $0x90] sm:$0xff] }
 0x335   :  { %v1680_v50 = vmax.f32 %v1650_v61, 0.0  ;;  %v4753_v61 = vpack.c.bf16 %v3076_v57, %v3075_v56 }
 0x336   :  { %v1654_v2 = vpop.f32.mrb[26].mxu0  ;;  %v1924_v11 = vld [vmem:[#allocation3] sm:$0xff] }
 0x337   :  { %1688 = vst.msk [vmem:[#allocation3 + $0x10] sm:$0xff] %vm221_vm2, %v1680_v50  ;;  %v1655_v26 = vadd.f32 %v1654_v2, %v1550_v6  ;;  %3975 = vmatmul.mubr.msk.f32.vlgmr.msra.gmra.mrb[68].mxu0 %vm221_vm2, %v1924_v11  ;;  %v1656_v30 = vpop.f32.mrb[27].mxu0  ;;  %v4741_v6 = vpack.c.bf16 %v3068_v25, %v3067_v23  ;;  %v3079_v50 = vld [vmem:[%s6768_s12 + $0xa0] sm:$0xff]  ;;  %v3080_v2 = vld [vmem:[%s6768_s12 + $0xa8] sm:$0xff] }
 0x338   :  { %2086 = vmatprep.mubr.f32.mxu0 %v4831_v9  ;;  %4730 = vmatpush1.bf16.msra.mxu0 %v4729_v51  ;;  %v4747_v51 = vpack.c.bf16 %v3072_v22, %v3071_v41  ;;  %v4759_v11 = vpack.c.bf16 %v3080_v2, %v3079_v50  ;;  %v3082_v30 = vld [vmem:[%s6768_s12 + $0xb8] sm:$0xff] }
 0x339   :  { %v1681_v35 = vmax.f32 %v1655_v26, 0.0  ;;  %4731 = vmatprep.subr.bf16.mxu0 %v4829_v3  ;;  %4808 = vmatpush1.bf16.msra.mxu1 %v4741_v6  ;;  %v3081_v26 = vld [vmem:[%s6768_s12 + $0xb0] sm:$0xff] }
 0x33a   :  { %v1659_v38 = vpop.f32.mrb[28].mxu0  ;;  %v1925_v43 = vld [vmem:[#allocation3 + $0x8] sm:$0xff]  ;;  %4793 = vmatprep.subr.bf16.mxu1 %v4829_v3 }
 0x33b   :  { %1689 = vst.msk [vmem:[#allocation3 + $0x18] sm:$0xff] %vm221_vm2, %v1681_v35  ;;  %v1660_v47 = vadd.f32 %v1659_v38, %v1555_v34  ;;  %3976 = vmatmul.mubr.msk.f32.gmra.mrb[70].mxu0 %vm221_vm2, %v1925_v43  ;;  %v1661_v52 = vpop.f32.mrb[29].mxu0  ;;  %v4762_v35 = vpack.c.bf16 %v3082_v30, %v3081_v26  ;;  %v3083_v38 = vld [vmem:[%s6768_s12 + $0xc0] sm:$0xff]  ;;  %v3084_v43 = vld [vmem:[%s6768_s12 + $0xc8] sm:$0xff] }
 0x33c   :  { %2092 = vmatprep.mubr.f32.mxu0 %v4831_v9  ;;  %4733 = vmatpush1.bf16.msra.mxu0 %v4732_v45  ;;  %v2372_v45 = vrot.slane %v5951_v32, 7  ;;  %v3085_v52 = vld [vmem:[%s6768_s12 + $0xd0] sm:$0xff] }
 0x33d   :  { %v1682_v12 = vmax.f32 %v1660_v47, 0.0  ;;  %4734 = vmatprep.subr.bf16.mxu0 %v4829_v3  ;;  %v4765_v47 = vpack.c.bf16 %v3084_v43, %v3083_v38  ;;  %v4768_v62 = vpack.c.bf16 %v3086_v55, %v3085_v52 }
 0x33e   :  { %v1664_v0 = vpop.f32.mrb[30].mxu0  ;;  %v1926_v18 = vld [vmem:[#allocation3 + $0x10] sm:$0xff]  ;;  %v2463_v15 = vsel %vm2419_vm5, %v2372_v45, %v2374_v7 }
 0x33f   :  { %1690 = vst.msk [vmem:[#allocation3 + $0x20] sm:$0xff] %vm221_vm2, %v1682_v12  ;;  %v1665_v20 = vadd.f32 %v1664_v0, %v5872_v39  ;;  %3977 = vmatmul.mubr.msk.f32.gmra.mrb[72].mxu0 %vm221_vm2, %v1926_v18  ;;  %v1666_v4 = vpop.f32.mrb[31].mxu0  ;;  %v4744_v39 = vpack.c.bf16 %v3070_v31, %v3069_v28  ;;  %v2952_v24 = vsub.f32 %v5964_v1, %v2463_v15  ;;  %v3087_v12 = vld [vmem:[%s6768_s12 + $0xe0] sm:$0xff]  ;;  %v6042_v0 = vld [vmem:[%s6758_s0 + $0x90] sm:$0xff]  ;;  %v3090_v28 = vld [vmem:[%s6768_s12 + $0xf8] sm:$0xff] }
 0x340   :  { %2098 = vmatprep.mubr.f32.mxu0 %v4831_v9  ;;  %4736 = vmatpush1.bf16.msra.mxu0 %v4735_v59  ;;  %v4756_v59 = vpack.c.bf16 %v3078_v33, %v3077_v63  ;;  %v73_v18 = vld [vmem:[%s6758_s0 + $0xa0] sm:$0xff]  ;;  %v2371_v23 = vrot.slane %v6042_v0, 7 }
 0x341   :  { %v1683_v10 = vmax.f32 %v1665_v20, 0.0  ;;  %4737 = vmatprep.subr.bf16.mxu0 %v4829_v3  ;;  %4809 = vmatpush1.bf16.msra.mxu1 %v4744_v39  ;;  %v76_v20 = vld [vmem:[%s6758_s0 + $0xb8] sm:$0xff]  ;;  %v2373_v25 = vrot.slane %v73_v18, 7 }
 0x342   :  { %v1669_v34 = vpop.f32.mrb[32].mxu0  ;;  %v1927_v13 = vld [vmem:[#allocation3 + $0x18] sm:$0xff]  ;;  %4794 = vmatprep.subr.bf16.mxu1 %v4829_v3  ;;  %3212 = vmatprep.mubr.f32.mxu1 %v2952_v24  ;;  %v2376_v31 = vrot.slane %v76_v20, 7 }
 0x343   :  { %1691 = vst.msk [vmem:[#allocation3 + $0x28] sm:$0xff] %vm221_vm2, %v1683_v10  ;;  %v1670_v36 = vadd.f32 %v1669_v34, %v5874_v44  ;;  %3978 = vmatmul.mubr.msk.f32.gmra.mrb[74].mxu0 %vm221_vm2, %v1927_v13  ;;  %v1671_v19 = vpop.f32.mrb[33].mxu0  ;;  %v75_v10 = vld [vmem:[%s6758_s0 + $0xb0] sm:$0xff]  ;;  %v78_v34 = vld [vmem:[%s6758_s0 + $0xc8] sm:$0xff]  ;;  %v1696_v13 = vsub.s32 1, %v5859_v8 }
 0x344   :  { %2104 = vmatprep.mubr.f32.mxu0 %v4831_v9  ;;  %4739 = vmatpush1.bf16.msra.mxu0 %v4738_v14  ;;  %v3088_v14 = vld [vmem:[%s6768_s12 + $0xe8] sm:$0xff]  ;;  %v2462_v19 = vsel %vm2419_vm5, %v2371_v23, %v2373_v25  ;;  %v2461_v22 = vsel %vm2419_vm5, %v2374_v7, %v2376_v31 }
 0x345   :  { %v1684_v27 = vmax.f32 %v1670_v36, 0.0  ;;  %4740 = vmatprep.subr.bf16.mxu0 %v4829_v3  ;;  %4810 = vmatpush1.bf16.msra.mxu1 %v4747_v51  ;;  %v4771_v4 = vpack.c.bf16 %v3088_v14, %v3087_v12 }
 0x346   :  { %v1674_v44 = vpop.f32.mrb[34].mxu0  ;;  %v1928_v16 = vld [vmem:[#allocation3 + $0x20] sm:$0xff]  ;;  %4795 = vmatprep.subr.bf16.mxu1 %v4829_v3 }
 0x347   :  { %1692 = vst.msk [vmem:[#allocation3 + $0x30] sm:$0xff] %vm221_vm2, %v1684_v27  ;;  %v1675_v46 = vadd.f32 %v1674_v44, %v5882_v37  ;;  %3979 = vmatmul.mubr.msk.f32.gmra.mrb[76].mxu0 %vm221_vm2, %v1928_v16  ;;  %v1676_v49 = vpop.f32.mrb[35].mxu0  ;;  %v3074_v37 = vld [vmem:[%s6768_s12 + $0x78] sm:$0xff]  ;;  %v2378_v27 = vrot.slane %v78_v34, 7  ;;  %v77_v44 = vld [vmem:[%s6758_s0 + $0xc0] sm:$0xff] }
 0x348   :  { %2110 = vmatprep.mubr.f32.mxu0 %v4831_v9  ;;  %4742 = vmatpush1.bf16.msra.mxu0 %v4741_v6  ;;  %v4750_v54 = vpack.c.bf16 %v3074_v37, %v3073_v40  ;;  %v3089_v6 = vld [vmem:[%s6768_s12 + $0xf0] sm:$0xff]  ;;  %v6087_v49 = vrot.slane %v5868_v21, %v1696_v13  ;;  %v2951_v40 = vsub.f32 %v73_v18, %v2462_v19 }
 0x349   :  { %v1685_v48 = vmax.f32 %v1675_v46, 0.0  ;;  %4743 = vmatprep.subr.bf16.mxu0 %v4829_v3  ;;  %v4774_v36 = vpack.c.bf16 %v3090_v28, %v3089_v6  ;;  %v6082_v46 = vld [vmem:[%s6758_s0 + $0xd8] sm:$0xff]  ;;  %v2954_v37 = vsub.f32 %v76_v20, %v2461_v22 }
 0x34a   :  { %v1929_v53 = vld [vmem:[#allocation3 + $0x28] sm:$0xff]  ;;  %4811 = vmatpush1.bf16.msra.mxu1 %v4750_v54  ;;  %v2380_v21 = vrot.slane %v6082_v46, 7 }
 0x34b   :  { %1693 = vst.msk [vmem:[#allocation3 + $0x38] sm:$0xff] %vm221_vm2, %v1685_v48  ;;  %3980 = vmatmul.mubr.msk.f32.gmra.mrb[78].mxu0 %vm221_vm2, %v1929_v53  ;;  %4796 = vmatprep.subr.bf16.mxu1 %v4829_v3  ;;  %v2377_v48 = vrot.slane %v77_v44, 7 }
 0x34c   :  { %2116 = vmatprep.mubr.f32.mxu0 %v4831_v9  ;;  %4745 = vmatpush1.bf16.msra.mxu0 %v4744_v39  ;;  %v2375_v39 = vrot.slane %v75_v10, 7  ;;  %v2457_v33 = vsel %vm2419_vm5, %v2378_v27, %v2380_v21 }
 0x34d   :  { %4746 = vmatprep.subr.bf16.mxu0 %v4829_v3  ;;  %v2958_v2 = vsub.f32 %v6082_v46, %v2457_v33 }
 0x34e   :  { %v1930_v58 = vld [vmem:[#allocation3 + $0x30] sm:$0xff]  ;;  %4812 = vmatpush1.bf16.msra.mxu1 %v4753_v61  ;;  %v2460_v1 = vsel %vm2419_vm5, %v2373_v25, %v2375_v39 }
 0x34f   :  { %3981 = vmatmul.mubr.msk.f32.gmra.mrb[80].mxu0 %vm221_vm2, %v1930_v58  ;;  %4797 = vmatprep.subr.bf16.mxu1 %v4829_v3  ;;  %v2953_v57 = vsub.f32 %v75_v10, %v2460_v1  ;;  %v2458_v58 = vsel %vm2419_vm5, %v2375_v39, %v2377_v48  ;;  %v82_v10 = vld [vmem:[%s6758_s0 + $0xe8] sm:$0xff] }
 0x350   :  { %2122 = vmatprep.mubr.f32.mxu0 %v4831_v9  ;;  %4748 = vmatpush1.bf16.msra.mxu0 %v4747_v51  ;;  %v2955_v50 = vsub.f32 %v77_v44, %v2458_v58  ;;  %v2382_v39 = vrot.slane %v82_v10, 7 }
 0x351   :  { %4749 = vmatprep.subr.bf16.mxu0 %v4829_v3 }
 0x352   :  { %v1931_v42 = vld [vmem:[#allocation3 + $0x38] sm:$0xff]  ;;  %4813 = vmatpush1.bf16.msra.mxu1 %v4756_v59  ;;  %v2455_v46 = vsel %vm2419_vm5, %v2380_v21, %v2382_v39 }
 0x353   :  { %3982 = vmatmul.mubr.msk.f32.gmra.mrb[82].mxu0 %vm221_vm2, %v1931_v42  ;;  %4798 = vmatprep.subr.bf16.mxu1 %v4829_v3 }
 0x354   :  { %2128 = vmatprep.mubr.f32.mxu0 %v4831_v9  ;;  %4751 = vmatpush1.bf16.msra.mxu0 %v4750_v54  ;;  %v2459_v54 = vsel %vm2419_vm5, %v2376_v31, %v2378_v27 }
 0x355   :  { %4752 = vmatprep.subr.bf16.mxu0 %v4829_v3  ;;  %v2956_v24 = vsub.f32 %v78_v34, %v2459_v54 }
 0x356   :  { %4814 = vmatpush1.bf16.msra.mxu1 %v4759_v11 }
 0x357   :  { %4799 = vmatprep.subr.bf16.mxu1 %v4829_v3 }
 0x358   :  { %4754 = vmatpush1.bf16.msra.mxu0 %v4753_v61 }
 0x359   :  { %4755 = vmatprep.subr.bf16.mxu0 %v4829_v3 }
 0x35a   :  { %4815 = vmatpush1.bf16.msra.mxu1 %v4762_v35 }
 0x35b   :  { %4800 = vmatprep.subr.bf16.mxu1 %v4829_v3 }
 0x35c   :  { %4757 = vmatpush1.bf16.msra.mxu0 %v4756_v59 }
 0x35d   :  { %4758 = vmatprep.subr.bf16.mxu0 %v4829_v3 }
 0x35e   :  { %4816 = vmatpush1.bf16.msra.mxu1 %v4765_v47 }
 0x35f   :  { %4801 = vmatprep.subr.bf16.mxu1 %v4829_v3 }
 0x360   :  { %4760 = vmatpush1.bf16.msra.mxu0 %v4759_v11 }
 0x361   :  { %4761 = vmatprep.subr.bf16.mxu0 %v4829_v3 }
 0x362   :  { %4817 = vmatpush1.bf16.msra.mxu1 %v4768_v62 }
 0x363   :  { %4802 = vmatprep.subr.bf16.mxu1 %v4829_v3 }
 0x364   :  { %4763 = vmatpush1.bf16.msra.mxu0 %v4762_v35 }
 0x365   :  { %4764 = vmatprep.subr.bf16.mxu0 %v4829_v3 }
 0x366   :  { %4818 = vmatpush1.bf16.msra.mxu1 %v4771_v4 }
 0x367   :  { %4803 = vmatprep.subr.bf16.mxu1 %v4829_v3 }
 0x368   :  { %4766 = vmatpush1.bf16.msra.mxu0 %v4765_v47 }
 0x369   :  { %4767 = vmatprep.subr.bf16.mxu0 %v4829_v3 }
 0x36a   :  { %4819 = vmatpush1.bf16.msra.mxu1 %v4774_v36 }
 0x36c   :  { %v4265_v41 = vpop.f32.mrb[36].mxu0  ;;  %4769 = vmatpush1.bf16.msra.mxu0 %v4768_v62 }
 0x36d   :  { %v4266_v16 = vpop.f32.mrb[37].mxu0  ;;  %4770 = vmatprep.subr.bf16.mxu0 %v4829_v3  ;;  %3213 = vmatmul.mubr.f32.vlgmr.msra.gmra.mrb[108].mxu1 %v2951_v40  ;;  %v2960_v40 = vsub.f32 %v82_v10, %v2455_v46 }
 0x36e   :  { %v4267_v51 = vadd.f32 %v4266_v16, %v4265_v41  ;;  %3217 = vmatprep.mubr.f32.mxu1 %v2954_v37  ;;  %v81_v41 = vld [vmem:[%s6758_s0 + $0xe0] sm:$0xff]  ;;  %v6131_v16 = vld [vmem:[%s6758_s0 + $0xf0] sm:$0xff] }
 0x36f   :  { %v2381_v27 = vrot.slane %v81_v41, 7  ;;  %v2383_v54 = vrot.slane %v6131_v16, 7 }
 0x370   :  { %v4268_v7 = vpop.f32.mrb[38].mxu0  ;;  %v6093_v53 = vadd.f32 %v4267_v51, %v6087_v49  ;;  %4772 = vmatpush1.bf16.msra.mxu0 %v4771_v4  ;;  %v79_v4 = vld [vmem:[%s6758_s0 + $0xd0] sm:$0xff]  ;;  %v6138_v51 = vld [vmem:[%s6758_s0 + $0xf8] sm:$0xff] }
 0x371   :  { %v4269_v15 = vpop.f32.mrb[39].mxu0  ;;  %4773 = vmatprep.subr.bf16.mxu0 %v4829_v3  ;;  %3218 = vmatmul.mubr.f32.gmra.mrb[110].mxu1 %v2953_v57  ;;  %v2379_v6 = vrot.slane %v79_v4, 7 }
 0x372   :  { %v4270_v56 = vadd.f32 %v4269_v15, %v4268_v7  ;;  %3222 = vmatprep.mubr.f32.mxu1 %v2956_v24 }
 0x373   :  { %v2456_v31 = vsel %vm2419_vm5, %v2377_v48, %v2379_v6  ;;  %v2454_v37 = vsel %vm2419_vm5, %v2379_v6, %v2381_v27  ;;  %v2384_v48 = vrot.slane %v6138_v51, 7 }
 0x374   :  { %v4271_v61 = vpop.f32.mrb[40].mxu0  ;;  %v6102_v63 = vadd.f32 %v4270_v56, %v6087_v49  ;;  %4775 = vmatpush1.bf16.msra.mxu0 %v4774_v36  ;;  %v2957_v19 = vsub.f32 %v79_v4, %v2456_v31  ;;  %v2959_v7 = vsub.f32 %v81_v41, %v2454_v37  ;;  %v2452_v56 = vsel %vm2419_vm5, %v2381_v27, %v2383_v54 }
 0x375   :  { %v4272_v42 = vpop.f32.mrb[41].mxu0  ;;  %4776 = vmatprep.subr.bf16.mxu0 %v4829_v3  ;;  %3223 = vmatmul.mubr.f32.gmra.mrb[112].mxu1 %v2955_v50  ;;  %v2453_v21 = vsel %vm2419_vm5, %v2382_v39, %v2384_v48 }
 0x376   :  { %v4273_v59 = vadd.f32 %v4272_v42, %v4271_v61  ;;  %3227 = vmatprep.mubr.f32.mxu1 %v2958_v2  ;;  %v2962_v15 = vsub.f32 %v6138_v51, %v2453_v21 }
 0x378   :  { %v4274_v11 = vpop.f32.mrb[42].mxu0  ;;  %v1775_v26 = vadd.f32 %v4273_v59, %v6087_v49 }
 0x379   :  { %v4275_v30 = vpop.f32.mrb[43].mxu0  ;;  %3228 = vmatmul.mubr.f32.gmra.mrb[114].mxu1 %v2957_v19 }
 0x37a   :  { %v4276_v35 = vadd.f32 %v4275_v30, %v4274_v11  ;;  %3232 = vmatprep.mubr.f32.mxu1 %v2960_v40  ;;  %v1956_v40 = vld [vmem:[%s6769_s11] sm:$0x3] }
 0x37b   :  { %v6186_v37 = vrot.slane %v1956_v40, %v5865_v17 }
 0x37c   :  { %v4277_v38 = vpop.f32.mrb[44].mxu0  ;;  %v1780_v43 = vadd.f32 %v4276_v35, %v6087_v49 }
 0x37d   :  { %v4278_v47 = vpop.f32.mrb[45].mxu0  ;;  %3233 = vmatmul.mubr.f32.gmra.mrb[116].mxu1 %v2959_v7  ;;  %v6195_v7 = vld [vmem:[%s6758_s0] sm:$0xff] }
 0x37e   :  { %v4279_v52 = vadd.f32 %v4278_v47, %v4277_v38  ;;  %3237 = vmatprep.mubr.f32.mxu1 %v2962_v15  ;;  %v6199_v21 = vrot.slane %v6195_v7, %v5865_v17  ;;  %v6204_v15 = vld [vmem:[%s6758_s0 + $0x8] sm:$0xff] }
 0x380   :  { %v4280_v55 = vpop.f32.mrb[46].mxu0  ;;  %v1785_v62 = vadd.f32 %v4279_v52, %v6087_v49 }
 0x381   :  { %v4281_v12 = vpop.f32.mrb[47].mxu0 }
 0x382   :  { %v4282_v14 = vadd.f32 %v4281_v12, %v4280_v55 }
 0x384   :  { %v4283_v18 = vpop.f32.mrb[48].mxu0  ;;  %v6112_v20 = vadd.f32 %v4282_v14, %v6087_v49 }
 0x385   :  { %v4284_v25 = vpop.f32.mrb[49].mxu0 }
 0x386   :  { %v4285_v28 = vadd.f32 %v4284_v25, %v4283_v18 }
 0x388   :  { %v4286_v34 = vpop.f32.mrb[50].mxu0  ;;  %v6123_v36 = vadd.f32 %v4285_v28, %v6087_v49 }
 0x389   :  { %v4287_v22 = vpop.f32.mrb[51].mxu0 }
 0x38a   :  { %v4288_v44 = vadd.f32 %v4287_v22, %v4286_v34 }
 0x38c   :  { %v1800_v1 = vadd.f32 %v4288_v44, %v6087_v49  ;;  %v2961_v49 = vsub.f32 %v6131_v16, %v2452_v56  ;;  %v6208_v56 = vrot.slane %v6204_v15, %v5865_v17 }
 0x38e   :  { %3238 = vmatmul.mubr.f32.gmra.mrb[118].mxu1 %v2961_v49  ;;  %v2499_v49 = vadd.s32 128, %v5859_v8 }
 0x396   :  { %v1869_v57 = vpop.f32.mrb[52].mxu0 }
 0x397   :  { %v1870_v24 = vadd.f32 %v1869_v57, %v6093_v53  ;;  %v1871_v58 = vpop.f32.mrb[53].mxu0 }
 0x399   :  { %v1908_v61 = vmax.f32 %v1870_v24, 0.0 }
 0x39a   :  { %v1874_v33 = vpop.f32.mrb[54].mxu0 }
 0x39b   :  { %1916 = vst.msk [vmem:[#allocation3 + $0x40] sm:$0xff] %vm221_vm2, %v1908_v61  ;;  %v1875_v42 = vadd.f32 %v1874_v33, %v6102_v63  ;;  %v1876_v59 = vpop.f32.mrb[55].mxu0 }
 0x39c   :  { %v2631_v59 = vand.u32 63, %v2499_v49 }
 0x39d   :  { %v1909_v50 = vmax.f32 %v1875_v42, 0.0 }
 0x39e   :  { %v1879_v2 = vpop.f32.mrb[56].mxu0  ;;  %vm4012_vm6 = vcmp.ne.s32.totalorder %v2631_v59, 0 }
 0x39f   :  { %1917 = vst.msk [vmem:[#allocation3 + $0x48] sm:$0xff] %vm221_vm2, %v1909_v50  ;;  %v1880_v11 = vadd.f32 %v1879_v2, %v1775_v26  ;;  %v1881_v30 = vpop.f32.mrb[57].mxu0 }
 0x3a1   :  { %v1910_v35 = vmax.f32 %v1880_v11, 0.0 }
 0x3a2   :  { %v1884_v38 = vpop.f32.mrb[58].mxu0  ;;  %v1932_v47 = vld [vmem:[#allocation3 + $0x40] sm:$0xff] }
 0x3a3   :  { %1918 = vst.msk [vmem:[#allocation3 + $0x50] sm:$0xff] %vm221_vm2, %v1910_v35  ;;  %v1885_v53 = vadd.f32 %v1884_v38, %v1780_v43  ;;  %v1886_v52 = vpop.f32.mrb[59].mxu0  ;;  %3983 = vmatmul.mubr.msk.f32.gmra.mrb[84].mxu0 %vm221_vm2, %v1932_v47 }
 0x3a4   :  { %2134 = vmatprep.mubr.f32.mxu0 %v4831_v9 }
 0x3a5   :  { %v1911_v55 = vmax.f32 %v1885_v53, 0.0 }
 0x3a6   :  { %v1889_v63 = vpop.f32.mrb[60].mxu0  ;;  %v1933_v12 = vld [vmem:[#allocation3 + $0x48] sm:$0xff] }
 0x3a7   :  { %1919 = vst.msk [vmem:[#allocation3 + $0x58] sm:$0xff] %vm221_vm2, %v1911_v55  ;;  %v1890_v14 = vadd.f32 %v1889_v63, %v1785_v62  ;;  %v1891_v18 = vpop.f32.mrb[61].mxu0  ;;  %3984 = vmatmul.mubr.msk.f32.gmra.mrb[86].mxu0 %vm221_vm2, %v1933_v12 }
 0x3a8   :  { %2140 = vmatprep.mubr.f32.mxu0 %v4831_v9 }
 0x3a9   :  { %v1912_v26 = vmax.f32 %v1890_v14, 0.0 }
 0x3aa   :  { %v1894_v4 = vpop.f32.mrb[62].mxu0  ;;  %v1934_v25 = vld [vmem:[#allocation3 + $0x50] sm:$0xff] }
 0x3ab   :  { %1920 = vst.msk [vmem:[#allocation3 + $0x60] sm:$0xff] %vm221_vm2, %v1912_v26  ;;  %v1895_v43 = vadd.f32 %v1894_v4, %v6112_v20  ;;  %v1896_v6 = vpop.f32.mrb[63].mxu0  ;;  %3985 = vmatmul.mubr.msk.f32.gmra.mrb[88].mxu0 %vm221_vm2, %v1934_v25 }
 0x3ac   :  { %2146 = vmatprep.mubr.f32.mxu0 %v4831_v9 }
 0x3ad   :  { %v1913_v28 = vmax.f32 %v1895_v43, 0.0 }
 0x3ae   :  { %v1899_v31 = vpop.f32.mrb[64].mxu0  ;;  %v1935_v62 = vld [vmem:[#allocation3 + $0x58] sm:$0xff] }
 0x3af   :  { %1921 = vst.msk [vmem:[#allocation3 + $0x68] sm:$0xff] %vm221_vm2, %v1913_v28  ;;  %v1900_v10 = vadd.f32 %v1899_v31, %v6123_v36  ;;  %v1901_v34 = vpop.f32.mrb[65].mxu0  ;;  %3986 = vmatmul.mubr.msk.f32.gmra.mrb[90].mxu0 %vm221_vm2, %v1935_v62 }
 0x3b0   :  { %2152 = vmatprep.mubr.f32.mxu0 %v4831_v9 }
 0x3b1   :  { %v1914_v19 = vmax.f32 %v1900_v10, 0.0 }
 0x3b2   :  { %v1904_v39 = vpop.f32.mrb[66].mxu0  ;;  %v1936_v20 = vld [vmem:[#allocation3 + $0x60] sm:$0xff] }
 0x3b3   :  { %1922 = vst.msk [vmem:[#allocation3 + $0x70] sm:$0xff] %vm221_vm2, %v1914_v19  ;;  %v1905_v41 = vadd.f32 %v1904_v39, %v1800_v1  ;;  %v1906_v22 = vpop.f32.mrb[67].mxu0  ;;  %3987 = vmatmul.mubr.msk.f32.gmra.mrb[92].mxu0 %vm221_vm2, %v1936_v20  ;;  %v6190_v1 = vrot.slane %v1956_v40, %v1696_v13 }
 0x3b4   :  { %2158 = vmatprep.mubr.f32.mxu0 %v4831_v9 }
 0x3b5   :  { %v1915_v27 = vmax.f32 %v1905_v41, 0.0 }
 0x3b6   :  { %v1937_v44 = vld [vmem:[#allocation3 + $0x68] sm:$0xff] }
 0x3b7   :  { %1923 = vst.msk [vmem:[#allocation3 + $0x78] sm:$0xff] %vm221_vm2, %v1915_v27  ;;  %3988 = vmatmul.mubr.msk.f32.gmra.mrb[94].mxu0 %vm221_vm2, %v1937_v44 }
 0x3b8   :  { %2164 = vmatprep.mubr.f32.mxu0 %v4831_v9 }
 0x3ba   :  { %v1938_v36 = vld [vmem:[#allocation3 + $0x70] sm:$0xff] }
 0x3bb   :  { %3989 = vmatmul.mubr.msk.f32.gmra.mrb[96].mxu0 %vm221_vm2, %v1938_v36 }
 0x3bc   :  { %2170 = vmatprep.mubr.f32.mxu0 %v4831_v9 }
 0x3be   :  { %v1939_v46 = vld [vmem:[#allocation3 + $0x78] sm:$0xff] }
 0x3bf   :  { %3990 = vmatmul.mubr.msk.f32.gmra.mrb[98].mxu0 %vm221_vm2, %v1939_v46 }
 0x40a   :  { %v2082_v13 = vpop.f32.mrb[68].mxu0 }
 0x40b   :  { %v2083_v57 = vadd.f32 %v2082_v13, %v6186_v37  ;;  %v2084_v24 = vpop.f32.mrb[69].mxu0 }
 0x40c   :  { %v2085_v58 = vadd.f32 %v2084_v24, %v6190_v1 }
 0x40d   :  { %v2217_v61 = vadd.f32 %v6199_v21, %v2083_v57 }
 0x40e   :  { %v2218_v33 = vadd.f32 %v6208_v56, %v2085_v58  ;;  %v2088_v42 = vpop.f32.mrb[70].mxu0 }
 0x40f   :  { %v2385_v50 = vrot.slane %v2217_v61, 7  ;;  %v2089_v2 = vadd.f32 %v2088_v42, %v6186_v37  ;;  %v2090_v11 = vpop.f32.mrb[71].mxu0 }
 0x410   :  { %v2386_v30 = vrot.slane %v2218_v33, 7  ;;  %v2091_v35 = vadd.f32 %v2090_v11, %v6190_v1 }
 0x411   :  { %v2450_v38 = vsel %vm2419_vm5, %v2383_v54, %v2385_v50  ;;  %v2219_v47 = vadd.f32 %v6199_v21, %v2089_v2 }
 0x412   :  { %v2451_v53 = vsel %vm2419_vm5, %v2384_v48, %v2386_v30  ;;  %v2220_v52 = vadd.f32 %v6208_v56, %v2091_v35  ;;  %v2094_v55 = vpop.f32.mrb[72].mxu0  ;;  %v2963_v16 = vsub.f32 %v2217_v61, %v2450_v38 }
 0x413   :  { %v2964_v63 = vsub.f32 %v2218_v33, %v2451_v53  ;;  %v2387_v12 = vrot.slane %v2219_v47, 7  ;;  %v2095_v14 = vadd.f32 %v2094_v55, %v6186_v37  ;;  %v2096_v18 = vpop.f32.mrb[73].mxu0 }
 0x414   :  { %v2388_v26 = vrot.slane %v2220_v52, 7  ;;  %v2097_v54 = vadd.f32 %v2096_v18, %v6190_v1 }
 0x415   :  { %v2221_v4 = vadd.f32 %v6199_v21, %v2095_v14  ;;  %4001 = vmatprep.mubr.msk.f32.mxu1 %vm4012_vm6, %v2964_v63  ;;  %v2448_v51 = vsel %vm2419_vm5, %v2385_v50, %v2387_v12 }
 0x416   :  { %v2222_v48 = vadd.f32 %v6208_v56, %v2097_v54  ;;  %v2100_v25 = vpop.f32.mrb[74].mxu0  ;;  %4003 = vmatmul.mubr.msk.f32.gmra.mrb[120].mxu1 %vm4012_vm6, %v2963_v16  ;;  %v2449_v43 = vsel %vm2419_vm5, %v2386_v30, %v2388_v26  ;;  %v2965_v6 = vsub.f32 %v2219_v47, %v2448_v51 }
 0x417   :  { %v2389_v28 = vrot.slane %v2221_v4, 7  ;;  %v2101_v31 = vadd.f32 %v2100_v25, %v6186_v37  ;;  %v2102_v62 = vpop.f32.mrb[75].mxu0  ;;  %v2966_v10 = vsub.f32 %v2220_v52, %v2449_v43 }
 0x418   :  { %v2390_v34 = vrot.slane %v2222_v48, 7  ;;  %v2103_v19 = vadd.f32 %v2102_v62, %v6190_v1 }
 0x419   :  { %v2223_v39 = vadd.f32 %v6199_v21, %v2101_v31  ;;  %3247 = vmatprep.mubr.f32.mxu1 %v2966_v10  ;;  %v2446_v20 = vsel %vm2419_vm5, %v2387_v12, %v2389_v28 }
 0x41a   :  { %v2224_v41 = vadd.f32 %v6208_v56, %v2103_v19  ;;  %v2106_v22 = vpop.f32.mrb[76].mxu0  ;;  %3248 = vmatmul.mubr.f32.gmra.mrb[122].mxu1 %v2965_v6  ;;  %v2447_v27 = vsel %vm2419_vm5, %v2388_v26, %v2390_v34  ;;  %v2967_v44 = vsub.f32 %v2221_v4, %v2446_v20 }
 0x41b   :  { %v2391_v36 = vrot.slane %v2223_v39, 7  ;;  %v2107_v46 = vadd.f32 %v2106_v22, %v6186_v37  ;;  %v2108_v40 = vpop.f32.mrb[77].mxu0  ;;  %v2968_v13 = vsub.f32 %v2222_v48, %v2447_v27 }
 0x41c   :  { %v2392_v49 = vrot.slane %v2224_v41, 7  ;;  %v2109_v57 = vadd.f32 %v2108_v40, %v6190_v1 }
 0x41d   :  { %v2225_v24 = vadd.f32 %v6199_v21, %v2107_v46  ;;  %3252 = vmatprep.mubr.f32.mxu1 %v2968_v13  ;;  %v2444_v58 = vsel %vm2419_vm5, %v2389_v28, %v2391_v36 }
 0x41e   :  { %v2226_v61 = vadd.f32 %v6208_v56, %v2109_v57  ;;  %v2112_v33 = vpop.f32.mrb[78].mxu0  ;;  %3253 = vmatmul.mubr.f32.gmra.mrb[124].mxu1 %v2967_v44  ;;  %v2445_v42 = vsel %vm2419_vm5, %v2390_v34, %v2392_v49  ;;  %v2969_v59 = vsub.f32 %v2223_v39, %v2444_v58 }
 0x41f   :  { %v2393_v50 = vrot.slane %v2225_v24, 7  ;;  %v2113_v2 = vadd.f32 %v2112_v33, %v6186_v37  ;;  %v2114_v11 = vpop.f32.mrb[79].mxu0  ;;  %v2970_v30 = vsub.f32 %v2224_v41, %v2445_v42  ;;  %v6294_v33 = vld [vmem:[%s6770_s13] ss:$0 sm:$0xff] }
 0x420   :  { %v2394_v35 = vrot.slane %v2226_v61, 7  ;;  %v2115_v38 = vadd.f32 %v2114_v11, %v6190_v1  ;;  %v6300_v11 = vld [vmem:[%s6771_s15] ss:$0 sm:$0xff] }
 0x421   :  { %v2227_v47 = vadd.f32 %v6199_v21, %v2113_v2  ;;  %3257 = vmatprep.mubr.f32.mxu1 %v2970_v30  ;;  %v2442_v53 = vsel %vm2419_vm5, %v2391_v36, %v2393_v50 }
 0x422   :  { %v2228_v52 = vadd.f32 %v6208_v56, %v2115_v38  ;;  %v2118_v55 = vpop.f32.mrb[80].mxu0  ;;  %3258 = vmatmul.mubr.f32.gmra.mrb[126].mxu1 %v2969_v59  ;;  %v2443_v63 = vsel %vm2419_vm5, %v2392_v49, %v2394_v35  ;;  %v2971_v12 = vsub.f32 %v2225_v24, %v2442_v53 }
 0x423   :  { %v2395_v14 = vrot.slane %v2227_v47, 7  ;;  %v2119_v18 = vadd.f32 %v2118_v55, %v6186_v37  ;;  %v2120_v16 = vpop.f32.mrb[81].mxu0  ;;  %v2972_v26 = vsub.f32 %v2226_v61, %v2443_v63 }
 0x424   :  { %v2396_v54 = vrot.slane %v2228_v52, 7  ;;  %v2121_v4 = vadd.f32 %v2120_v16, %v6190_v1 }
 0x425   :  { %v2229_v51 = vadd.f32 %v6199_v21, %v2119_v18  ;;  %3262 = vmatprep.mubr.f32.mxu1 %v2972_v26  ;;  %v2440_v48 = vsel %vm2419_vm5, %v2393_v50, %v2395_v14 }
 0x426   :  { %v2230_v25 = vadd.f32 %v6208_v56, %v2121_v4  ;;  %v2124_v43 = vpop.f32.mrb[82].mxu0  ;;  %3263 = vmatmul.mubr.f32.gmra.mrb[128].mxu1 %v2971_v12  ;;  %v2441_v6 = vsel %vm2419_vm5, %v2394_v35, %v2396_v54  ;;  %v2973_v28 = vsub.f32 %v2227_v47, %v2440_v48 }
 0x427   :  { %v2397_v31 = vrot.slane %v2229_v51, 7  ;;  %v2125_v62 = vadd.f32 %v2124_v43, %v6186_v37  ;;  %v2126_v10 = vpop.f32.mrb[83].mxu0  ;;  %v2974_v34 = vsub.f32 %v2228_v52, %v2441_v6 }
 0x428   :  { %v2398_v19 = vrot.slane %v2230_v25, 7  ;;  %v2127_v39 = vadd.f32 %v2126_v10, %v6190_v1 }
 0x429   :  { %v6270_v20 = vadd.f32 %v6199_v21, %v2125_v62  ;;  %3267 = vmatprep.mubr.f32.mxu1 %v2974_v34  ;;  %v2438_v41 = vsel %vm2419_vm5, %v2395_v14, %v2397_v31 }
 0x42a   :  { %v6275_v22 = vadd.f32 %v6208_v56, %v2127_v39  ;;  %3268 = vmatmul.mubr.f32.gmra.mrb[130].mxu1 %v2973_v28  ;;  %v2439_v27 = vsel %vm2419_vm5, %v2396_v54, %v2398_v19  ;;  %v2975_v44 = vsub.f32 %v2229_v51, %v2438_v41 }
 0x42b   :  { %v2399_v36 = vrot.slane %v6270_v20, 7  ;;  %v2976_v46 = vsub.f32 %v2230_v25, %v2439_v27 }
 0x42c   :  { %v2400_v40 = vrot.slane %v6275_v22, 7 }
 0x42d   :  { %3272 = vmatprep.mubr.f32.mxu1 %v2976_v46  ;;  %v2436_v21 = vsel %vm2419_vm5, %v2397_v31, %v2399_v36 }
 0x42e   :  { %3273 = vmatmul.mubr.f32.gmra.mrb[132].mxu1 %v2975_v44  ;;  %v2437_v56 = vsel %vm2419_vm5, %v2398_v19, %v2400_v40  ;;  %v2977_v13 = vsub.f32 %v6270_v20, %v2436_v21 }
 0x42f   :  { %v2978_v49 = vsub.f32 %v6275_v22, %v2437_v56 }
 0x431   :  { %3277 = vmatprep.mubr.f32.mxu1 %v2978_v49  ;;  %v6322_v49 = vld [vmem:[%s6758_s0 + $0x80] sm:$0xff] }
 0x432   :  { %3278 = vmatmul.mubr.f32.gmra.mrb[134].mxu1 %v2977_v13 }
 0x440   :  { %v3214_v57 = vpop.f32.mrb[108].mxu1 }
 0x441   :  { %v3216_v24 = vpop.f32.mrb[109].mxu1  ;;  %v3215_v12 = vadd.f32 %v6294_v33, %v3214_v57  ;;  %v6326_v57 = vrot.slane %v6322_v49, %v5865_v17 }
 0x442   :  { %v6331_v24 = vld [vmem:[%s6758_s0 + $0x88] sm:$0xff] }
 0x443   :  { %v3365_v48 = vmul.f32 0.2, %v3215_v12  ;;  %vm3333_vm11 = vcmp.gt.f32.partialorder %v3215_v12, 0.0 }
 0x444   :  { %v3219_v58 = vpop.f32.mrb[110].mxu1 }
 0x445   :  { %v3221_v61 = vpop.f32.mrb[111].mxu1  ;;  %v3220_v25 = vadd.f32 %v6294_v33, %v3219_v58  ;;  %v3397_v39 = vsel %vm3333_vm11, %v3215_v12, %v3365_v48  ;;  %v6335_v58 = vrot.slane %v6331_v24, %v5865_v17 }
 0x446   :  { %v3436_v27 = vmul.f32 %v6300_v11, %v3397_v39 }
 0x447   :  { %v3366_v34 = vmul.f32 0.2, %v3220_v25  ;;  %vm3334_vm12 = vcmp.gt.f32.partialorder %v3220_v25, 0.0 }
 0x448   :  { %v3224_v42 = vpop.f32.mrb[112].mxu1  ;;  %v3488_v46 = vsel %vm221_vm2, %v3436_v27, 0.0 }
 0x449   :  { %v3225_v59 = vadd.f32 %v6294_v33, %v3224_v42  ;;  %v3226_v50 = vpop.f32.mrb[113].mxu1  ;;  %3489 = vadd.xlane.f32.xlu1 %v3488_v46  ;;  %v3398_v21 = vsel %vm3334_vm12, %v3220_v25, %v3366_v34  ;;  %v2507_v42 = vadd.s32 192, %v5859_v8 }
 0x44a   :  { %v3437_v56 = vmul.f32 %v6300_v11, %v3398_v21 }
 0x44b   :  { %v3367_v2 = vmul.f32 0.2, %v3225_v59  ;;  %vm3335_vm7 = vcmp.gt.f32.partialorder %v3225_v59, 0.0 }
 0x44c   :  { %v3229_v47 = vpop.f32.mrb[114].mxu1  ;;  %v3491_v13 = vsel %vm221_vm2, %v3437_v56, 0.0 }
 0x44d   :  { %v3399_v30 = vsel %vm3335_vm7, %v3225_v59, %v3367_v2  ;;  %v3230_v53 = vadd.f32 %v6294_v33, %v3229_v47  ;;  %v3231_v52 = vpop.f32.mrb[115].mxu1  ;;  %3492 = vadd.xlane.f32.xlu1 %v3491_v13  ;;  %v2687_v47 = vand.u32 63, %v2507_v42 }
 0x44e   :  { %v3438_v35 = vmul.f32 %v6300_v11, %v3399_v30 }
 0x44f   :  { %vm3336_vm8 = vcmp.gt.f32.partialorder %v3230_v53, 0.0  ;;  %v3368_v55 = vmul.f32 0.2, %v3230_v53  ;;  %vm4013_vm13 = vcmp.ne.s32.totalorder %v2687_v47, 0 }
 0x450   :  { %v3494_v38 = vsel %vm221_vm2, %v3438_v35, 0.0  ;;  %v3234_v63 = vpop.f32.mrb[116].mxu1 }
 0x451   :  { %3495 = vadd.xlane.f32.xlu0 %v3494_v38  ;;  %v3235_v14 = vadd.f32 %v6294_v33, %v3234_v63  ;;  %v3236_v18 = vpop.f32.mrb[117].mxu1  ;;  %v3400_v16 = vsel %vm3336_vm8, %v3230_v53, %v3368_v55 }
 0x452   :  { %v3439_v26 = vmul.f32 %v6300_v11, %v3400_v16 }
 0x453   :  { %vm3337_vm9 = vcmp.gt.f32.partialorder %v3235_v14, 0.0  ;;  %v3369_v54 = vmul.f32 0.2, %v3235_v14 }
 0x454   :  { %v3497_v51 = vsel %vm221_vm2, %v3439_v26, 0.0 }
 0x455   :  { %3498 = vadd.xlane.f32.xlu0 %v3497_v51  ;;  %v3401_v28 = vsel %vm3337_vm9, %v3235_v14, %v3369_v54 }
 0x456   :  { %v3440_v31 = vmul.f32 %v6300_v11, %v3401_v28 }
 0x458   :  { %v3500_v10 = vsel %vm221_vm2, %v3440_v31, 0.0 }
 0x459   :  { %3501 = vadd.xlane.f32.xlu0 %v3500_v10 }
 0x461   :  { %v3239_v4 = vpop.f32.mrb[118].mxu1 }
 0x462   :  { %v3240_v43 = vadd.f32 %v6294_v33, %v3239_v4  ;;  %v3241_v6 = vpop.f32.mrb[119].mxu1 }
 0x464   :  { %vm3338_vm10 = vcmp.gt.f32.partialorder %v3240_v43, 0.0  ;;  %v3370_v62 = vmul.f32 0.2, %v3240_v43 }
 0x466   :  { %v3402_v19 = vsel %vm3338_vm10, %v3240_v43, %v3370_v62 }
 0x467   :  { %v3441_v41 = vmul.f32 %v6300_v11, %v3402_v19 }
 0x469   :  { %v3503_v44 = vsel %vm221_vm2, %v3441_v41, 0.0 }
 0x46a   :  { %3504 = vadd.xlane.f32.xlu0 %v3503_v44 }
 0x476   :  { %v2130_v61 = vpop.f32.mrb[84].mxu0 }
 0x477   :  { %v2131_v59 = vadd.f32 %v2130_v61, %v6186_v37  ;;  %v2132_v50 = vpop.f32.mrb[85].mxu0 }
 0x478   :  { %v2133_v2 = vadd.f32 %v2132_v50, %v6190_v1 }
 0x479   :  { %v2257_v30 = vadd.f32 %v6326_v57, %v2131_v59 }
 0x47a   :  { %v2258_v35 = vadd.f32 %v6335_v58, %v2133_v2  ;;  %v2136_v38 = vpop.f32.mrb[86].mxu0 }
 0x47b   :  { %v2401_v53 = vrot.slane %v2257_v30, 7  ;;  %v2137_v52 = vadd.f32 %v2136_v38, %v6186_v37  ;;  %v2138_v55 = vpop.f32.mrb[87].mxu0 }
 0x47c   :  { %v2402_v17 = vrot.slane %v2258_v35, 7  ;;  %v2139_v63 = vadd.f32 %v2138_v55, %v6190_v1 }
 0x47d   :  { %v2434_v12 = vsel %vm2419_vm5, %v2399_v36, %v2401_v53  ;;  %v2259_v14 = vadd.f32 %v6326_v57, %v2137_v52 }
 0x47e   :  { %v2435_v18 = vsel %vm2419_vm5, %v2400_v40, %v2402_v17  ;;  %v2260_v16 = vadd.f32 %v6335_v58, %v2139_v63  ;;  %v2142_v26 = vpop.f32.mrb[88].mxu0  ;;  %v2979_v20 = vsub.f32 %v2257_v30, %v2434_v12 }
 0x47f   :  { %v2980_v54 = vsub.f32 %v2258_v35, %v2435_v18  ;;  %v2403_v4 = vrot.slane %v2259_v14, 7  ;;  %v2143_v51 = vadd.f32 %v2142_v26, %v6186_v37  ;;  %v2144_v48 = vpop.f32.mrb[89].mxu0 }
 0x480   :  { %v2404_v25 = vrot.slane %v2260_v16, 7  ;;  %v2145_v36 = vadd.f32 %v2144_v48, %v6190_v1 }
 0x481   :  { %v2261_v43 = vadd.f32 %v6326_v57, %v2143_v51  ;;  %4005 = vmatprep.mubr.msk.f32.mxu1 %vm4013_vm13, %v2980_v54  ;;  %v2432_v22 = vsel %vm2419_vm5, %v2401_v53, %v2403_v4 }
 0x482   :  { %v2262_v40 = vadd.f32 %v6335_v58, %v2145_v36  ;;  %v2148_v6 = vpop.f32.mrb[90].mxu0  ;;  %4007 = vmatmul.mubr.msk.f32.gmra.mrb[136].mxu1 %vm4013_vm13, %v2979_v20  ;;  %v2433_v28 = vsel %vm2419_vm5, %v2402_v17, %v2404_v25  ;;  %v2981_v31 = vsub.f32 %v2259_v14, %v2432_v22 }
 0x483   :  { %v2405_v62 = vrot.slane %v2261_v43, 7  ;;  %v2149_v10 = vadd.f32 %v2148_v6, %v6186_v37  ;;  %v2150_v34 = vpop.f32.mrb[91].mxu0  ;;  %v2982_v19 = vsub.f32 %v2260_v16, %v2433_v28  ;;  %v56_v28 = vld [vmem:[%s6758_s0 + $0x18] sm:$0xff] }
 0x484   :  { %v2406_v39 = vrot.slane %v2262_v40, 7  ;;  %v2151_v41 = vadd.f32 %v2150_v34, %v6190_v1 }
 0x485   :  { %v2263_v27 = vadd.f32 %v6326_v57, %v2149_v10  ;;  %3287 = vmatprep.mubr.f32.mxu1 %v2982_v19  ;;  %v2430_v44 = vsel %vm2419_vm5, %v2403_v4, %v2405_v62 }
 0x486   :  { %v2264_v46 = vadd.f32 %v6335_v58, %v2151_v41  ;;  %v2154_v21 = vpop.f32.mrb[92].mxu0  ;;  %3288 = vmatmul.mubr.f32.gmra.mrb[138].mxu1 %v2981_v31  ;;  %v2431_v56 = vsel %vm2419_vm5, %v2404_v25, %v2406_v39  ;;  %v2983_v13 = vsub.f32 %v2261_v43, %v2430_v44 }
 0x487   :  { %v2407_v61 = vrot.slane %v2263_v27, 7  ;;  %v2155_v42 = vadd.f32 %v2154_v21, %v6186_v37  ;;  %v2156_v59 = vpop.f32.mrb[93].mxu0  ;;  %v2984_v50 = vsub.f32 %v2262_v40, %v2431_v56  ;;  %v2356_v21 = vrot.slane %v56_v28, 7 }
 0x488   :  { %v2408_v2 = vrot.slane %v2264_v46, 7  ;;  %v2157_v30 = vadd.f32 %v2156_v59, %v6190_v1  ;;  %v2354_v56 = vrot.slane %v6204_v15, 7  ;;  %v2353_v59 = vrot.slane %v6195_v7, 7 }
 0x489   :  { %v2265_v35 = vadd.f32 %v6326_v57, %v2155_v42  ;;  %3292 = vmatprep.mubr.f32.mxu1 %v2984_v50  ;;  %v2428_v38 = vsel %vm2419_vm5, %v2405_v62, %v2407_v61  ;;  %v55_v42 = vld [vmem:[%s6758_s0 + $0x10] sm:$0xff] }
 0x48a   :  { %v2266_v47 = vadd.f32 %v6335_v58, %v2157_v30  ;;  %v2160_v53 = vpop.f32.mrb[94].mxu0  ;;  %3293 = vmatmul.mubr.f32.gmra.mrb[140].mxu1 %v2983_v13  ;;  %v2429_v52 = vsel %vm2419_vm5, %v2406_v39, %v2408_v2  ;;  %v2985_v55 = vsub.f32 %v2263_v27, %v2428_v38  ;;  %v58_v30 = vld [vmem:[%s6758_s0 + $0x28] sm:$0xff] }
 0x48b   :  { %v2409_v17 = vrot.slane %v2265_v35, 7  ;;  %v2161_v63 = vadd.f32 %v2160_v53, %v6186_v37  ;;  %v2162_v12 = vpop.f32.mrb[95].mxu0  ;;  %v2986_v14 = vsub.f32 %v2264_v46, %v2429_v52  ;;  %v2355_v52 = vrot.slane %v55_v42, 7 }
 0x48c   :  { %v2410_v18 = vrot.slane %v2266_v47, 7  ;;  %v2163_v16 = vadd.f32 %v2162_v12, %v6190_v1 }
 0x48d   :  { %v2267_v26 = vadd.f32 %v6326_v57, %v2161_v63  ;;  %3297 = vmatprep.mubr.f32.mxu1 %v2986_v14  ;;  %v2426_v54 = vsel %vm2419_vm5, %v2407_v61, %v2409_v17  ;;  %v57_v63 = vld [vmem:[%s6758_s0 + $0x20] sm:$0xff] }
 0x48e   :  { %v2268_v4 = vadd.f32 %v6335_v58, %v2163_v16  ;;  %v2166_v51 = vpop.f32.mrb[96].mxu0  ;;  %3298 = vmatmul.mubr.f32.gmra.mrb[142].mxu1 %v2985_v55  ;;  %v2427_v48 = vsel %vm2419_vm5, %v2408_v2, %v2410_v18  ;;  %v2987_v20 = vsub.f32 %v2265_v35, %v2426_v54  ;;  %v2519_v2 = vand.u32 63, %v5859_v8 }
 0x48f   :  { %v2411_v25 = vrot.slane %v2267_v26, 7  ;;  %v2167_v36 = vadd.f32 %v2166_v51, %v6186_v37  ;;  %v2168_v43 = vpop.f32.mrb[97].mxu0  ;;  %v2988_v22 = vsub.f32 %v2266_v47, %v2427_v48 }
 0x490   :  { %v2412_v40 = vrot.slane %v2268_v4, 7  ;;  %v2169_v6 = vadd.f32 %v2168_v43, %v6190_v1  ;;  %vm6421_vm14 = vcmp.ne.s32.totalorder %v2519_v2, 0 }
 0x491   :  { %v2269_v31 = vadd.f32 %v6326_v57, %v2167_v36  ;;  %3302 = vmatprep.mubr.f32.mxu1 %v2988_v22  ;;  %v2424_v62 = vsel %vm2419_vm5, %v2409_v17, %v2411_v25  ;;  %v2358_v17 = vrot.slane %v58_v30, 7 }
 0x492   :  { %v2270_v10 = vadd.f32 %v6335_v58, %v2169_v6  ;;  %v2172_v34 = vpop.f32.mrb[98].mxu0  ;;  %3303 = vmatmul.mubr.f32.gmra.mrb[144].mxu1 %v2987_v20  ;;  %v2425_v19 = vsel %vm2419_vm5, %v2410_v18, %v2412_v40  ;;  %v2989_v39 = vsub.f32 %v2267_v26, %v2424_v62  ;;  %v60_v18 = vld [vmem:[%s6758_s0 + $0x38] sm:$0xff]  ;;  %v2480_v20 = vsel %vm2419_vm5, %v2353_v59, %v2355_v52 }
 0x493   :  { %v2413_v41 = vrot.slane %v2269_v31, 7  ;;  %v2173_v27 = vadd.f32 %v2172_v34, %v6186_v37  ;;  %v2174_v44 = vpop.f32.mrb[99].mxu0  ;;  %v2990_v46 = vsub.f32 %v2268_v4, %v2425_v19  ;;  %v2479_v43 = vsel %vm2419_vm5, %v2356_v21, %v2358_v17  ;;  %v61_v34 = vld [vmem:[%s6758_s0 + $0x40] sm:$0xff]  ;;  %v64_v19 = vld [vmem:[%s6758_s0 + $0x58] sm:$0xff] }
 0x494   :  { %v2414_v13 = vrot.slane %v2270_v10, 7  ;;  %v2175_v61 = vadd.f32 %v2174_v44, %v6190_v1  ;;  %v2360_v22 = vrot.slane %v60_v18, 7  ;;  %v2936_v6 = vsub.f32 %v58_v30, %v2479_v43  ;;  %v65_v30 = vld [vmem:[%s6758_s0 + $0x60] sm:$0xff] }
 0x495   :  { %v2271_v50 = vadd.f32 %v6326_v57, %v2173_v27  ;;  %3307 = vmatprep.mubr.f32.mxu1 %v2990_v46  ;;  %v2422_v37 = vsel %vm2419_vm5, %v2411_v25, %v2413_v41  ;;  %v2481_v57 = vsel %vm2419_vm5, %v2354_v56, %v2356_v21  ;;  %v2357_v25 = vrot.slane %v57_v63, 7 }
 0x496   :  { %v2272_v1 = vadd.f32 %v6335_v58, %v2175_v61  ;;  %3308 = vmatmul.mubr.f32.gmra.mrb[146].mxu1 %v2989_v39  ;;  %v2423_v35 = vsel %vm2419_vm5, %v2412_v40, %v2414_v13  ;;  %v2991_v38 = vsub.f32 %v2269_v31, %v2422_v37  ;;  %v2934_v4 = vsub.f32 %v56_v28, %v2481_v57  ;;  %v59_v40 = vld [vmem:[%s6758_s0 + $0x30] sm:$0xff] }
 0x497   :  { %v2415_v47 = vrot.slane %v2271_v50, 7  ;;  %v2992_v53 = vsub.f32 %v2270_v10, %v2423_v35  ;;  %v2478_v28 = vsel %vm2419_vm5, %v2355_v52, %v2357_v25  ;;  %v2359_v31 = vrot.slane %v59_v40, 7 }
 0x498   :  { %v2416_v55 = vrot.slane %v2272_v1, 7  ;;  %v2477_v62 = vsel %vm2419_vm5, %v2358_v17, %v2360_v22  ;;  %v2935_v39 = vsub.f32 %v57_v63, %v2478_v28  ;;  %v2361_v44 = vrot.slane %v61_v34, 7 }
 0x499   :  { %v2482_v58 = vsel %vm2419_vm5, %v2415_v47, %v2353_v59  ;;  %3312 = vmatprep.mubr.f32.mxu1 %v2992_v53  ;;  %v2420_v14 = vsel %vm2419_vm5, %v2413_v41, %v2415_v47  ;;  %v2938_v41 = vsub.f32 %v60_v18, %v2477_v62  ;;  %v2476_v27 = vsel %vm2419_vm5, %v2357_v25, %v2359_v31 }
 0x49a   :  { %3313 = vmatmul.mubr.f32.gmra.mrb[148].mxu1 %v2991_v38  ;;  %v2483_v16 = vsel %vm2419_vm5, %v2416_v55, %v2354_v56  ;;  %v2421_v26 = vsel %vm2419_vm5, %v2414_v13, %v2416_v55  ;;  %v2993_v54 = vsub.f32 %v2271_v50, %v2420_v14  ;;  %v2931_v36 = vsub.f32 %v6195_v7, %v2482_v58  ;;  %v63_v56 = vld [vmem:[%s6758_s0 + $0x50] sm:$0xff]  ;;  %v66_v13 = vld [vmem:[%s6758_s0 + $0x68] sm:$0xff] }
 0x49b   :  { %v2932_v51 = vsub.f32 %v6204_v15, %v2483_v16  ;;  %v2994_v48 = vsub.f32 %v2272_v1, %v2421_v26  ;;  %v62_v15 = vld [vmem:[%s6758_s0 + $0x48] sm:$0xff]  ;;  %v2933_v7 = vsub.f32 %v55_v42, %v2480_v20  ;;  %v2364_v21 = vrot.slane %v64_v19, 7  ;;  %v68_v1 = vld [vmem:[%s6758_s0 + $0x78] sm:$0xff]  ;;  %v67_v55 = vld [vmem:[%s6758_s0 + $0x70] sm:$0xff] }
 0x49c   :  { %v2362_v10 = vrot.slane %v62_v15, 7  ;;  %v2937_v61 = vsub.f32 %v59_v40, %v2476_v27  ;;  %v2474_v59 = vsel %vm2419_vm5, %v2359_v31, %v2361_v44  ;;  %v2363_v50 = vrot.slane %v63_v56, 7 }
 0x49d   :  { %3993 = vmatprep.mubr.msk.f32.mxu0 %vm6421_vm14, %v2932_v51  ;;  %3317 = vmatprep.mubr.f32.mxu1 %v2994_v48  ;;  %v2366_v2 = vrot.slane %v66_v13, 7  ;;  %v2939_v35 = vsub.f32 %v61_v34, %v2474_v59  ;;  %v2365_v53 = vrot.slane %v65_v30, 7  ;;  %v2368_v52 = vrot.slane %v68_v1, 7 }
 0x49e   :  { %3995 = vmatmul.mubr.msk.f32.vlgmr.msra.gmra.mrb[100].mxu0 %vm6421_vm14, %v2931_v36  ;;  %3318 = vmatmul.mubr.f32.gmra.mrb[150].mxu1 %v2993_v54  ;;  %v2475_v46 = vsel %vm2419_vm5, %v2360_v22, %v2362_v10  ;;  %v2473_v37 = vsel %vm2419_vm5, %v2362_v10, %v2364_v21  ;;  %v2472_v47 = vsel %vm2419_vm5, %v2361_v44, %v2363_v50  ;;  %v2367_v12 = vrot.slane %v67_v55, 7  ;;  %v4827_v22 = vld [vmem:[%s6758_s0 + $0x98] sm:$0xff] }
 0x49f   :  { %3167 = vmatprep.mubr.f32.mxu0 %v2934_v4  ;;  %v2940_v42 = vsub.f32 %v62_v15, %v2475_v46  ;;  %v2942_v38 = vsub.f32 %v64_v19, %v2473_v37  ;;  %v2471_v57 = vsel %vm2419_vm5, %v2364_v21, %v2366_v2  ;;  %v2941_v17 = vsub.f32 %v63_v56, %v2472_v47 }
 0x4a0   :  { %v2944_v63 = vsub.f32 %v66_v13, %v2471_v57  ;;  %v2470_v58 = vsel %vm2419_vm5, %v2363_v50, %v2365_v53  ;;  %v2469_v14 = vsel %vm2419_vm5, %v2366_v2, %v2368_v52  ;;  %v2491_v18 = vadd.s32 64, %v5859_v8 }
 0x4a1   :  { %v2943_v16 = vsub.f32 %v65_v30, %v2470_v58  ;;  %v2946_v26 = vsub.f32 %v68_v1, %v2469_v14  ;;  %v2468_v54 = vsel %vm2419_vm5, %v2365_v53, %v2367_v12  ;;  %v2467_v4 = vsel %vm2419_vm5, %v2368_v52, %v4978_v29 }
 0x4a2   :  { %3168 = vmatmul.mubr.f32.gmra.mrb[102].mxu0 %v2933_v7  ;;  %v2575_v51 = vand.u32 63, %v2491_v18  ;;  %v2945_v48 = vsub.f32 %v67_v55, %v2468_v54  ;;  %v2948_v20 = vsub.f32 %v6331_v24, %v2467_v4  ;;  %v2466_v25 = vsel %vm2419_vm5, %v2367_v12, %v5041_v60 }
 0x4a3   :  { %3172 = vmatprep.mubr.f32.mxu0 %v2936_v6  ;;  %v2465_v36 = vsel %vm2419_vm5, %v4978_v29, %v2372_v45  ;;  %v2947_v43 = vsub.f32 %v6322_v49, %v2466_v25  ;;  %v2464_v40 = vsel %vm2419_vm5, %v5041_v60, %v2371_v23  ;;  %v4828_v29 = vld [vmem:[%s6758_s0 + $0x90] sm:$0xff] }
 0x4a4   :  { %vm4011_vm15 = vcmp.ne.s32.totalorder %v2575_v51, 0  ;;  %v2950_v24 = vsub.f32 %v4827_v22, %v2465_v36  ;;  %v2949_v32 = vsub.f32 %v4828_v29, %v2464_v40 }
 0x4a6   :  { %3173 = vmatmul.mubr.f32.gmra.mrb[104].mxu0 %v2935_v39 }
 0x4a7   :  { %3177 = vmatprep.mubr.f32.mxu0 %v2938_v41 }
 0x4aa   :  { %3178 = vmatmul.mubr.f32.gmra.mrb[106].mxu0 %v2937_v61 }
 0x4ab   :  { %3182 = vmatprep.mubr.f32.mxu0 %v2940_v42 }
 0x4ae   :  { %3183 = vmatmul.mubr.f32.gmra.mrb[108].mxu0 %v2939_v35 }
 0x4af   :  { %3187 = vmatprep.mubr.f32.mxu0 %v2942_v38 }
 0x4b2   :  { %3188 = vmatmul.mubr.f32.gmra.mrb[110].mxu0 %v2941_v17 }
 0x4b3   :  { %3192 = vmatprep.mubr.f32.mxu0 %v2944_v63 }
 0x4b6   :  { %3193 = vmatmul.mubr.f32.gmra.mrb[112].mxu0 %v2943_v16 }
 0x4b7   :  { %3197 = vmatprep.mubr.f32.mxu0 %v2946_v26 }
 0x4ba   :  { %3198 = vmatmul.mubr.f32.gmra.mrb[114].mxu0 %v2945_v48 }
 0x4bb   :  { %3997 = vmatprep.mubr.msk.f32.mxu0 %vm4011_vm15, %v2948_v20 }
 0x4be   :  { %3999 = vmatmul.mubr.msk.f32.gmra.mrb[116].mxu0 %vm4011_vm15, %v2947_v43 }
 0x4bf   :  { %3207 = vmatprep.mubr.f32.mxu0 %v2950_v24 }
 0x4c2   :  { %3208 = vmatmul.mubr.f32.gmra.mrb[118].mxu0 %v2949_v32 }
 0x4c3   :  { %4519 = vmatprep.mubr.msk.f32.mxu0 %vm4830_vm1, %v4831_v9 }
 0x4e9   :  { %v3244_v45 = vpop.f32.mrb[120].mxu1 }
 0x4ea   :  { %v3245_v49 = vadd.f32 %v6294_v33, %v3244_v45  ;;  %v3246_v15 = vpop.f32.mrb[121].mxu1 }
 0x4ec   :  { %vm3339_vm3 = vcmp.gt.f32.partialorder %v3245_v49, 0.0  ;;  %v3371_v0 = vmul.f32 0.2, %v3245_v49 }
 0x4ed   :  { %v3249_v7 = vpop.f32.mrb[122].mxu1 }
 0x4ee   :  { %v3250_v60 = vadd.f32 %v6294_v33, %v3249_v7  ;;  %v3251_v23 = vpop.f32.mrb[123].mxu1  ;;  %v3403_v6 = vsel %vm3339_vm3, %v3245_v49, %v3371_v0 }
 0x4ef   :  { %v3442_v28 = vmul.f32 %v6300_v11, %v3403_v6 }
 0x4f0   :  { %vm3340_vm4 = vcmp.gt.f32.partialorder %v3250_v60, 0.0  ;;  %v3372_v31 = vmul.f32 0.2, %v3250_v60 }
 0x4f1   :  { %v3254_v62 = vpop.f32.mrb[124].mxu1  ;;  %v3506_v10 = vsel %vm221_vm2, %v3442_v28, 0.0 }
 0x4f2   :  { %v3255_v9 = vadd.f32 %v6294_v33, %v3254_v62  ;;  %3507 = vadd.xlane.f32.xlu0 %v3506_v10  ;;  %v3256_v34 = vpop.f32.mrb[125].mxu1  ;;  %v3404_v19 = vsel %vm3340_vm4, %v3250_v60, %v3372_v31 }
 0x4f3   :  { %v3443_v39 = vmul.f32 %v6300_v11, %v3404_v19 }
 0x4f4   :  { %vm3341_vm1 = vcmp.gt.f32.partialorder %v3255_v9, 0.0  ;;  %v3373_v41 = vmul.f32 0.2, %v3255_v9 }
 0x4f5   :  { %v3259_v27 = vpop.f32.mrb[126].mxu1  ;;  %v3509_v44 = vsel %vm221_vm2, %v3443_v39, 0.0 }
 0x4f6   :  { %v3260_v46 = vadd.f32 %v6294_v33, %v3259_v27  ;;  %v3261_v21 = vpop.f32.mrb[127].mxu1  ;;  %3510 = vadd.xlane.f32.xlu1 %v3509_v44  ;;  %v3405_v56 = vsel %vm3341_vm1, %v3255_v9, %v3373_v41 }
 0x4f7   :  { %v3444_v13 = vmul.f32 %v6300_v11, %v3405_v56 }
 0x4f8   :  { %vm3342_vm5 = vcmp.gt.f32.partialorder %v3260_v46, 0.0  ;;  %v3374_v61 = vmul.f32 0.2, %v3260_v46 }
 0x4f9   :  { %v3264_v42 = vpop.f32.mrb[128].mxu1  ;;  %v3512_v59 = vsel %vm221_vm2, %v3444_v13, 0.0 }
 0x4fa   :  { %v3265_v50 = vadd.f32 %v6294_v33, %v3264_v42  ;;  %v3266_v37 = vpop.f32.mrb[129].mxu1  ;;  %3513 = vadd.xlane.f32.xlu0 %v3512_v59  ;;  %v3406_v2 = vsel %vm3342_vm5, %v3260_v46, %v3374_v61 }
 0x4fb   :  { %v3445_v30 = vmul.f32 %v6300_v11, %v3406_v2 }
 0x4fc   :  { %vm3343_vm6 = vcmp.gt.f32.partialorder %v3265_v50, 0.0  ;;  %v3375_v1 = vmul.f32 0.2, %v3265_v50 }
 0x4fd   :  { %v3269_v35 = vpop.f32.mrb[130].mxu1  ;;  %v3515_v38 = vsel %vm221_vm2, %v3445_v30, 0.0 }
 0x4fe   :  { %v3270_v47 = vadd.f32 %v6294_v33, %v3269_v35  ;;  %v3271_v53 = vpop.f32.mrb[131].mxu1  ;;  %3516 = vadd.xlane.f32.xlu1 %v3515_v38  ;;  %v3407_v57 = vsel %vm3343_vm6, %v3265_v50, %v3375_v1 }
 0x4ff   :  { %v3446_v52 = vmul.f32 %v6300_v11, %v3407_v57 }
 0x500   :  { %vm3344_vm7 = vcmp.gt.f32.partialorder %v3270_v47, 0.0  ;;  %v3376_v55 = vmul.f32 0.2, %v3270_v47 }
 0x501   :  { %v3274_v17 = vpop.f32.mrb[132].mxu1  ;;  %v3518_v63 = vsel %vm221_vm2, %v3446_v52, 0.0 }
 0x502   :  { %v3275_v58 = vadd.f32 %v6294_v33, %v3274_v17  ;;  %v3276_v12 = vpop.f32.mrb[133].mxu1  ;;  %3519 = vadd.xlane.f32.xlu1 %v3518_v63  ;;  %v3408_v14 = vsel %vm3344_vm7, %v3270_v47, %v3376_v55 }
 0x503   :  { %v3447_v18 = vmul.f32 %v6300_v11, %v3408_v14 }
 0x504   :  { %vm3345_vm8 = vcmp.gt.f32.partialorder %v3275_v58, 0.0  ;;  %v3377_v16 = vmul.f32 0.2, %v3275_v58 }
 0x505   :  { %v6538_v26 = vpop.f32.mrb[134].mxu1  ;;  %v3521_v54 = vsel %vm221_vm2, %v3447_v18, 0.0 }
 0x506   :  { %v3281_v4 = vpop.f32.mrb[135].mxu1  ;;  %3522 = vadd.xlane.f32.xlu1 %v3521_v54  ;;  %v3409_v51 = vsel %vm3345_vm8, %v3275_v58, %v3377_v16 }
 0x507   :  { %v3448_v48 = vmul.f32 %v6300_v11, %v3409_v51 }
 0x509   :  { %v3524_v20 = vsel %vm221_vm2, %v3448_v48, 0.0 }
 0x50a   :  { %3525 = vadd.xlane.f32.xlu1 %v3524_v20 }
 0x555   :  { %v3284_v25 = vpop.f32.mrb[136].mxu1 }
 0x556   :  { %v3285_v36 = vadd.f32 %v6294_v33, %v3284_v25  ;;  %v3286_v43 = vpop.f32.mrb[137].mxu1 }
 0x558   :  { %vm3347_vm9 = vcmp.gt.f32.partialorder %v3285_v36, 0.0  ;;  %v3379_v22 = vmul.f32 0.2, %v3285_v36 }
 0x559   :  { %v3289_v24 = vpop.f32.mrb[138].mxu1 }
 0x55a   :  { %v3290_v40 = vadd.f32 %v6294_v33, %v3289_v24  ;;  %v3291_v29 = vpop.f32.mrb[139].mxu1  ;;  %v3411_v32 = vsel %vm3347_vm9, %v3285_v36, %v3379_v22 }
 0x55b   :  { %v3450_v45 = vmul.f32 %v6300_v11, %v3411_v32 }
 0x55c   :  { %vm3348_vm10 = vcmp.gt.f32.partialorder %v3290_v40, 0.0  ;;  %v3380_v49 = vmul.f32 0.2, %v3290_v40 }
 0x55d   :  { %v3294_v15 = vpop.f32.mrb[140].mxu1  ;;  %v3530_v0 = vsel %vm221_vm2, %v3450_v45, 0.0 }
 0x55e   :  { %v3295_v7 = vadd.f32 %v6294_v33, %v3294_v15  ;;  %3531 = vadd.xlane.f32.xlu1 %v3530_v0  ;;  %v3296_v60 = vpop.f32.mrb[141].mxu1  ;;  %v3412_v23 = vsel %vm3348_vm10, %v3290_v40, %v3380_v49 }
 0x55f   :  { %v3451_v6 = vmul.f32 %v6300_v11, %v3412_v23 }
 0x560   :  { %vm3349_vm11 = vcmp.gt.f32.partialorder %v3295_v7, 0.0  ;;  %v3381_v28 = vmul.f32 0.2, %v3295_v7 }
 0x561   :  { %v3299_v31 = vpop.f32.mrb[142].mxu1  ;;  %v3533_v62 = vsel %vm221_vm2, %v3451_v6, 0.0 }
 0x562   :  { %v3300_v10 = vadd.f32 %v6294_v33, %v3299_v31  ;;  %v3301_v9 = vpop.f32.mrb[143].mxu1  ;;  %3534 = vadd.xlane.f32.xlu0 %v3533_v62  ;;  %v3413_v34 = vsel %vm3349_vm11, %v3295_v7, %v3381_v28 }
 0x563   :  { %v3452_v19 = vmul.f32 %v6300_v11, %v3413_v34 }
 0x564   :  { %vm3350_vm12 = vcmp.gt.f32.partialorder %v3300_v10, 0.0  ;;  %v3382_v39 = vmul.f32 0.2, %v3300_v10 }
 0x565   :  { %v3304_v41 = vpop.f32.mrb[144].mxu1  ;;  %v3536_v27 = vsel %vm221_vm2, %v3452_v19, 0.0 }
 0x566   :  { %v3305_v44 = vadd.f32 %v6294_v33, %v3304_v41  ;;  %v3306_v46 = vpop.f32.mrb[145].mxu1  ;;  %3537 = vadd.xlane.f32.xlu0 %v3536_v27  ;;  %v3414_v21 = vsel %vm3350_vm12, %v3300_v10, %v3382_v39 }
 0x567   :  { %v3453_v56 = vmul.f32 %v6300_v11, %v3414_v21 }
 0x568   :  { %vm3351_vm13 = vcmp.gt.f32.partialorder %v3305_v44, 0.0  ;;  %v3383_v13 = vmul.f32 0.2, %v3305_v44 }
 0x569   :  { %v3309_v61 = vpop.f32.mrb[146].mxu1  ;;  %v3539_v42 = vsel %vm221_vm2, %v3453_v56, 0.0 }
 0x56a   :  { %v3311_v59 = vpop.f32.mrb[147].mxu1  ;;  %3540 = vadd.xlane.f32.xlu0 %v3539_v42  ;;  %v3415_v50 = vsel %vm3351_vm13, %v3305_v44, %v3383_v13  ;;  %v3310_v54 = vadd.f32 %v6294_v33, %v3309_v61 }
 0x56b   :  { %v3454_v37 = vmul.f32 %v6300_v11, %v3415_v50 }
 0x56c   :  { %v3384_v22 = vmul.f32 0.2, %v3310_v54  ;;  %vm3352_vm4 = vcmp.gt.f32.partialorder %v3310_v54, 0.0 }
 0x56d   :  { %v3314_v2 = vpop.f32.mrb[148].mxu1  ;;  %v3542_v30 = vsel %vm221_vm2, %v3454_v37, 0.0 }
 0x56e   :  { %v3316_v1 = vpop.f32.mrb[149].mxu1  ;;  %3543 = vadd.xlane.f32.xlu0 %v3542_v30  ;;  %v3315_v24 = vadd.f32 %v6294_v33, %v3314_v2  ;;  %v3416_v28 = vsel %vm3352_vm4, %v3310_v54, %v3384_v22  ;;  %v3554_v54 = vld [vmem:[%s6772_s14] sm:$0xff]  ;;  %vm3626_vm4 = vcmask 326912  }
 0x56f   :  { %v3455_v34 = vmul.f32 %v6300_v11, %v3416_v28 }
 0x570   :  { %v3385_v7 = vmul.f32 0.2, %v3315_v24  ;;  %vm3353_vm5 = vcmp.gt.f32.partialorder %v3315_v24, 0.0 }
 0x571   :  { %v3164_v35 = vpop.f32.mrb[100].mxu0  ;;  %v6558_v38 = vpop.f32.mrb[150].mxu1  ;;  %v3545_v13 = vsel %vm221_vm2, %v3455_v34, 0.0 }
 0x572   :  { %v3165_v47 = vadd.f32 %v6294_v33, %v3164_v35  ;;  %v3166_v53 = vpop.f32.mrb[101].mxu0  ;;  %v3321_v57 = vpop.f32.mrb[151].mxu1  ;;  %v3417_v27 = vsel %vm3353_vm5, %v3315_v24, %v3385_v7  ;;  %vm3640_vm5 = vcmask 458112  }
 0x573   :  { %v3456_v61 = vmul.f32 %v6300_v11, %v3417_v27 }
 0x574   :  { %vm3323_vm14 = vcmp.gt.f32.partialorder %v3165_v47, 0.0  ;;  %v3355_v52 = vmul.f32 0.2, %v3165_v47 }
 0x575   :  { %v3169_v55 = vpop.f32.mrb[102].mxu0  ;;  %v3548_v35 = vsel %vm221_vm2, %v3456_v61, 0.0 }
 0x576   :  { %v3170_v17 = vadd.f32 %v6294_v33, %v3169_v55  ;;  %v3171_v63 = vpop.f32.mrb[103].mxu0  ;;  %v3387_v58 = vsel %vm3323_vm14, %v3165_v47, %v3355_v52  ;;  %vm3605_vm14 = vcmask 130112  }
 0x577   :  { %v3426_v12 = vmul.f32 %v6300_v11, %v3387_v58  ;;  %v3280_v58 = vadd.f32 %v6294_v33, %v6538_v26 }
 0x578   :  { %vm3324_vm15 = vcmp.gt.f32.partialorder %v3170_v17, 0.0  ;;  %v3356_v14 = vmul.f32 0.2, %v3170_v17 }
 0x579   :  { %v3174_v18 = vpop.f32.mrb[104].mxu0  ;;  %v3458_v16 = vsel %vm221_vm2, %v3426_v12, 0.0  ;;  %vm3346_vm11 = vcmp.gt.f32.partialorder %v3280_v58, 0.0 }
 0x57a   :  { %v3175_v4 = vadd.f32 %v6294_v33, %v3174_v18  ;;  %v3176_v51 = vpop.f32.mrb[105].mxu0  ;;  %3459 = vadd.xlane.f32.xlu0 %v3458_v16  ;;  %v3388_v48 = vsel %vm3324_vm15, %v3170_v17, %v3356_v14  ;;  %vm3612_vm15 = vcmask 195712  }
 0x57b   :  { %v3427_v20 = vmul.f32 %v6300_v11, %v3388_v48 }
 0x57c   :  { %vm3325_vm3 = vcmp.gt.f32.partialorder %v3175_v4, 0.0  ;;  %v3357_v25 = vmul.f32 0.2, %v3175_v4 }
 0x57d   :  { %v3179_v36 = vpop.f32.mrb[106].mxu0  ;;  %v3461_v43 = vsel %vm221_vm2, %v3427_v20, 0.0 }
 0x57e   :  { %v3180_v40 = vadd.f32 %v6294_v33, %v3179_v36  ;;  %v3181_v29 = vpop.f32.mrb[107].mxu0  ;;  %3462 = vadd.xlane.f32.xlu0 %v3461_v43  ;;  %v3389_v32 = vsel %vm3325_vm3, %v3175_v4, %v3357_v25  ;;  %v3555_v4 = vld [vmem:[%s6772_s14 + $0x8] sm:$0xff]  ;;  %v3378_v25 = vmul.f32 0.2, %v3280_v58  ;;  %v3320_v36 = vadd.f32 %v6294_v33, %v6558_v38  ;;  %v3557_v38 = vld [vmem:[%s6772_s14 + $0x18] sm:$0xff] }
 0x57f   :  { %v3428_v45 = vmul.f32 %v6300_v11, %v3389_v32  ;;  %v4777_v48 = vpack.c.bf16 %v3555_v4, %v3554_v54  ;;  %vm3619_vm3 = vcmask 261312  }
 0x580   :  { %vm3326_vm1 = vcmp.gt.f32.partialorder %v3180_v40, 0.0  ;;  %v3358_v49 = vmul.f32 0.2, %v3180_v40  ;;  %vm3354_vm13 = vcmp.gt.f32.partialorder %v3320_v36, 0.0 }
 0x581   :  { %v3184_v15 = vpop.f32.mrb[108].mxu0  ;;  %v3464_v0 = vsel %vm221_vm2, %v3428_v45, 0.0  ;;  %4778 = vmatpush3.bf16.msra.mxu0 %v4777_v48  ;;  %v3386_v45 = vmul.f32 0.2, %v3320_v36 }
 0x582   :  { %v3185_v60 = vadd.f32 %v6294_v33, %v3184_v15  ;;  %v3186_v23 = vpop.f32.mrb[109].mxu0  ;;  %3465 = vadd.xlane.f32.xlu0 %v3464_v0  ;;  %v3390_v6 = vsel %vm3326_vm1, %v3180_v40, %v3358_v49  ;;  %4779 = vmatprep.subr.bf16.mxu0 %v4829_v3  ;;  %v3410_v15 = vsel %vm3346_vm11, %v3280_v58, %v3378_v25  ;;  %vm3633_vm1 = vcmask 392512  }
 0x583   :  { %v3429_v31 = vmul.f32 %v6300_v11, %v3390_v6  ;;  %v3449_v23 = vmul.f32 %v6300_v11, %v3410_v15  ;;  %v3418_v6 = vsel %vm3354_vm13, %v3320_v36, %v3386_v45 }
 0x584   :  { %vm3327_vm6 = vcmp.gt.f32.partialorder %v3185_v60, 0.0  ;;  %v3359_v62 = vmul.f32 0.2, %v3185_v60 }
 0x585   :  { %v3189_v10 = vpop.f32.mrb[110].mxu0  ;;  %v3467_v9 = vsel %vm221_vm2, %v3429_v31, 0.0  ;;  %v3527_v28 = vsel %vm221_vm2, %v3449_v23, 0.0  ;;  %v3457_v31 = vmul.f32 %v6300_v11, %v3418_v6 }
 0x586   :  { %v3190_v19 = vadd.f32 %v6294_v33, %v3189_v10  ;;  %v3191_v39 = vpop.f32.mrb[111].mxu0  ;;  %3468 = vadd.xlane.f32.xlu0 %v3467_v9  ;;  %v3391_v41 = vsel %vm3327_vm6, %v3185_v60, %v3359_v62  ;;  %v3558_v10 = vld [vmem:[%s6772_s14 + $0x20] sm:$0xff]  ;;  %v3559_v9 = vld [vmem:[%s6772_s14 + $0x28] sm:$0xff]  ;;  %vm3647_vm6 = vcmask 523712  }
 0x587   :  { %v3430_v44 = vmul.f32 %v6300_v11, %v3391_v41  ;;  %v3551_v62 = vsel %vm221_vm2, %v3457_v31, 0.0  ;;  %v4783_v34 = vpack.c.bf16 %v3559_v9, %v3558_v10  ;;  %v6631_v41 = vpop.xlane.xlu0 %3495 }
 0x588   :  { %vm3328_vm7 = vcmp.gt.f32.partialorder %v3190_v19, 0.0  ;;  %v3360_v46 = vmul.f32 0.2, %v3190_v19 }
 0x589   :  { %v3194_v21 = vpop.f32.mrb[112].mxu0  ;;  %v3470_v56 = vsel %vm221_vm2, %v3430_v44, 0.0 }
 0x58a   :  { %v3195_v42 = vadd.f32 %v6294_v33, %v3194_v21  ;;  %v3196_v59 = vpop.f32.mrb[113].mxu0  ;;  %3471 = vadd.xlane.f32.xlu1 %v3470_v56  ;;  %3546 = vadd.xlane.f32.xlu0 %v3545_v13  ;;  %v3392_v50 = vsel %vm3328_vm7, %v3190_v19, %v3360_v46  ;;  %v3561_v19 = vld [vmem:[%s6772_s14 + $0x38] sm:$0xff]  ;;  %v6639_v21 = vpop.xlane.xlu1 %3489  ;;  %vm3767_vm7 = vcmask 1042434  }
 0x58b   :  { %v3431_v37 = vmul.f32 %v6300_v11, %v3392_v50  ;;  %v6633_v27 = vpop.xlane.xlu0 %3498 }
 0x58c   :  { %vm3329_vm8 = vcmp.gt.f32.partialorder %v3195_v42, 0.0  ;;  %v3361_v2 = vmul.f32 0.2, %v3195_v42 }
 0x58d   :  { %v3199_v30 = vpop.f32.mrb[114].mxu0  ;;  %v3473_v1 = vsel %vm221_vm2, %v3431_v37, 0.0 }
 0x58e   :  { %v3200_v47 = vadd.f32 %v6294_v33, %v3199_v30  ;;  %v3201_v53 = vpop.f32.mrb[115].mxu0  ;;  %3474 = vadd.xlane.f32.xlu1 %v3473_v1  ;;  %3549 = vadd.xlane.f32.xlu0 %v3548_v35  ;;  %v3393_v57 = vsel %vm3329_vm8, %v3195_v42, %v3361_v2  ;;  %v6641_v56 = vpop.xlane.xlu1 %3492  ;;  %vm3769_vm8 = vcmask 1043459  }
 0x58f   :  { %v3432_v52 = vmul.f32 %v6300_v11, %v3393_v57  ;;  %v6635_v44 = vpop.xlane.xlu0 %3501 }
 0x590   :  { %vm3330_vm9 = vcmp.gt.f32.partialorder %v3200_v47, 0.0  ;;  %v3362_v55 = vmul.f32 0.2, %v3200_v47 }
 0x591   :  { %v3204_v17 = vpop.f32.mrb[116].mxu0  ;;  %v3476_v63 = vsel %vm221_vm2, %v3432_v52, 0.0 }
 0x592   :  { %v3205_v12 = vadd.f32 %v6294_v33, %v3204_v17  ;;  %v3206_v14 = vpop.f32.mrb[117].mxu0  ;;  %3477 = vadd.xlane.f32.xlu1 %v3476_v63  ;;  %v3394_v18 = vsel %vm3330_vm9, %v3200_v47, %v3362_v55  ;;  %v3511_v61 = vpop.xlane.xlu1 %3510  ;;  %v3595_v55 = vand.u32 127, %v1439_v5 }
 0x593   :  { %v3433_v16 = vmul.f32 %v6300_v11, %v3394_v18  ;;  %v6637_v46 = vpop.xlane.xlu0 %3504 }
 0x594   :  { %vm3331_vm10 = vcmp.gt.f32.partialorder %v3205_v12, 0.0  ;;  %v3363_v51 = vmul.f32 0.2, %v3205_v12  ;;  %v3600_v17 = vadd.s32 4294967288, %v3595_v55  ;;  %v3607_v58 = vadd.s32 4294967280, %v3595_v55 }
 0x595   :  { %v3209_v20 = vpop.f32.mrb[118].mxu0  ;;  %v3479_v26 = vsel %vm221_vm2, %v3433_v16, 0.0  ;;  %v3614_v14 = vadd.s32 4294967272, %v3595_v55  ;;  %v3621_v18 = vadd.s32 4294967264, %v3595_v55  ;;  %v3628_v16 = vadd.s32 4294967256, %v3595_v55 }
 0x596   :  { %v3210_v43 = vadd.f32 %v6294_v33, %v3209_v20  ;;  %v3211_v22 = vpop.f32.mrb[119].mxu0  ;;  %3480 = vadd.xlane.f32.xlu1 %v3479_v26  ;;  %v3395_v24 = vsel %vm3331_vm10, %v3205_v12, %v3363_v51  ;;  %v3556_v33 = vld [vmem:[%s6772_s14 + $0x10] sm:$0xff]  ;;  %v3517_v59 = vpop.xlane.xlu1 %3516  ;;  %v3603_v54 = vsub.s32 %v3600_v17, %v5859_v8  ;;  %v3642_v51 = vadd.s32 4294967240, %v3595_v55 }
 0x597   :  { %v3434_v40 = vmul.f32 %v6300_v11, %v3395_v24  ;;  %v4780_v7 = vpack.c.bf16 %v3557_v38, %v3556_v33  ;;  %v3610_v48 = vsub.s32 %v3607_v58, %v5859_v8  ;;  %v3635_v20 = vadd.s32 4294967248, %v3595_v55 }
 0x598   :  { %vm3332_vm12 = vcmp.gt.f32.partialorder %v3210_v43, 0.0  ;;  %v3364_v29 = vmul.f32 0.2, %v3210_v43  ;;  %v6669_v26 = vsub.s32 %v3614_v14, %v5859_v8  ;;  %v3598_v5 = vsub.s32 %v3595_v55, %v5859_v8 }
 0x599   :  { %v3482_v32 = vsel %vm221_vm2, %v3434_v40, 0.0  ;;  %4781 = vmatpush3.bf16.msra.mxu0 %v4780_v7  ;;  %v6673_v25 = vsub.s32 %v3621_v18, %v5859_v8  ;;  %v3695_v22 = vrot.slane %v3511_v61, %v3603_v54  ;;  %v6681_v40 = vsub.s32 %v3642_v51, %v5859_v8 }
 0x59a   :  { %3483 = vadd.xlane.f32.xlu1 %v3482_v32  ;;  %v3396_v49 = vsel %vm3332_vm12, %v3210_v43, %v3364_v29  ;;  %4782 = vmatprep.subr.bf16.mxu0 %v4829_v3  ;;  %v3520_v37 = vpop.xlane.xlu1 %3519  ;;  %v6676_v43 = vsub.s32 %v3628_v16, %v5859_v8  ;;  %v6684_v32 = vsub.s32 %v3635_v20, %v5859_v8 }
 0x59b   :  { %v3435_v0 = vmul.f32 %v6300_v11, %v3396_v49  ;;  %v3560_v11 = vld [vmem:[%s6772_s14 + $0x30] sm:$0xff]  ;;  %v3705_v49 = vrot.slane %v3517_v59, %v6669_v26  ;;  %v3671_v15 = vrot.slane %v6631_v41, %v6673_v25  ;;  %v3710_v38 = vrot.slane %v3520_v37, %v6673_v25 }
 0x59c   :  { %v4786_v39 = vpack.c.bf16 %v3561_v19, %v3560_v11  ;;  %v3676_v33 = vrot.slane %v6633_v27, %v6676_v43  ;;  %v3681_v23 = vrot.slane %v6635_v44, %v6684_v32  ;;  %v3686_v6 = vrot.slane %v6637_v46, %v6681_v40 }
 0x59d   :  { %v3485_v60 = vsel %vm221_vm2, %v3435_v0, 0.0  ;;  %4784 = vmatpush3.bf16.msra.mxu0 %v4783_v34  ;;  %v3661_v11 = vrot.slane %v6639_v21, %v3610_v48  ;;  %v3666_v41 = vrot.slane %v6641_v56, %v6669_v26 }
 0x59e   :  { %3486 = vadd.xlane.f32.xlu1 %v3485_v60  ;;  %4785 = vmatprep.subr.bf16.mxu0 %v4829_v3  ;;  %v3508_v3 = vpop.xlane.xlu0 %3507  ;;  %v3523_v30 = vpop.xlane.xlu1 %3522 }
 0x59f   :  { %v3691_v45 = vrot.slane %v3508_v3, %v3598_v5  ;;  %v3715_v7 = vrot.slane %v3523_v30, %v6676_v43 }
 0x5a1   :  { %4787 = vmatpush3.bf16.msra.mxu0 %v4786_v39  ;;  %v3696_v0 = vsel %vm3605_vm14, %v3695_v22, %v3691_v45 }
 0x5a2   :  { %3528 = vadd.xlane.f32.xlu1 %v3527_v28  ;;  %v3514_v13 = vpop.xlane.xlu0 %3513  ;;  %v6651_v35 = vpop.xlane.xlu1 %3525 }
 0x5a3   :  { %v3700_v29 = vrot.slane %v3514_v13, %v3610_v48  ;;  %v3720_v10 = vrot.slane %v6651_v35, %v6684_v32 }
 0x5a5   :  { %v3701_v28 = vsel %vm3612_vm15, %v3700_v29, %v3696_v0 }
 0x5a6   :  { %3552 = vadd.xlane.f32.xlu1 %v3551_v62  ;;  %v3706_v62 = vsel %vm3619_vm3, %v3705_v49, %v3701_v28 }
 0x5a7   :  { %v3711_v19 = vsel %vm3626_vm4, %v3710_v38, %v3706_v62 }
 0x5a8   :  { %v3716_v27 = vsel %vm3633_vm1, %v3715_v7, %v3711_v19 }
 0x5a9   :  { %v3721_v59 = vsel %vm3640_vm5, %v3720_v10, %v3716_v27 }
 0x5eb   :  { %v3532_v53 = vpop.xlane.xlu1 %3531 }
 0x5ec   :  { %v3730_v9 = vrot.slane %v3532_v53, %v3598_v5 }
 0x5ef   :  { %v6643_v42 = vpop.xlane.xlu0 %3534 }
 0x5f0   :  { %v3734_v8 = vrot.slane %v6643_v42, %v3603_v54 }
 0x5f2   :  { %v3735_v44 = vsel %vm3605_vm14, %v3734_v8, %v3730_v9 }
 0x5f3   :  { %v6645_v50 = vpop.xlane.xlu0 %3537 }
 0x5f4   :  { %v3739_v34 = vrot.slane %v6645_v50, %v3610_v48 }
 0x5f6   :  { %v3740_v50 = vsel %vm3612_vm15, %v3739_v34, %v3735_v44 }
 0x5f7   :  { %v6647_v2 = vpop.xlane.xlu0 %3540 }
 0x5f8   :  { %v3744_v37 = vrot.slane %v6647_v2, %v6669_v26 }
 0x5fb   :  { %v6649_v1 = vpop.xlane.xlu0 %3543 }
 0x607   :  { %v6653_v47 = vpop.xlane.xlu0 %3459 }
 0x608   :  { %v3599_v13 = vrot.slane %v6653_v47, %v3598_v5 }
 0x60b   :  { %v6655_v57 = vpop.xlane.xlu0 %3462 }
 0x60c   :  { %v3604_v39 = vrot.slane %v6655_v57, %v3603_v54  ;;  %v3749_v57 = vrot.slane %v6649_v1, %v6673_v25 }
 0x60e   :  { %v3606_v30 = vsel %vm3605_vm14, %v3604_v39, %v3599_v13 }
 0x60f   :  { %v6662_v12 = vpop.xlane.xlu0 %3465 }
 0x610   :  { %v3611_v46 = vrot.slane %v6662_v12, %v3610_v48 }
 0x612   :  { %v3613_v55 = vsel %vm3612_vm15, %v3611_v46, %v3606_v30 }
 0x613   :  { %v3469_v36 = vpop.xlane.xlu0 %3468 }
 0x614   :  { %v3618_v61 = vrot.slane %v3469_v36, %v6669_v26 }
 0x616   :  { %v3620_v2 = vsel %vm3619_vm3, %v3618_v61, %v3613_v55 }
 0x617   :  { %v6657_v52 = vpop.xlane.xlu1 %3471  ;;  %v3547_v31 = vpop.xlane.xlu0 %3546 }
 0x618   :  { %v3625_v56 = vrot.slane %v6657_v52, %v6673_v25  ;;  %v3754_v12 = vrot.slane %v3547_v31, %v6676_v43 }
 0x61a   :  { %v3627_v18 = vsel %vm3626_vm4, %v3625_v56, %v3620_v2 }
 0x61b   :  { %v6660_v63 = vpop.xlane.xlu1 %3474  ;;  %v3550_v47 = vpop.xlane.xlu0 %3549 }
 0x61c   :  { %v3632_v35 = vrot.slane %v6660_v63, %v6676_v43  ;;  %v3759_v1 = vrot.slane %v3550_v47, %v6684_v32 }
 0x61e   :  { %v3634_v51 = vsel %vm3633_vm1, %v3632_v35, %v3627_v18 }
 0x61f   :  { %v6665_v4 = vpop.xlane.xlu1 %3477 }
 0x620   :  { %v3639_v52 = vrot.slane %v6665_v4, %v6684_v32  ;;  %v3745_v4 = vsel %vm3619_vm3, %v3744_v37, %v3740_v50 }
 0x621   :  { %v3750_v20 = vsel %vm3626_vm4, %v3749_v57, %v3745_v4 }
 0x622   :  { %v3641_v26 = vsel %vm3640_vm5, %v3639_v52, %v3634_v51  ;;  %v3755_v36 = vsel %vm3633_vm1, %v3754_v12, %v3750_v20 }
 0x623   :  { %v6678_v24 = vpop.xlane.xlu1 %3480  ;;  %v3760_v29 = vsel %vm3640_vm5, %v3759_v1, %v3755_v36 }
 0x624   :  { %v3646_v63 = vrot.slane %v6678_v24, %v6681_v40 }
 0x626   :  { %v3648_v43 = vsel %vm3647_vm6, %v3646_v63, %v3641_v26 }
 0x627   :  { %v3484_v60 = vpop.xlane.xlu1 %3483 }
 0x628   :  { %v3652_v21 = vrot.slane %v3484_v60, %v3598_v5 }
 0x62b   :  { %v3487_v3 = vpop.xlane.xlu1 %3486 }
 0x62c   :  { %v3656_v42 = vrot.slane %v3487_v3, %v3603_v54 }
 0x62e   :  { %v3657_v53 = vsel %vm3605_vm14, %v3656_v42, %v3652_v21 }
 0x62f   :  { %v3662_v17 = vsel %vm3612_vm15, %v3661_v11, %v3657_v53  ;;  %v3529_v58 = vpop.xlane.xlu1 %3528 }
 0x630   :  { %v3667_v14 = vsel %vm3619_vm3, %v3666_v41, %v3662_v17  ;;  %v3725_v54 = vrot.slane %v3529_v58, %v6681_v40 }
 0x631   :  { %v3672_v16 = vsel %vm3626_vm4, %v3671_v15, %v3667_v14 }
 0x632   :  { %v3677_v48 = vsel %vm3633_vm1, %v3676_v33, %v3672_v16  ;;  %v3726_v32 = vsel %vm3647_vm6, %v3725_v54, %v3721_v59 }
 0x633   :  { %v3682_v5 = vsel %vm3640_vm5, %v3681_v23, %v3677_v48  ;;  %v3553_v25 = vpop.xlane.xlu1 %3552 }
 0x634   :  { %v3687_v22 = vsel %vm3647_vm6, %v3686_v6, %v3682_v5  ;;  %v3764_v24 = vrot.slane %v3553_v25, %v6681_v40 }
 0x635   :  { %v3766_v45 = vsel %vm129_vm0, %v3687_v22, %v3648_v43 }
 0x636   :  { %v3768_v49 = vsel %vm3767_vm7, %v3726_v32, %v3766_v45  ;;  %v3765_v15 = vsel %vm3647_vm6, %v3764_v24, %v3760_v29 }
 0x637   :  { %v3770_v33 = vsel %vm3769_vm8, %v3765_v15, %v3768_v49 }
 0x638   :  { %4520 = vmatmul.mubr.msk.f32.vlgmr.msra.gmra.mrb[120].mxu0 %vm221_vm2, %v3770_v33 }
 0x70b   :  { %v3839_v38 = vpop.f32.mrb[120].mxu0 }
 0x70c   :  { %3843 = vst [vmem:[%s6773_s16] sm:$0xf] %v3839_v38  ;;  %v4521_v0 = vpop.f32.mrb[121].mxu0 }

</bundles_post_ra>
